<compile_context>
chip_gen: v6e
topology: v6e:2x2x1
jax: 0.10.0
libtpu: 0.0.40
codegen_flags: <defaults>
</compile_context>

<pallas_src>
import jax
import jax.numpy as jnp
from jax.experimental import pallas as pl
from jax.experimental.pallas import tpu as pltpu

IMAGE_SIZE = 28 * 28          # 784
IMAGE_PAD = 896               # 7 * 128, lane-aligned K for the first matmul
H1, H2, H3, OUT = 1024, 512, 256, 1
NEG_SLOPE = 0.2


def _round_up(x, m):
    return ((x + m - 1) // m) * m


def _leaky_relu(x, slope=NEG_SLOPE):
    return jnp.where(x >= 0, x, slope * x)


def _sigmoid(z):
    # exp(-z) may overflow to inf for very negative z; 1/inf saturates to 0,
    # matching torch.sigmoid semantics.
    return 1.0 / (1.0 + jnp.exp(-z))


def discriminator_kernel(x_ref,
                         w1_ref, b1_ref,
                         w2_ref, b2_ref,
                         w3_ref, b3_ref,
                         w4_ref, b4_ref,
                         o_ref):
    # x tile: (TB, 896) bf16; weights: bf16; biases: f32; all dots accumulate f32.
    x = x_ref[...]

    h = jnp.dot(x, w1_ref[...], preferred_element_type=jnp.float32)     # (TB, 1024)
    h = _leaky_relu(h + b1_ref[...])

    h = jnp.dot(h.astype(jnp.bfloat16), w2_ref[...],
                preferred_element_type=jnp.float32)                      # (TB, 512)
    h = _leaky_relu(h + b2_ref[...])

    h = jnp.dot(h.astype(jnp.bfloat16), w3_ref[...],
                preferred_element_type=jnp.float32)                      # (TB, 256)
    h = _leaky_relu(h + b3_ref[...])

    # Final 256 -> 1 layer: N=1 is a degenerate MXU shape, do it on the VPU/XLU.
    z = jnp.sum(h * w4_ref[...], axis=-1, keepdims=True) + b4_ref[...]   # (TB, 1)
    o_ref[...] = _sigmoid(z)


def discriminator_forward(x, params):
    """x: (B, 784) float32; params: dict (see init_params). Returns (B, 1) f32."""
    B = x.shape[0]

    # Batch tile: multiple of 16 (bf16 sublane packing), capped at 256
    # (MXU row height). Pad batch to a multiple of the tile.
    TB = min(256, _round_up(max(B, 1), 16))
    B_pad = _round_up(B, TB)

    # Cast to bf16 in the wrapper (halves x HBM traffic; the kernel consumed
    # bf16 anyway), then zero-pad batch and features 784 -> 896.
    x_pad = jnp.pad(x.astype(jnp.bfloat16),
                    ((0, B_pad - B), (0, IMAGE_PAD - IMAGE_SIZE)))

    w1, b1 = params["w1"], params["b1"]
    w2, b2 = params["w2"], params["b2"]
    w3, b3 = params["w3"], params["b3"]
    w4, b4 = params["w4"], params["b4"]

    # Weights/biases: constant block index -> DMA'd once, stay resident in
    # VMEM across the batch grid while x / out tiles are pipelined.
    resident = lambda shape: pl.BlockSpec(shape, lambda i: (0, 0))

    out = pl.pallas_call(
        discriminator_kernel,
        out_shape=jax.ShapeDtypeStruct((B_pad, OUT), jnp.float32),
        grid=(B_pad // TB,),
        in_specs=[
            pl.BlockSpec((TB, IMAGE_PAD), lambda i: (i, 0)),
            resident((IMAGE_PAD, H1)), resident((1, H1)),
            resident((H1, H2)),        resident((1, H2)),
            resident((H2, H3)),        resident((1, H3)),
            resident((1, H3)),         resident((1, 1)),
        ],
        out_specs=pl.BlockSpec((TB, OUT), lambda i: (i, 0)),
        compiler_params=pltpu.CompilerParams(
            dimension_semantics=("parallel",),
            vmem_limit_bytes=32 << 20,
        ),
    )(x_pad, w1, b1, w2, b2, w3, b3, w4, b4)

    return out[:B]


def init_params(key):
    """Deterministic synthetic init (PyTorch-like uniform fan_in scaling).

    Weights are stored (in_features, out_features) in bfloat16 (f32 MXU
    accumulate in the kernel); biases in f32. w1 is zero-padded 784 -> 896
    rows; w4 is stored as a (1, 256) f32 row for the VPU reduction.
    """
    ks = jax.random.split(key, 8)

    def linear(kw, kb, fan_in, fan_out):
        bound = 1.0 / jnp.sqrt(fan_in)
        w = jax.random.uniform(kw, (fan_in, fan_out), jnp.float32, -bound, bound)
        b = jax.random.uniform(kb, (1, fan_out), jnp.float32, -bound, bound)
        return w, b

    w1, b1 = linear(ks[0], ks[1], IMAGE_SIZE, H1)
    w2, b2 = linear(ks[2], ks[3], H1, H2)
    w3, b3 = linear(ks[4], ks[5], H2, H3)
    w4, b4 = linear(ks[6], ks[7], H3, OUT)

    w1 = jnp.pad(w1, ((0, IMAGE_PAD - IMAGE_SIZE), (0, 0)))   # (896, 1024)
    return dict(
        w1=w1.astype(jnp.bfloat16), b1=b1,
        w2=w2.astype(jnp.bfloat16), b2=b2,
        w3=w3.astype(jnp.bfloat16), b3=b3,
        w4=w4.T.astype(jnp.float32),            # (1, 256) row, kept f32 (tiny)
        b4=b4.reshape(1, 1),
    )


def reference_forward(x, p):
    """Pure-JAX reference using the same bf16-weight / f32-accumulate recipe."""
    xb = x.astype(jnp.bfloat16)
    h = _leaky_relu(
        jnp.dot(xb, p["w1"][:IMAGE_SIZE], preferred_element_type=jnp.float32)
        + p["b1"])
    h = _leaky_relu(
        jnp.dot(h.astype(jnp.bfloat16), p["w2"],
                preferred_element_type=jnp.float32) + p["b2"])
    h = _leaky_relu(
        jnp.dot(h.astype(jnp.bfloat16), p["w3"],
                preferred_element_type=jnp.float32) + p["b3"])
    z = jnp.sum(h * p["w4"], axis=-1, keepdims=True) + p["b4"]
    return _sigmoid(z)


if __name__ == "__main__":
    key = jax.random.PRNGKey(0)
    k_params, k_x = jax.random.split(key)

    params = init_params(k_params)
    B = 4
    x = jax.random.normal(k_x, (B, IMAGE_SIZE), jnp.float32)

    out = discriminator_forward(x, params)
    out = jax.block_until_ready(out)

    ref = reference_forward(x, params)
    assert out.shape == (B, OUT), out.shape
    assert jnp.allclose(out, ref, atol=1e-4, rtol=1e-4), (
        f"max abs err {jnp.max(jnp.abs(out - ref))}")

    print("KERNEL_OK")
</pallas_src>

<mosaic_0001>
module attributes {stable_mosaic.version = 11 : i64} {
  func.func @discriminator_kernel(%arg0: i32, %arg1: memref<16x896xbf16, #tpu.memory_space<vmem>>, %arg2: memref<896x1024xbf16, #tpu.memory_space<vmem>>, %arg3: memref<1x1024xf32, #tpu.memory_space<vmem>>, %arg4: memref<1024x512xbf16, #tpu.memory_space<vmem>>, %arg5: memref<1x512xf32, #tpu.memory_space<vmem>>, %arg6: memref<512x256xbf16, #tpu.memory_space<vmem>>, %arg7: memref<1x256xf32, #tpu.memory_space<vmem>>, %arg8: memref<1x256xf32, #tpu.memory_space<vmem>>, %arg9: memref<1x1xf32, #tpu.memory_space<vmem>>, %arg10: memref<16x1xf32, #tpu.memory_space<vmem>>) attributes {dimension_semantics = [#tpu.dimension_semantics<parallel>], iteration_bounds = array<i64: 1>, scalar_prefetch = 0 : i64, scratch_operands = 0 : i64, tpu.core_type = #tpu.core_type<tc>, window_params = [{transform_indices = @transform_0, window_bounds = array<i64: 16, 896>}, {pipeline_mode = #tpu.pipeline_mode<synchronous>, transform_indices = @transform_1, window_bounds = array<i64: 896, 1024>}, {pipeline_mode = #tpu.pipeline_mode<synchronous>, transform_indices = @transform_2, window_bounds = array<i64: 1, 1024>}, {pipeline_mode = #tpu.pipeline_mode<synchronous>, transform_indices = @transform_3, window_bounds = array<i64: 1024, 512>}, {pipeline_mode = #tpu.pipeline_mode<synchronous>, transform_indices = @transform_4, window_bounds = array<i64: 1, 512>}, {pipeline_mode = #tpu.pipeline_mode<synchronous>, transform_indices = @transform_5, window_bounds = array<i64: 512, 256>}, {pipeline_mode = #tpu.pipeline_mode<synchronous>, transform_indices = @transform_6, window_bounds = array<i64: 1, 256>}, {pipeline_mode = #tpu.pipeline_mode<synchronous>, transform_indices = @transform_7, window_bounds = array<i64: 1, 256>}, {pipeline_mode = #tpu.pipeline_mode<synchronous>, transform_indices = @transform_8, window_bounds = array<i64: 1, 1>}, {transform_indices = @transform_9, window_bounds = array<i64: 16, 1>}]} {
    %c0 = arith.constant 0 : index
    %c0_0 = arith.constant 0 : index
    %0 = vector.load %arg1[%c0, %c0_0] : memref<16x896xbf16, #tpu.memory_space<vmem>>, vector<16x896xbf16>
    %c0_1 = arith.constant 0 : index
    %c0_2 = arith.constant 0 : index
    %1 = vector.load %arg2[%c0_1, %c0_2] : memref<896x1024xbf16, #tpu.memory_space<vmem>>, vector<896x1024xbf16>
    %cst = arith.constant dense<0.000000e+00> : vector<16x1024xf32>
    %2 = tpu.matmul %0, %1, %cst {dimension_numbers = #tpu.dot_dimension_numbers<[1], [0], [0], [1], [0, 0, 1, 1], [], []>} : vector<16x896xbf16>, vector<896x1024xbf16>, vector<16x1024xf32> -> vector<16x1024xf32>
    %c0_3 = arith.constant 0 : index
    %c0_4 = arith.constant 0 : index
    %3 = vector.load %arg3[%c0_3, %c0_4] : memref<1x1024xf32, #tpu.memory_space<vmem>>, vector<1x1024xf32>
    %4 = vector.broadcast %3 : vector<1x1024xf32> to vector<16x1024xf32>
    %5 = arith.addf %2, %4 : vector<16x1024xf32>
    %cst_5 = arith.constant 0.000000e+00 : f32
    %6 = vector.broadcast %cst_5 : f32 to vector<16x1024xf32>
    %7 = arith.cmpf oge, %5, %6 : vector<16x1024xf32>
    %cst_6 = arith.constant 2.000000e-01 : f32
    %8 = vector.broadcast %cst_6 : f32 to vector<16x1024xf32>
    %9 = arith.mulf %8, %5 : vector<16x1024xf32>
    %10 = arith.select %7, %5, %9 : vector<16x1024xi1>, vector<16x1024xf32>
    %11 = arith.truncf %10 : vector<16x1024xf32> to vector<16x1024xbf16>
    %c0_7 = arith.constant 0 : index
    %c0_8 = arith.constant 0 : index
    %12 = vector.load %arg4[%c0_7, %c0_8] : memref<1024x512xbf16, #tpu.memory_space<vmem>>, vector<1024x512xbf16>
    %cst_9 = arith.constant dense<0.000000e+00> : vector<16x512xf32>
    %13 = tpu.matmul %11, %12, %cst_9 {dimension_numbers = #tpu.dot_dimension_numbers<[1], [0], [0], [1], [0, 0, 1, 1], [], []>} : vector<16x1024xbf16>, vector<1024x512xbf16>, vector<16x512xf32> -> vector<16x512xf32>
    %c0_10 = arith.constant 0 : index
    %c0_11 = arith.constant 0 : index
    %14 = vector.load %arg5[%c0_10, %c0_11] : memref<1x512xf32, #tpu.memory_space<vmem>>, vector<1x512xf32>
    %15 = vector.broadcast %14 : vector<1x512xf32> to vector<16x512xf32>
    %16 = arith.addf %13, %15 : vector<16x512xf32>
    %cst_12 = arith.constant 0.000000e+00 : f32
    %17 = vector.broadcast %cst_12 : f32 to vector<16x512xf32>
    %18 = arith.cmpf oge, %16, %17 : vector<16x512xf32>
    %cst_13 = arith.constant 2.000000e-01 : f32
    %19 = vector.broadcast %cst_13 : f32 to vector<16x512xf32>
    %20 = arith.mulf %19, %16 : vector<16x512xf32>
    %21 = arith.select %18, %16, %20 : vector<16x512xi1>, vector<16x512xf32>
    %22 = arith.truncf %21 : vector<16x512xf32> to vector<16x512xbf16>
    %c0_14 = arith.constant 0 : index
    %c0_15 = arith.constant 0 : index
    %23 = vector.load %arg6[%c0_14, %c0_15] : memref<512x256xbf16, #tpu.memory_space<vmem>>, vector<512x256xbf16>
    %cst_16 = arith.constant dense<0.000000e+00> : vector<16x256xf32>
    %24 = tpu.matmul %22, %23, %cst_16 {dimension_numbers = #tpu.dot_dimension_numbers<[1], [0], [0], [1], [0, 0, 1, 1], [], []>} : vector<16x512xbf16>, vector<512x256xbf16>, vector<16x256xf32> -> vector<16x256xf32>
    %c0_17 = arith.constant 0 : index
    %c0_18 = arith.constant 0 : index
    %25 = vector.load %arg7[%c0_17, %c0_18] : memref<1x256xf32, #tpu.memory_space<vmem>>, vector<1x256xf32>
    %26 = vector.broadcast %25 : vector<1x256xf32> to vector<16x256xf32>
    %27 = arith.addf %24, %26 : vector<16x256xf32>
    %cst_19 = arith.constant 0.000000e+00 : f32
    %28 = vector.broadcast %cst_19 : f32 to vector<16x256xf32>
    %29 = arith.cmpf oge, %27, %28 : vector<16x256xf32>
    %cst_20 = arith.constant 2.000000e-01 : f32
    %30 = vector.broadcast %cst_20 : f32 to vector<16x256xf32>
    %31 = arith.mulf %30, %27 : vector<16x256xf32>
    %32 = arith.select %29, %27, %31 : vector<16x256xi1>, vector<16x256xf32>
    %c0_21 = arith.constant 0 : index
    %c0_22 = arith.constant 0 : index
    %33 = vector.load %arg8[%c0_21, %c0_22] : memref<1x256xf32, #tpu.memory_space<vmem>>, vector<1x256xf32>
    %34 = vector.broadcast %33 : vector<1x256xf32> to vector<16x256xf32>
    %35 = arith.mulf %32, %34 : vector<16x256xf32>
    %cst_23 = arith.constant dense<0.000000e+00> : vector<16xf32>
    %36 = vector.multi_reduction <add>, %35, %cst_23 [1] : vector<16x256xf32> to vector<16xf32>
    %37 = vector.shape_cast %36 : vector<16xf32> to vector<16x1xf32>
    %c0_24 = arith.constant 0 : index
    %c0_25 = arith.constant 0 : index
    %38 = vector.load %arg9[%c0_24, %c0_25] : memref<1x1xf32, #tpu.memory_space<vmem>>, vector<1x1xf32>
    %39 = vector.broadcast %38 : vector<1x1xf32> to vector<16x1xf32>
    %40 = arith.addf %37, %39 : vector<16x1xf32>
    %cst_26 = arith.constant 0.000000e+00 : f32
    %41 = vector.broadcast %cst_26 : f32 to vector<16x1xf32>
    %42 = arith.subf %41, %40 : vector<16x1xf32>
    %43 = math.exp %42 : vector<16x1xf32>
    %cst_27 = arith.constant 1.000000e+00 : f32
    %44 = vector.broadcast %cst_27 : f32 to vector<16x1xf32>
    %45 = arith.addf %44, %43 : vector<16x1xf32>
    %cst_28 = arith.constant 1.000000e+00 : f32
    %46 = vector.broadcast %cst_28 : f32 to vector<16x1xf32>
    %47 = arith.divf %46, %45 : vector<16x1xf32>
    %c0_29 = arith.constant 0 : index
    %c0_30 = arith.constant 0 : index
    %48 = vector.load %arg10[%c0_29, %c0_30] : memref<16x1xf32, #tpu.memory_space<vmem>>, vector<16x1xf32>
    tpu.vector_store %arg10[%c0_29, %c0_30], %47 {strides = array<i32>} : memref<16x1xf32, #tpu.memory_space<vmem>>, vector<16x1xf32>,
    return
  }
  func.func @transform_0(%arg0: i32) -> (i32, i32) {
    %c0_i32 = arith.constant 0 : i32
    %c0_i32_0 = arith.constant 0 : i32
    return %arg0, %c0_i32 : i32, i32
  }
  func.func @transform_1(%arg0: i32) -> (i32, i32) {
    %c0_i32 = arith.constant 0 : i32
    %c0_i32_0 = arith.constant 0 : i32
    %c0_i32_1 = arith.constant 0 : i32
    return %c0_i32, %c0_i32_0 : i32, i32
  }
  func.func @transform_2(%arg0: i32) -> (i32, i32) {
    %c0_i32 = arith.constant 0 : i32
    %c0_i32_0 = arith.constant 0 : i32
    %c0_i32_1 = arith.constant 0 : i32
    return %c0_i32, %c0_i32_0 : i32, i32
  }
  func.func @transform_3(%arg0: i32) -> (i32, i32) {
    %c0_i32 = arith.constant 0 : i32
    %c0_i32_0 = arith.constant 0 : i32
    %c0_i32_1 = arith.constant 0 : i32
    return %c0_i32, %c0_i32_0 : i32, i32
  }
  func.func @transform_4(%arg0: i32) -> (i32, i32) {
    %c0_i32 = arith.constant 0 : i32
    %c0_i32_0 = arith.constant 0 : i32
    %c0_i32_1 = arith.constant 0 : i32
    return %c0_i32, %c0_i32_0 : i32, i32
  }
  func.func @transform_5(%arg0: i32) -> (i32, i32) {
    %c0_i32 = arith.constant 0 : i32
    %c0_i32_0 = arith.constant 0 : i32
    %c0_i32_1 = arith.constant 0 : i32
    return %c0_i32, %c0_i32_0 : i32, i32
  }
  func.func @transform_6(%arg0: i32) -> (i32, i32) {
    %c0_i32 = arith.constant 0 : i32
    %c0_i32_0 = arith.constant 0 : i32
    %c0_i32_1 = arith.constant 0 : i32
    return %c0_i32, %c0_i32_0 : i32, i32
  }
  func.func @transform_7(%arg0: i32) -> (i32, i32) {
    %c0_i32 = arith.constant 0 : i32
    %c0_i32_0 = arith.constant 0 : i32
    %c0_i32_1 = arith.constant 0 : i32
    return %c0_i32, %c0_i32_0 : i32, i32
  }
  func.func @transform_8(%arg0: i32) -> (i32, i32) {
    %c0_i32 = arith.constant 0 : i32
    %c0_i32_0 = arith.constant 0 : i32
    %c0_i32_1 = arith.constant 0 : i32
    return %c0_i32, %c0_i32_0 : i32, i32
  }
  func.func @transform_9(%arg0: i32) -> (i32, i32) {
    %c0_i32 = arith.constant 0 : i32
    %c0_i32_0 = arith.constant 0 : i32
    return %arg0, %c0_i32 : i32, i32
  }
}

</mosaic_0001>

<bundles_post_ra>
// kernel: tpu_custom_call.1
= control target key start
LH: loop header
LB: loop body
LE: loop exit
PB: predicated region body
PF: predicated region fallthrough
CT: control target
= control target key end

     0   :  { %s7899_s0 = inlined_call_operand.hbm [shape: bf16[16,896], index: 0, kind: input, shape index: {}]   ;;  %s7900_s1 = inlined_call_operand.hbm [shape: bf16[896,1024], index: 1, kind: input, shape index: {}]   ;;  %s7901_s2 = inlined_call_operand.hbm [shape: f32[1,1024], index: 2, kind: input, shape index: {}]   ;;  %s7902_s3 = inlined_call_operand.hbm [shape: bf16[1024,512], index: 3, kind: input, shape index: {}]   ;;  %s7903_s4 = inlined_call_operand.hbm [shape: f32[1,512], index: 4, kind: input, shape index: {}]   ;;  %s7904_s5 = inlined_call_operand.hbm [shape: bf16[512,256], index: 5, kind: input, shape index: {}]   ;;  %s7905_s6 = inlined_call_operand.hbm [shape: f32[1,256], index: 6, kind: input, shape index: {}]   ;;  %s7906_s7 = inlined_call_operand.hbm [shape: f32[1,256], index: 7, kind: input, shape index: {}]   ;;  %s7907_s8 = inlined_call_operand.<no memory space> [shape: f32[1,1], index: 8, kind: input, shape index: {}]   ;;  %s7908_s9 = inlined_call_operand.vmem [shape: f32[16,1], index: 9, kind: output, shape index: {}]  }
   0x1   :  { %v14_v0 = vstv %s7907_s8 }
   0x2   :  { %15 = vst [vmem:[#allocation2] sm:$0x1] %v14_v0 }
   0x3   :  { %16 = vsyncpa [#allocation4], 0 }
   0x4   :  { %17 = vsyncpa [#allocation6], 0 }
   0x5   :  { %18 = vsyncpa [#allocation9], 0 }
   0x6   :  { %19 = vsyncpa [#allocation12], 0 }
   0x7   :  { %20 = vsyncpa [#allocation15], 0  ;;  %s7605_s11 = smov [#allocation5]  }
   0x8   :  { %s38_s12 = sshll.u32 %s7605_s11, 4  ;;  %s39_s12 = int_to_ptr.vmem [resolvable:$true] %s38_s12 }
   0x9   :  { %s7443_s13 = scalar_lea.vmem %s39_s12, 57344  ;;  %p7448_p1 = scmp.lt.s32.totalorder %s39_s12, %s39_s12 }
   0xa   :  { %p7444_p0 = scmp.ne.s32.totalorder %s39_s12, %s7443_s13  ;;  %p7449_p2 = scmp.lt.s32.totalorder %s7443_s13, %s7443_s13 }
   0xc   :  { %p7450_p3 = por %p7449_p2, %p7448_p1 }
   0xe   :  { %p7451_p4 = pnand %p7450_p3, %p7444_p0 }
  0x10   :  { %7454 = shalt.err (!%p7451_p4)
}
  0x11   :  { %s7606_s14 = smov 512   ;;  %s7607_s15 = smov 32  }
  0x12   :  { %44 = dma.hbm_to_vmem [thread:$0]  %s7900_s1, 57344, %s39_s12, [#allocation6], %s7606_s14, %s7606_s14, %s7607_s15  }
  0x13   :  { %s7608_s17 = smov [#allocation8]  }
  0x14   :  { %s60_s18 = sshll.u32 %s7608_s17, 4  ;;  %s61_s18 = int_to_ptr.vmem [resolvable:$true] %s60_s18 }
  0x15   :  { %s7463_s19 = scalar_lea.vmem %s61_s18, 32768  ;;  %p7468_p6 = scmp.lt.s32.totalorder %s61_s18, %s61_s18 }
  0x16   :  { %p7464_p5 = scmp.ne.s32.totalorder %s61_s18, %s7463_s19  ;;  %p7469_p7 = scmp.lt.s32.totalorder %s7463_s19, %s7463_s19 }
  0x18   :  { %p7470_p8 = por %p7469_p7, %p7468_p6 }
  0x1a   :  { %p7471_p9 = pnand %p7470_p8, %p7464_p5 }
  0x1c   :  { %7474 = shalt.err (!%p7471_p9)
}
  0x1d   :  { %s7609_s20 = smov 256   ;;  %s7610_s21 = smov 16  }
  0x1e   :  { %66 = dma.hbm_to_vmem [thread:$0]  %s7902_s3, 32768, %s61_s18, [#allocation9], %s7609_s20, %s7609_s20, %s7610_s21  }
  0x1f   :  { %s7611_s24 = smov [#allocation11]  }
  0x20   :  { %s82_s25 = sshll.u32 %s7611_s24, 4  ;;  %s83_s25 = int_to_ptr.vmem [resolvable:$true] %s82_s25 }
  0x21   :  { %s7483_s1 = scalar_lea.vmem %s83_s25, 8192  ;;  %p7488_p11 = scmp.lt.s32.totalorder %s83_s25, %s83_s25 }
  0x22   :  { %p7484_p10 = scmp.ne.s32.totalorder %s83_s25, %s7483_s1  ;;  %p7489_p12 = scmp.lt.s32.totalorder %s7483_s1, %s7483_s1 }
  0x24   :  { %p7490_p13 = por %p7489_p12, %p7488_p11 }
  0x26   :  { %p7491_p0 = pnand %p7490_p13, %p7484_p10 }
  0x28   :  { %7494 = shalt.err (!%p7491_p0)
}
  0x29   :  { %s7612_s26 = smov 128   ;;  %s7613_s27 = smov 8  }
  0x2a   :  { %88 = dma.hbm_to_vmem [thread:$0]  %s7904_s5, 8192, %s83_s25, [#allocation12], %s7612_s26, %s7612_s26, %s7613_s27  }
  0x2b   :  { %s7614_s30 = smov [#allocation3]  }
  0x2c   :  { %s26_s10 = sshll.u32 %s7614_s30, 4  ;;  %s27_s10 = int_to_ptr.vmem [resolvable:$true] %s26_s10 }
  0x2d   :  { %s7503_s3 = scalar_lea.vmem %s27_s10, 896  ;;  %p7508_p2 = scmp.lt.s32.totalorder %s27_s10, %s27_s10 }
  0x2e   :  { %p7504_p1 = scmp.ne.s32.totalorder %s27_s10, %s7503_s3  ;;  %p7509_p3 = scmp.lt.s32.totalorder %s7503_s3, %s7503_s3 }
  0x30   :  { %p7510_p4 = por %p7509_p3, %p7508_p2 }
  0x32   :  { %p7511_p5 = pnand %p7510_p4, %p7504_p1 }
  0x34   :  { %7514 = shalt.err (!%p7511_p5)
}
  0x35   :  { %s7615_s11 = smov 448   ;;  %s7616_s12 = smov 28  }
  0x36   :  { %32 = dma.hbm_to_vmem [thread:$0]  %s7899_s0, 896, %s27_s10, [#allocation4], %s7615_s11, %s7615_s11, %s7616_s12  }
  0x37   :  { %s7617_s15 = smov [#allocation7]   ;;  %s7618_s8 = smov [#allocation10]  }
  0x38   :  { %s51_s16 = sshll.u32 %s7617_s15, 4  ;;  %s73_s5 = sshll.u32 %s7618_s8, 4  ;;  %s52_s16 = int_to_ptr.vmem [resolvable:$true] %s51_s16  ;;  %s74_s5 = int_to_ptr.vmem [resolvable:$true] %s73_s5 }
  0x39   :  { %s7523_s17 = scalar_lea.vmem %s52_s16, 128  ;;  %p7528_p7 = scmp.lt.s32.totalorder %s52_s16, %s52_s16 }
  0x3a   :  { %p7524_p6 = scmp.ne.s32.totalorder %s52_s16, %s7523_s17  ;;  %p7529_p8 = scmp.lt.s32.totalorder %s7523_s17, %s7523_s17 }
  0x3c   :  { %p7530_p9 = por %p7529_p8, %p7528_p7 }
  0x3e   :  { %p7531_p10 = pnand %p7530_p9, %p7524_p6 }
  0x40   :  { %7534 = shalt.err (!%p7531_p10)
}
  0x41   :  { %54 = dma.hbm_to_vmem [thread:$0]  %s7901_s2, 128, %s52_s16, [#allocation6]  }
  0x42   :  { %s7543_s20 = scalar_lea.vmem %s74_s5, 64  ;;  %p7548_p12 = scmp.lt.s32.totalorder %s74_s5, %s74_s5 }
  0x43   :  { %p7544_p11 = scmp.ne.s32.totalorder %s74_s5, %s7543_s20  ;;  %p7549_p13 = scmp.lt.s32.totalorder %s7543_s20, %s7543_s20 }
  0x45   :  { %p7550_p0 = por %p7549_p13, %p7548_p12 }
  0x47   :  { %p7551_p1 = pnand %p7550_p0, %p7544_p11 }
  0x49   :  { %7554 = shalt.err (!%p7551_p1)
}
  0x4a   :  { %76 = dma.hbm_to_vmem [thread:$0]  %s7903_s4, 64, %s74_s5, [#allocation9]  }
  0x4b   :  { %s7619_s22 = smov [#allocation13]   ;;  %s7620_s24 = smov [#allocation14]  }
  0x4c   :  { %s95_s23 = sshll.u32 %s7619_s22, 4  ;;  %s105_s25 = sshll.u32 %s7620_s24, 4  ;;  %s96_s23 = int_to_ptr.vmem [resolvable:$true] %s95_s23  ;;  %s106_s25 = int_to_ptr.vmem [resolvable:$true] %s105_s25 }
  0x4d   :  { %s7563_s1 = scalar_lea.vmem %s96_s23, 32  ;;  %p7568_p3 = scmp.lt.s32.totalorder %s96_s23, %s96_s23 }
  0x4e   :  { %p7564_p2 = scmp.ne.s32.totalorder %s96_s23, %s7563_s1  ;;  %p7569_p4 = scmp.lt.s32.totalorder %s7563_s1, %s7563_s1 }
  0x50   :  { %p7570_p5 = por %p7569_p4, %p7568_p3 }
  0x52   :  { %p7571_p6 = pnand %p7570_p5, %p7564_p2 }
  0x54   :  { %7574 = shalt.err (!%p7571_p6)
}
  0x55   :  { %98 = dma.hbm_to_vmem [thread:$0]  %s7905_s6, 32, %s96_s23, [#allocation12]  }
  0x56   :  { %s7583_s27 = scalar_lea.vmem %s106_s25, 32  ;;  %p7588_p8 = scmp.lt.s32.totalorder %s106_s25, %s106_s25 }
  0x57   :  { %p7584_p7 = scmp.ne.s32.totalorder %s106_s25, %s7583_s27  ;;  %p7589_p9 = scmp.lt.s32.totalorder %s7583_s27, %s7583_s27 }
  0x59   :  { %p7590_p10 = por %p7589_p9, %p7588_p8 }
  0x5b   :  { %p7591_p11 = pnand %p7590_p10, %p7584_p7 }
  0x5d   :  { %7594 = shalt.err (!%p7591_p11)
}
  0x5e   :  { %108 = dma.hbm_to_vmem [thread:$0]  %s7906_s7, 32, %s106_s25, [#allocation15]  }
  0x5f   :  { %7595 = dma.done.wait [#allocation4], 896  }
  0x60   :  { %7596 = vsyncadd [#allocation4], 4294966400 }
  0x61   :  { %7597 = dma.done.wait [#allocation6], 57472  }
  0x62   :  { %7598 = vsyncadd [#allocation6], 4294909824 }
  0x63   :  { %7599 = dma.done.wait [#allocation9], 32832  }
  0x64   :  { %7600 = vsyncadd [#allocation9], 4294934464 }
  0x65   :  { %7601 = dma.done.wait [#allocation12], 8224  }
  0x66   :  { %7602 = vsyncadd [#allocation12], 4294959072 }
  0x67   :  { %7603 = dma.done.wait [#allocation15], 32  }
  0x68   :  { %7604 = vsyncadd [#allocation15], 4294967264  ;;  %v200_v1 = vld [vmem:[#allocation5 + $0x1c0] sm:$0xff]  ;;  %v7699_v57 = vld [vmem:[#allocation3 + $0x4] ss:$28 sps:$4 sm:$0xff]  }
  0x69   :  { %v204_v2 = vld [vmem:[#allocation5 + $0x1e0] sm:$0xff]  ;;  %v7701_v60 = vld [vmem:[#allocation3 + $0xc] ss:$28 sps:$4 sm:$0xff]   ;;  %2942 = vmatprep.mubr.bf16.mxu0 %v7699_v57 }
  0x6a   :  { %v328_v3 = vld [vmem:[#allocation5 + $0x5c0] sm:$0xff]  ;;  %v6197_v4 = vcombine.high %v200_v1, %v204_v2  ;;  %v6196_v6 = vcombine.low %v200_v1, %v204_v2  ;;  %2985 = vmatprep.mubr.bf16.mxu1 %v7701_v60 }
  0x6b   :  { %v332_v5 = vld [vmem:[#allocation5 + $0x5e0] sm:$0xff] }
  0x6c   :  { %v192_v7 = vld [vmem:[#allocation5 + $0x180] sm:$0xff]  ;;  %v6325_v9 = vcombine.high %v328_v3, %v332_v5  ;;  %v6324_v10 = vcombine.low %v328_v3, %v332_v5  ;;  %2910 = vmatprep.subr.bf16.mxu0 %v6197_v4 }
  0x6d   :  { %v196_v8 = vld [vmem:[#allocation5 + $0x1a0] sm:$0xff]  ;;  %2911 = vmatpush1.bf16.msra.mxu0 %v6196_v6 }
  0x6e   :  { %v6189_v11 = vcombine.high %v192_v7, %v196_v8  ;;  %v320_v12 = vld [vmem:[#allocation5 + $0x580] sm:$0xff]  ;;  %2953 = vmatprep.subr.bf16.mxu1 %v6325_v9  ;;  %v6188_v19 = vcombine.low %v192_v7, %v196_v8 }
  0x6f   :  { %v324_v13 = vld [vmem:[#allocation5 + $0x5a0] sm:$0xff]  ;;  %2954 = vmatpush1.bf16.msra.mxu1 %v6324_v10 }
  0x70   :  { %v184_v14 = vld [vmem:[#allocation5 + $0x140] sm:$0xff]  ;;  %v6317_v15 = vcombine.high %v320_v12, %v324_v13  ;;  %2912 = vmatprep.subr.bf16.mxu0 %v6189_v11  ;;  %v6316_v20 = vcombine.low %v320_v12, %v324_v13 }
  0x71   :  { %v188_v16 = vld [vmem:[#allocation5 + $0x160] sm:$0xff]  ;;  %2913 = vmatpush1.bf16.msra.mxu0 %v6188_v19 }
  0x72   :  { %v312_v17 = vld [vmem:[#allocation5 + $0x540] sm:$0xff]  ;;  %v6181_v21 = vcombine.high %v184_v14, %v188_v16  ;;  %2955 = vmatprep.subr.bf16.mxu1 %v6317_v15  ;;  %v6180_v27 = vcombine.low %v184_v14, %v188_v16 }
  0x73   :  { %v316_v18 = vld [vmem:[#allocation5 + $0x560] sm:$0xff]  ;;  %2956 = vmatpush1.bf16.msra.mxu1 %v6316_v20 }
  0x74   :  { %v6309_v22 = vcombine.high %v312_v17, %v316_v18  ;;  %v176_v23 = vld [vmem:[#allocation5 + $0x100] sm:$0xff]  ;;  %2914 = vmatprep.subr.bf16.mxu0 %v6181_v21  ;;  %v6308_v28 = vcombine.low %v312_v17, %v316_v18 }
  0x75   :  { %v180_v24 = vld [vmem:[#allocation5 + $0x120] sm:$0xff]  ;;  %2915 = vmatpush1.bf16.msra.mxu0 %v6180_v27 }
  0x76   :  { %v304_v25 = vld [vmem:[#allocation5 + $0x500] sm:$0xff]  ;;  %v6173_v29 = vcombine.high %v176_v23, %v180_v24  ;;  %2957 = vmatprep.subr.bf16.mxu1 %v6309_v22  ;;  %v6172_v35 = vcombine.low %v176_v23, %v180_v24 }
  0x77   :  { %v308_v26 = vld [vmem:[#allocation5 + $0x520] sm:$0xff]  ;;  %2958 = vmatpush1.bf16.msra.mxu1 %v6308_v28 }
  0x78   :  { %v6301_v30 = vcombine.high %v304_v25, %v308_v26  ;;  %v168_v31 = vld [vmem:[#allocation5 + $0xc0] sm:$0xff]  ;;  %2916 = vmatprep.subr.bf16.mxu0 %v6173_v29  ;;  %v6300_v36 = vcombine.low %v304_v25, %v308_v26 }
  0x79   :  { %v172_v32 = vld [vmem:[#allocation5 + $0xe0] sm:$0xff]  ;;  %2917 = vmatpush1.bf16.msra.mxu0 %v6172_v35 }
  0x7a   :  { %v296_v33 = vld [vmem:[#allocation5 + $0x4c0] sm:$0xff]  ;;  %v6165_v37 = vcombine.high %v168_v31, %v172_v32  ;;  %2959 = vmatprep.subr.bf16.mxu1 %v6301_v30  ;;  %v6164_v43 = vcombine.low %v168_v31, %v172_v32 }
  0x7b   :  { %v300_v34 = vld [vmem:[#allocation5 + $0x4e0] sm:$0xff]  ;;  %2960 = vmatpush1.bf16.msra.mxu1 %v6300_v36 }
  0x7c   :  { %v6293_v38 = vcombine.high %v296_v33, %v300_v34  ;;  %v160_v39 = vld [vmem:[#allocation5 + $0x80] sm:$0xff]  ;;  %2918 = vmatprep.subr.bf16.mxu0 %v6165_v37  ;;  %v6292_v44 = vcombine.low %v296_v33, %v300_v34 }
  0x7d   :  { %v164_v40 = vld [vmem:[#allocation5 + $0xa0] sm:$0xff]  ;;  %2919 = vmatpush1.bf16.msra.mxu0 %v6164_v43 }
  0x7e   :  { %v288_v41 = vld [vmem:[#allocation5 + $0x480] sm:$0xff]  ;;  %v6157_v45 = vcombine.high %v160_v39, %v164_v40  ;;  %2961 = vmatprep.subr.bf16.mxu1 %v6293_v38  ;;  %v6156_v51 = vcombine.low %v160_v39, %v164_v40 }
  0x7f   :  { %v292_v42 = vld [vmem:[#allocation5 + $0x4a0] sm:$0xff]  ;;  %2962 = vmatpush1.bf16.msra.mxu1 %v6292_v44 }
  0x80   :  { %v6285_v46 = vcombine.high %v288_v41, %v292_v42  ;;  %v152_v47 = vld [vmem:[#allocation5 + $0x40] sm:$0xff]  ;;  %2920 = vmatprep.subr.bf16.mxu0 %v6157_v45  ;;  %v6284_v53 = vcombine.low %v288_v41, %v292_v42 }
  0x81   :  { %v156_v48 = vld [vmem:[#allocation5 + $0x60] sm:$0xff]  ;;  %2921 = vmatpush1.bf16.msra.mxu0 %v6156_v51 }
  0x82   :  { %v280_v49 = vld [vmem:[#allocation5 + $0x440] sm:$0xff]  ;;  %v6149_v54 = vcombine.high %v152_v47, %v156_v48  ;;  %2963 = vmatprep.subr.bf16.mxu1 %v6285_v46  ;;  %v6148_v61 = vcombine.low %v152_v47, %v156_v48 }
  0x83   :  { %v284_v50 = vld [vmem:[#allocation5 + $0x460] sm:$0xff]  ;;  %2964 = vmatpush1.bf16.msra.mxu1 %v6284_v53 }
  0x84   :  { %v144_v52 = vld [vmem:[#allocation5] sm:$0xff]  ;;  %v6277_v56 = vcombine.high %v280_v49, %v284_v50  ;;  %2922 = vmatprep.subr.bf16.mxu0 %v6149_v54  ;;  %v6276_v62 = vcombine.low %v280_v49, %v284_v50 }
  0x85   :  { %v148_v55 = vld [vmem:[#allocation5 + $0x20] sm:$0xff]  ;;  %2923 = vmatpush1.bf16.msra.mxu0 %v6148_v61 }
  0x86   :  { %v272_v58 = vld [vmem:[#allocation5 + $0x400] sm:$0xff]  ;;  %v6141_v63 = vcombine.high %v144_v52, %v148_v55  ;;  %2965 = vmatprep.subr.bf16.mxu1 %v6277_v56  ;;  %v6140_v5 = vcombine.low %v144_v52, %v148_v55 }
  0x87   :  { %v276_v59 = vld [vmem:[#allocation5 + $0x420] sm:$0xff]  ;;  %2966 = vmatpush1.bf16.msra.mxu1 %v6276_v62 }
  0x88   :  { %v6269_v0 = vcombine.high %v272_v58, %v276_v59  ;;  %v264_v1 = vld [vmem:[#allocation5 + $0x3c0] sm:$0xff]  ;;  %2924 = vmatprep.subr.bf16.mxu0 %v6141_v63  ;;  %v6268_v6 = vcombine.low %v272_v58, %v276_v59 }
  0x89   :  { %v268_v2 = vld [vmem:[#allocation5 + $0x3e0] sm:$0xff]  ;;  %2925 = vmatpush1.bf16.msra.mxu0 %v6140_v5 }
  0x8a   :  { %v392_v3 = vld [vmem:[#allocation5 + $0x7c0] sm:$0xff]  ;;  %v6261_v7 = vcombine.high %v264_v1, %v268_v2  ;;  %2967 = vmatprep.subr.bf16.mxu1 %v6269_v0  ;;  %v6260_v13 = vcombine.low %v264_v1, %v268_v2 }
  0x8b   :  { %v396_v4 = vld [vmem:[#allocation5 + $0x7e0] sm:$0xff]  ;;  %2968 = vmatpush1.bf16.msra.mxu1 %v6268_v6 }
  0x8c   :  { %v6389_v8 = vcombine.high %v392_v3, %v396_v4  ;;  %v256_v9 = vld [vmem:[#allocation5 + $0x380] sm:$0xff]  ;;  %2926 = vmatprep.subr.bf16.mxu0 %v6261_v7  ;;  %v6388_v14 = vcombine.low %v392_v3, %v396_v4 }
  0x8d   :  { %v260_v10 = vld [vmem:[#allocation5 + $0x3a0] sm:$0xff]  ;;  %2927 = vmatpush2.bf16.msra.mxu0 %v6260_v13 }
  0x8e   :  { %v384_v11 = vld [vmem:[#allocation5 + $0x780] sm:$0xff]  ;;  %v6253_v15 = vcombine.high %v256_v9, %v260_v10  ;;  %2969 = vmatprep.subr.bf16.mxu1 %v6389_v8  ;;  %v6252_v21 = vcombine.low %v256_v9, %v260_v10 }
  0x8f   :  { %v388_v12 = vld [vmem:[#allocation5 + $0x7a0] sm:$0xff]  ;;  %2970 = vmatpush2.bf16.msra.mxu1 %v6388_v14 }
  0x90   :  { %v6381_v16 = vcombine.high %v384_v11, %v388_v12  ;;  %v248_v17 = vld [vmem:[#allocation5 + $0x340] sm:$0xff]  ;;  %2928 = vmatprep.subr.bf16.mxu0 %v6253_v15  ;;  %v6380_v22 = vcombine.low %v384_v11, %v388_v12 }
  0x91   :  { %v252_v18 = vld [vmem:[#allocation5 + $0x360] sm:$0xff]  ;;  %2929 = vmatpush2.bf16.msra.mxu0 %v6252_v21 }
  0x92   :  { %v376_v19 = vld [vmem:[#allocation5 + $0x740] sm:$0xff]  ;;  %v6245_v23 = vcombine.high %v248_v17, %v252_v18  ;;  %2971 = vmatprep.subr.bf16.mxu1 %v6381_v16  ;;  %v6244_v29 = vcombine.low %v248_v17, %v252_v18  ;;  %v6931_v16 = vld [vmem:[#allocation3 + $0x8] ss:$28 sps:$4 sm:$0xff]  }
  0x93   :  { %v380_v20 = vld [vmem:[#allocation5 + $0x760] sm:$0xff]  ;;  %2972 = vmatpush2.bf16.msra.mxu1 %v6380_v22 }
  0x94   :  { %v6373_v24 = vcombine.high %v376_v19, %v380_v20  ;;  %v240_v25 = vld [vmem:[#allocation5 + $0x300] sm:$0xff]  ;;  %2930 = vmatprep.subr.bf16.mxu0 %v6245_v23  ;;  %v6372_v30 = vcombine.low %v376_v19, %v380_v20 }
  0x95   :  { %v244_v26 = vld [vmem:[#allocation5 + $0x320] sm:$0xff]  ;;  %2931 = vmatpush2.bf16.msra.mxu0 %v6244_v29 }
  0x96   :  { %v368_v27 = vld [vmem:[#allocation5 + $0x700] sm:$0xff]  ;;  %v6237_v31 = vcombine.high %v240_v25, %v244_v26  ;;  %2973 = vmatprep.subr.bf16.mxu1 %v6373_v24  ;;  %v6236_v37 = vcombine.low %v240_v25, %v244_v26  ;;  %v7708_v25 = vld [vmem:[#allocation3 + $0x14] ss:$28 sps:$4 sm:$0xff]  }
  0x97   :  { %v372_v28 = vld [vmem:[#allocation5 + $0x720] sm:$0xff]  ;;  %2974 = vmatpush2.bf16.msra.mxu1 %v6372_v30 }
  0x98   :  { %v6365_v32 = vcombine.high %v368_v27, %v372_v28  ;;  %v232_v33 = vld [vmem:[#allocation5 + $0x2c0] sm:$0xff]  ;;  %2932 = vmatprep.subr.bf16.mxu0 %v6237_v31  ;;  %v6364_v38 = vcombine.low %v368_v27, %v372_v28 }
  0x99   :  { %v236_v34 = vld [vmem:[#allocation5 + $0x2e0] sm:$0xff]  ;;  %2933 = vmatpush2.bf16.msra.mxu0 %v6236_v37 }
  0x9a   :  { %v360_v35 = vld [vmem:[#allocation5 + $0x6c0] sm:$0xff]  ;;  %v6229_v39 = vcombine.high %v232_v33, %v236_v34  ;;  %2975 = vmatprep.subr.bf16.mxu1 %v6365_v32  ;;  %v6228_v45 = vcombine.low %v232_v33, %v236_v34  ;;  %v7621_v32 = vmov 0  }
  0x9b   :  { %v364_v36 = vld [vmem:[#allocation5 + $0x6e0] sm:$0xff]  ;;  %2976 = vmatpush2.bf16.msra.mxu1 %v6364_v38 }
  0x9c   :  { %v224_v40 = vld [vmem:[#allocation5 + $0x280] sm:$0xff]  ;;  %v6357_v41 = vcombine.high %v360_v35, %v364_v36  ;;  %2934 = vmatprep.subr.bf16.mxu0 %v6229_v39  ;;  %v6356_v46 = vcombine.low %v360_v35, %v364_v36 }
  0x9d   :  { %v228_v42 = vld [vmem:[#allocation5 + $0x2a0] sm:$0xff]  ;;  %2935 = vmatpush2.bf16.msra.mxu0 %v6228_v45 }
  0x9e   :  { %v352_v43 = vld [vmem:[#allocation5 + $0x680] sm:$0xff]  ;;  %v6221_v47 = vcombine.high %v224_v40, %v228_v42  ;;  %2977 = vmatprep.subr.bf16.mxu1 %v6357_v41  ;;  %v6220_v53 = vcombine.low %v224_v40, %v228_v42 }
  0x9f   :  { %v356_v44 = vld [vmem:[#allocation5 + $0x6a0] sm:$0xff]  ;;  %2978 = vmatpush2.bf16.msra.mxu1 %v6356_v46 }
  0xa0   :  { %v6349_v48 = vcombine.high %v352_v43, %v356_v44  ;;  %v216_v49 = vld [vmem:[#allocation5 + $0x240] sm:$0xff]  ;;  %2936 = vmatprep.subr.bf16.mxu0 %v6221_v47  ;;  %v6348_v54 = vcombine.low %v352_v43, %v356_v44 }
  0xa1   :  { %v220_v50 = vld [vmem:[#allocation5 + $0x260] sm:$0xff]  ;;  %2937 = vmatpush2.bf16.msra.mxu0 %v6220_v53 }
  0xa2   :  { %v344_v51 = vld [vmem:[#allocation5 + $0x640] sm:$0xff]  ;;  %v6213_v55 = vcombine.high %v216_v49, %v220_v50  ;;  %2979 = vmatprep.subr.bf16.mxu1 %v6349_v48  ;;  %v6212_v63 = vcombine.low %v216_v49, %v220_v50 }
  0xa3   :  { %v348_v52 = vld [vmem:[#allocation5 + $0x660] sm:$0xff]  ;;  %2980 = vmatpush2.bf16.msra.mxu1 %v6348_v54 }
  0xa4   :  { %v6341_v56 = vcombine.high %v344_v51, %v348_v52  ;;  %v208_v58 = vld [vmem:[#allocation5 + $0x200] sm:$0xff]  ;;  %2938 = vmatprep.subr.bf16.mxu0 %v6213_v55  ;;  %v6340_v0 = vcombine.low %v344_v51, %v348_v52 }
  0xa5   :  { %v212_v59 = vld [vmem:[#allocation5 + $0x220] sm:$0xff]  ;;  %2939 = vmatpush2.bf16.msra.mxu0 %v6212_v63 }
  0xa6   :  { %v336_v61 = vld [vmem:[#allocation5 + $0x600] sm:$0xff]  ;;  %v6205_v1 = vcombine.high %v208_v58, %v212_v59  ;;  %2981 = vmatprep.subr.bf16.mxu1 %v6341_v56  ;;  %v6204_v7 = vcombine.low %v208_v58, %v212_v59 }
  0xa7   :  { %v340_v62 = vld [vmem:[#allocation5 + $0x620] sm:$0xff]  ;;  %2982 = vmatpush2.bf16.msra.mxu1 %v6340_v0 }
  0xa8   :  { %v6333_v2 = vcombine.high %v336_v61, %v340_v62  ;;  %v456_v3 = vld [vmem:[#allocation5 + $0x9c0] sm:$0xff]  ;;  %2940 = vmatprep.subr.bf16.mxu0 %v6205_v1  ;;  %v6332_v8 = vcombine.low %v336_v61, %v340_v62 }
  0xa9   :  { %v460_v4 = vld [vmem:[#allocation5 + $0x9e0] sm:$0xff]  ;;  %2941 = vmatpush2.bf16.msra.mxu0 %v6204_v7 }
  0xaa   :  { %v584_v5 = vld [vmem:[#allocation5 + $0xdc0] sm:$0xff]  ;;  %v6453_v9 = vcombine.high %v456_v3, %v460_v4  ;;  %2983 = vmatprep.subr.bf16.mxu1 %v6333_v2  ;;  %v6452_v17 = vcombine.low %v456_v3, %v460_v4 }
  0xab   :  { %v588_v6 = vld [vmem:[#allocation5 + $0xde0] sm:$0xff]  ;;  %2984 = vmatpush2.bf16.msra.mxu1 %v6332_v8 }
  0xac   :  { %v6581_v10 = vcombine.high %v584_v5, %v588_v6  ;;  %v448_v11 = vld [vmem:[#allocation5 + $0x980] sm:$0xff]  ;;  %2996 = vmatprep.subr.bf16.mxu0 %v6453_v9  ;;  %v6580_v18 = vcombine.low %v584_v5, %v588_v6 }
  0xad   :  { %v452_v12 = vld [vmem:[#allocation5 + $0x9a0] sm:$0xff] }
  0xae   :  { %v7705_v13 = vld [vmem:[#allocation3] ss:$28 sps:$4 sm:$0xff]   ;;  %v6445_v19 = vcombine.high %v448_v11, %v452_v12  ;;  %3039 = vmatprep.subr.bf16.mxu1 %v6581_v10  ;;  %2986 = vmatmul.mubr.bf16.vlgmr.msra.gmra.mxu1 %v6931_v16  ;;  %v6444_v26 = vcombine.low %v448_v11, %v452_v12 }
  0xaf   :  { %v576_v14 = vld [vmem:[#allocation5 + $0xd80] sm:$0xff]  ;;  %2943 = vmatmul.mubr.bf16.vlgmr.msra.gmra.mxu0 %v7705_v13  ;;  %3040 = vmatpush1.bf16.msra.mxu1 %v6580_v18  ;;  %v201_v10 = vld [vmem:[#allocation5 + $0x1c8] sm:$0xff] }
  0xb0   :  { %v580_v15 = vld [vmem:[#allocation5 + $0xda0] sm:$0xff]  ;;  %2997 = vmatpush1.bf16.msra.mxu0 %v6452_v17  ;;  %3071 = vmatprep.mubr.bf16.mxu1 %v7621_v32  ;;  %v205_v12 = vld [vmem:[#allocation5 + $0x1e8] sm:$0xff] }
  0xb1   :  { %v6573_v20 = vcombine.high %v576_v14, %v580_v15  ;;  %v440_v21 = vld [vmem:[#allocation5 + $0x940] sm:$0xff]  ;;  %2998 = vmatprep.subr.bf16.mxu0 %v6445_v19  ;;  %v6572_v27 = vcombine.low %v576_v14, %v580_v15  ;;  %3028 = vmatprep.mubr.bf16.mxu0 %v7708_v25  ;;  %v193_v19 = vld [vmem:[#allocation5 + $0x188] sm:$0xff] }
  0xb2   :  { %v444_v22 = vld [vmem:[#allocation5 + $0x960] sm:$0xff] }
  0xb3   :  { %v568_v23 = vld [vmem:[#allocation5 + $0xd40] sm:$0xff]  ;;  %v6437_v28 = vcombine.high %v440_v21, %v444_v22  ;;  %3041 = vmatprep.subr.bf16.mxu1 %v6573_v20  ;;  %v6436_v35 = vcombine.low %v440_v21, %v444_v22  ;;  %v6199_v21 = vcombine.high %v201_v10, %v205_v12  ;;  %v197_v22 = vld [vmem:[#allocation5 + $0x1a8] sm:$0xff] }
  0xb4   :  { %v572_v24 = vld [vmem:[#allocation5 + $0xd60] sm:$0xff]  ;;  %2999 = vmatpush1.bf16.msra.mxu0 %v6444_v26  ;;  %3042 = vmatpush1.bf16.msra.mxu1 %v6572_v27 }
  0xb5   :  { %v6565_v29 = vcombine.high %v568_v23, %v572_v24  ;;  %v432_v30 = vld [vmem:[#allocation5 + $0x900] sm:$0xff]  ;;  %3000 = vmatprep.subr.bf16.mxu0 %v6437_v28  ;;  %v6564_v36 = vcombine.low %v568_v23, %v572_v24  ;;  %v6198_v24 = vcombine.low %v201_v10, %v205_v12 }
  0xb6   :  { %v436_v31 = vld [vmem:[#allocation5 + $0x920] sm:$0xff] }
  0xb7   :  { %v560_v33 = vld [vmem:[#allocation5 + $0xd00] sm:$0xff]  ;;  %v6429_v37 = vcombine.high %v432_v30, %v436_v31  ;;  %3043 = vmatprep.subr.bf16.mxu1 %v6565_v29  ;;  %v6428_v43 = vcombine.low %v432_v30, %v436_v31  ;;  %v185_v29 = vld [vmem:[#allocation5 + $0x148] sm:$0xff]  ;;  %v6191_v30 = vcombine.high %v193_v19, %v197_v22 }
  0xb8   :  { %v564_v34 = vld [vmem:[#allocation5 + $0xd20] sm:$0xff]  ;;  %3001 = vmatpush1.bf16.msra.mxu0 %v6436_v35  ;;  %3044 = vmatpush1.bf16.msra.mxu1 %v6564_v36  ;;  %v189_v31 = vld [vmem:[#allocation5 + $0x168] sm:$0xff] }
  0xb9   :  { %v424_v38 = vld [vmem:[#allocation5 + $0x8c0] sm:$0xff]  ;;  %v6557_v41 = vcombine.high %v560_v33, %v564_v34  ;;  %3002 = vmatprep.subr.bf16.mxu0 %v6429_v37  ;;  %v6556_v44 = vcombine.low %v560_v33, %v564_v34  ;;  %v6190_v34 = vcombine.low %v193_v19, %v197_v22 }
  0xba   :  { %v428_v39 = vld [vmem:[#allocation5 + $0x8e0] sm:$0xff] }
  0xbb   :  { %v552_v40 = vld [vmem:[#allocation5 + $0xcc0] sm:$0xff]  ;;  %v6421_v45 = vcombine.high %v424_v38, %v428_v39  ;;  %3045 = vmatprep.subr.bf16.mxu1 %v6557_v41  ;;  %v6420_v51 = vcombine.low %v424_v38, %v428_v39  ;;  %v177_v38 = vld [vmem:[#allocation5 + $0x108] sm:$0xff]  ;;  %v6183_v39 = vcombine.high %v185_v29, %v189_v31 }
  0xbc   :  { %v556_v42 = vld [vmem:[#allocation5 + $0xce0] sm:$0xff]  ;;  %3003 = vmatpush1.bf16.msra.mxu0 %v6428_v43  ;;  %3046 = vmatpush1.bf16.msra.mxu1 %v6556_v44 }
  0xbd   :  { %v416_v46 = vld [vmem:[#allocation5 + $0x880] sm:$0xff]  ;;  %v6549_v49 = vcombine.high %v552_v40, %v556_v42  ;;  %3004 = vmatprep.subr.bf16.mxu0 %v6421_v45  ;;  %v6548_v52 = vcombine.low %v552_v40, %v556_v42  ;;  %v181_v40 = vld [vmem:[#allocation5 + $0x128] sm:$0xff]  ;;  %v6182_v42 = vcombine.low %v185_v29, %v189_v31 }
  0xbe   :  { %v420_v47 = vld [vmem:[#allocation5 + $0x8a0] sm:$0xff] }
  0xbf   :  { %v544_v48 = vld [vmem:[#allocation5 + $0xc80] sm:$0xff]  ;;  %v6413_v53 = vcombine.high %v416_v46, %v420_v47  ;;  %3047 = vmatprep.subr.bf16.mxu1 %v6549_v49  ;;  %v6412_v61 = vcombine.low %v416_v46, %v420_v47  ;;  %v169_v46 = vld [vmem:[#allocation5 + $0xc8] sm:$0xff]  ;;  %v6175_v47 = vcombine.high %v177_v38, %v181_v40 }
  0xc0   :  { %v548_v50 = vld [vmem:[#allocation5 + $0xca0] sm:$0xff]  ;;  %3005 = vmatpush1.bf16.msra.mxu0 %v6420_v51  ;;  %3048 = vmatpush1.bf16.msra.mxu1 %v6548_v52 }
  0xc1   :  { %v408_v54 = vld [vmem:[#allocation5 + $0x840] sm:$0xff]  ;;  %v6541_v58 = vcombine.high %v544_v48, %v548_v50  ;;  %3006 = vmatprep.subr.bf16.mxu0 %v6413_v53  ;;  %v6540_v62 = vcombine.low %v544_v48, %v548_v50  ;;  %v173_v48 = vld [vmem:[#allocation5 + $0xe8] sm:$0xff]  ;;  %v6174_v50 = vcombine.low %v177_v38, %v181_v40 }
  0xc2   :  { %v412_v55 = vld [vmem:[#allocation5 + $0x860] sm:$0xff]  ;;  %v161_v53 = vld [vmem:[#allocation5 + $0x88] sm:$0xff] }
  0xc3   :  { %v536_v56 = vld [vmem:[#allocation5 + $0xc40] sm:$0xff]  ;;  %v6405_v63 = vcombine.high %v408_v54, %v412_v55  ;;  %3049 = vmatprep.subr.bf16.mxu1 %v6541_v58  ;;  %v6404_v5 = vcombine.low %v408_v54, %v412_v55  ;;  %v6167_v54 = vcombine.high %v169_v46, %v173_v48  ;;  %v165_v55 = vld [vmem:[#allocation5 + $0xa8] sm:$0xff]  ;;  %v6166_v58 = vcombine.low %v169_v46, %v173_v48 }
  0xc4   :  { %v540_v59 = vld [vmem:[#allocation5 + $0xc60] sm:$0xff]  ;;  %3007 = vmatpush1.bf16.msra.mxu0 %v6412_v61  ;;  %3050 = vmatpush1.bf16.msra.mxu1 %v6540_v62 }
  0xc5   :  { %v400_v0 = vld [vmem:[#allocation5 + $0x800] sm:$0xff]  ;;  %v6533_v3 = vcombine.high %v536_v56, %v540_v59  ;;  %3008 = vmatprep.subr.bf16.mxu0 %v6405_v63  ;;  %v6532_v6 = vcombine.low %v536_v56, %v540_v59  ;;  %v153_v63 = vld [vmem:[#allocation5 + $0x48] sm:$0xff] }
  0xc6   :  { %v404_v1 = vld [vmem:[#allocation5 + $0x820] sm:$0xff] }
  0xc7   :  { %v528_v2 = vld [vmem:[#allocation5 + $0xc00] sm:$0xff]  ;;  %v6397_v7 = vcombine.high %v400_v0, %v404_v1  ;;  %3051 = vmatprep.subr.bf16.mxu1 %v6533_v3  ;;  %v6396_v14 = vcombine.low %v400_v0, %v404_v1  ;;  %v6159_v0 = vcombine.high %v161_v53, %v165_v55  ;;  %v157_v1 = vld [vmem:[#allocation5 + $0x68] sm:$0xff]  ;;  %v6158_v3 = vcombine.low %v161_v53, %v165_v55 }
  0xc8   :  { %v532_v4 = vld [vmem:[#allocation5 + $0xc20] sm:$0xff]  ;;  %3009 = vmatpush1.bf16.msra.mxu0 %v6404_v5  ;;  %3052 = vmatpush1.bf16.msra.mxu1 %v6532_v6  ;;  %v225_v55 = vld [vmem:[#allocation5 + $0x288] sm:$0xff] }
  0xc9   :  { %v520_v8 = vld [vmem:[#allocation5 + $0xbc0] sm:$0xff]  ;;  %v6525_v11 = vcombine.high %v528_v2, %v532_v4  ;;  %3010 = vmatprep.subr.bf16.mxu0 %v6397_v7  ;;  %v6524_v15 = vcombine.low %v528_v2, %v532_v4  ;;  %v145_v7 = vld [vmem:[#allocation5 + $0x8] sm:$0xff] }
  0xca   :  { %v524_v9 = vld [vmem:[#allocation5 + $0xbe0] sm:$0xff] }
  0xcb   :  { %v6517_v16 = vcombine.high %v520_v8, %v524_v9  ;;  %v512_v17 = vld [vmem:[#allocation5 + $0xb80] sm:$0xff]  ;;  %3053 = vmatprep.subr.bf16.mxu1 %v6525_v11  ;;  %v6516_v23 = vcombine.low %v520_v8, %v524_v9  ;;  %v6151_v8 = vcombine.high %v153_v63, %v157_v1  ;;  %v149_v9 = vld [vmem:[#allocation5 + $0x28] sm:$0xff]  ;;  %v6150_v11 = vcombine.low %v153_v63, %v157_v1 }
  0xcc   :  { %v516_v18 = vld [vmem:[#allocation5 + $0xba0] sm:$0xff]  ;;  %3011 = vmatpush1.bf16.msra.mxu0 %v6396_v14  ;;  %3054 = vmatpush1.bf16.msra.mxu1 %v6524_v15  ;;  %v265_v14 = vld [vmem:[#allocation5 + $0x3c8] sm:$0xff] }
  0xcd   :  { %v6932_v20 = vld [vmem:[#allocation3 + $0x18] ss:$28 sps:$4 sm:$0xff]   ;;  %3012 = vmatprep.subr.bf16.mxu0 %v6517_v16  ;;  %v6509_v26 = vcombine.high %v512_v17, %v516_v18  ;;  %3082 = vmatprep.subr.bf16.mxu1 %v6199_v21  ;;  %v6508_v33 = vcombine.low %v512_v17, %v516_v18  ;;  %v269_v15 = vld [vmem:[#allocation5 + $0x3e8] sm:$0xff]  ;;  %v6143_v17 = vcombine.high %v145_v7, %v149_v9  ;;  %v6935_v21 = vld [vmem:[#allocation3 + $0x10] ss:$28 sps:$4 sm:$0xff]  }
  0xce   :  { %v504_v27 = vld [vmem:[#allocation5 + $0xb40] sm:$0xff]  ;;  %v329_v16 = vld [vmem:[#allocation5 + $0x5c8] sm:$0xff] }
  0xcf   :  { %v508_v28 = vld [vmem:[#allocation5 + $0xb60] sm:$0xff]  ;;  %3072 = vmatmul.mubr.bf16.vlgmr.msra.gmra.mxu1 %v6932_v20  ;;  %v333_v18 = vld [vmem:[#allocation5 + $0x5e8] sm:$0xff]  ;;  %v6142_v20 = vcombine.low %v145_v7, %v149_v9 }
  0xd0   :  { %3013 = vmatpush2.bf16.msra.mxu0 %v6516_v23  ;;  %3083 = vmatpush1.bf16.msra.mxu1 %v6198_v24  ;;  %v6501_v35 = vcombine.high %v504_v27, %v508_v28  ;;  %v496_v36 = vld [vmem:[#allocation5 + $0xb00] sm:$0xff]  ;;  %v6500_v41 = vcombine.low %v504_v27, %v508_v28  ;;  %v6327_v22 = vcombine.high %v329_v16, %v333_v18  ;;  %v257_v23 = vld [vmem:[#allocation5 + $0x388] sm:$0xff] }
  0xd1   :  { %3014 = vmatprep.subr.bf16.mxu0 %v6509_v26  ;;  %v500_v37 = vld [vmem:[#allocation5 + $0xb20] sm:$0xff]  ;;  %3084 = vmatprep.subr.bf16.mxu1 %v6191_v30  ;;  %v261_v24 = vld [vmem:[#allocation5 + $0x3a8] sm:$0xff]  ;;  %v6263_v27 = vcombine.high %v265_v14, %v269_v15  ;;  %v6326_v29 = vcombine.low %v329_v16, %v333_v18  ;;  %v6262_v30 = vcombine.low %v265_v14, %v269_v15 }
  0xd2   :  { %3114 = vmatprep.mubr.bf16.mxu1 %v7699_v57  ;;  %v6493_v43 = vcombine.high %v496_v36, %v500_v37  ;;  %v488_v44 = vld [vmem:[#allocation5 + $0xac0] sm:$0xff]  ;;  %v6492_v49 = vcombine.low %v496_v36, %v500_v37  ;;  %v321_v26 = vld [vmem:[#allocation5 + $0x588] sm:$0xff] }
  0xd3   :  { %v492_v45 = vld [vmem:[#allocation5 + $0xae0] sm:$0xff]  ;;  %v325_v28 = vld [vmem:[#allocation5 + $0x5a8] sm:$0xff] }
  0xd4   :  { %3015 = vmatpush2.bf16.msra.mxu0 %v6508_v33  ;;  %3085 = vmatpush1.bf16.msra.mxu1 %v6190_v34  ;;  %v6485_v51 = vcombine.high %v488_v44, %v492_v45  ;;  %v480_v52 = vld [vmem:[#allocation5 + $0xa80] sm:$0xff]  ;;  %v6484_v56 = vcombine.low %v488_v44, %v492_v45  ;;  %v6319_v31 = vcombine.high %v321_v26, %v325_v28  ;;  %v249_v33 = vld [vmem:[#allocation5 + $0x348] sm:$0xff] }
  0xd5   :  { %3016 = vmatprep.subr.bf16.mxu0 %v6501_v35  ;;  %3086 = vmatprep.subr.bf16.mxu1 %v6183_v39  ;;  %v484_v57 = vld [vmem:[#allocation5 + $0xaa0] sm:$0xff]  ;;  %v253_v34 = vld [vmem:[#allocation5 + $0x368] sm:$0xff]  ;;  %v6255_v35 = vcombine.high %v257_v23, %v261_v24  ;;  %v6318_v38 = vcombine.low %v321_v26, %v325_v28  ;;  %v6254_v39 = vcombine.low %v257_v23, %v261_v24 }
  0xd6   :  { %v6477_v59 = vcombine.high %v480_v52, %v484_v57  ;;  %v472_v61 = vld [vmem:[#allocation5 + $0xa40] sm:$0xff]  ;;  %v6476_v2 = vcombine.low %v480_v52, %v484_v57  ;;  %v313_v36 = vld [vmem:[#allocation5 + $0x548] sm:$0xff]  ;;  %v6247_v44 = vcombine.high %v249_v33, %v253_v34 }
  0xd7   :  { %v476_v62 = vld [vmem:[#allocation5 + $0xa60] sm:$0xff]  ;;  %v317_v37 = vld [vmem:[#allocation5 + $0x568] sm:$0xff] }
  0xd8   :  { %3017 = vmatpush2.bf16.msra.mxu0 %v6500_v41  ;;  %3087 = vmatpush1.bf16.msra.mxu1 %v6182_v42  ;;  %v6469_v4 = vcombine.high %v472_v61, %v476_v62  ;;  %v464_v5 = vld [vmem:[#allocation5 + $0xa00] sm:$0xff]  ;;  %v6468_v10 = vcombine.low %v472_v61, %v476_v62  ;;  %v6311_v40 = vcombine.high %v313_v36, %v317_v37  ;;  %v241_v41 = vld [vmem:[#allocation5 + $0x308] sm:$0xff] }
  0xd9   :  { %3018 = vmatprep.subr.bf16.mxu0 %v6493_v43  ;;  %3088 = vmatprep.subr.bf16.mxu1 %v6175_v47  ;;  %v468_v6 = vld [vmem:[#allocation5 + $0xa20] sm:$0xff]  ;;  %v245_v42 = vld [vmem:[#allocation5 + $0x328] sm:$0xff]  ;;  %v6310_v46 = vcombine.low %v313_v36, %v317_v37  ;;  %v6246_v47 = vcombine.low %v249_v33, %v253_v34 }
  0xda   :  { %v6461_v12 = vcombine.high %v464_v5, %v468_v6  ;;  %v6460_v19 = vcombine.low %v464_v5, %v468_v6  ;;  %v305_v43 = vld [vmem:[#allocation5 + $0x508] sm:$0xff]  ;;  %v6238_v53 = vcombine.low %v241_v41, %v245_v42 }
  0xdb   :  { %v309_v45 = vld [vmem:[#allocation5 + $0x528] sm:$0xff] }
  0xdc   :  { %3019 = vmatpush2.bf16.msra.mxu0 %v6492_v49  ;;  %3089 = vmatpush1.bf16.msra.mxu1 %v6174_v50  ;;  %v6303_v48 = vcombine.high %v305_v43, %v309_v45  ;;  %v233_v49 = vld [vmem:[#allocation5 + $0x2c8] sm:$0xff]  ;;  %v6302_v57 = vcombine.low %v305_v43, %v309_v45 }
  0xdd   :  { %3020 = vmatprep.subr.bf16.mxu0 %v6485_v51  ;;  %3090 = vmatprep.subr.bf16.mxu1 %v6167_v54  ;;  %v237_v50 = vld [vmem:[#allocation5 + $0x2e8] sm:$0xff] }
  0xde   :  { %v297_v51 = vld [vmem:[#allocation5 + $0x4c8] sm:$0xff]  ;;  %v6230_v63 = vcombine.low %v233_v49, %v237_v50 }
  0xdf   :  { %v301_v52 = vld [vmem:[#allocation5 + $0x4e8] sm:$0xff] }
  0xe0   :  { %3021 = vmatpush2.bf16.msra.mxu0 %v6484_v56  ;;  %3091 = vmatpush1.bf16.msra.mxu1 %v6166_v58  ;;  %v6295_v54 = vcombine.high %v297_v51, %v301_v52  ;;  %v229_v56 = vld [vmem:[#allocation5 + $0x2a8] sm:$0xff]  ;;  %v6294_v62 = vcombine.low %v297_v51, %v301_v52 }
  0xe1   :  { %3022 = vmatprep.subr.bf16.mxu0 %v6477_v59  ;;  %3092 = vmatprep.subr.bf16.mxu1 %v6159_v0  ;;  %v289_v58 = vld [vmem:[#allocation5 + $0x488] sm:$0xff]  ;;  %v6231_v59 = vcombine.high %v233_v49, %v237_v50  ;;  %v6222_v7 = vcombine.low %v225_v55, %v229_v56 }
  0xe2   :  { %v293_v61 = vld [vmem:[#allocation5 + $0x4a8] sm:$0xff] }
  0xe3   :  { %v6287_v0 = vcombine.high %v289_v58, %v293_v61  ;;  %v217_v1 = vld [vmem:[#allocation5 + $0x248] sm:$0xff]  ;;  %v6286_v6 = vcombine.low %v289_v58, %v293_v61 }
  0xe4   :  { %3023 = vmatpush2.bf16.msra.mxu0 %v6476_v2  ;;  %3093 = vmatpush1.bf16.msra.mxu1 %v6158_v3  ;;  %v221_v2 = vld [vmem:[#allocation5 + $0x268] sm:$0xff] }
  0xe5   :  { %3024 = vmatprep.subr.bf16.mxu0 %v6469_v4  ;;  %3094 = vmatprep.subr.bf16.mxu1 %v6151_v8  ;;  %v281_v3 = vld [vmem:[#allocation5 + $0x448] sm:$0xff]  ;;  %v6223_v4 = vcombine.high %v225_v55, %v229_v56  ;;  %v6214_v16 = vcombine.low %v217_v1, %v221_v2 }
  0xe6   :  { %v285_v5 = vld [vmem:[#allocation5 + $0x468] sm:$0xff] }
  0xe7   :  { %v6279_v8 = vcombine.high %v281_v3, %v285_v5  ;;  %v209_v9 = vld [vmem:[#allocation5 + $0x208] sm:$0xff]  ;;  %v6278_v15 = vcombine.low %v281_v3, %v285_v5 }
  0xe8   :  { %3025 = vmatpush2.bf16.msra.mxu0 %v6468_v10  ;;  %3095 = vmatpush1.bf16.msra.mxu1 %v6150_v11  ;;  %v213_v10 = vld [vmem:[#allocation5 + $0x228] sm:$0xff] }
  0xe9   :  { %3026 = vmatprep.subr.bf16.mxu0 %v6461_v12  ;;  %3096 = vmatprep.subr.bf16.mxu1 %v6143_v17  ;;  %v273_v11 = vld [vmem:[#allocation5 + $0x408] sm:$0xff]  ;;  %v6215_v12 = vcombine.high %v217_v1, %v221_v2  ;;  %v6206_v24 = vcombine.low %v209_v9, %v213_v10 }
  0xea   :  { %v277_v14 = vld [vmem:[#allocation5 + $0x428] sm:$0xff] }
  0xeb   :  { %v6271_v17 = vcombine.high %v273_v11, %v277_v14  ;;  %v393_v18 = vld [vmem:[#allocation5 + $0x7c8] sm:$0xff]  ;;  %v6270_v23 = vcombine.low %v273_v11, %v277_v14 }
  0xec   :  { %3027 = vmatpush2.bf16.msra.mxu0 %v6460_v19  ;;  %3097 = vmatpush1.bf16.msra.mxu1 %v6142_v20  ;;  %v397_v19 = vld [vmem:[#allocation5 + $0x7e8] sm:$0xff] }
  0xed   :  { %3125 = vmatprep.subr.bf16.mxu0 %v6327_v22  ;;  %3098 = vmatprep.subr.bf16.mxu1 %v6263_v27  ;;  %v457_v20 = vld [vmem:[#allocation5 + $0x9c8] sm:$0xff]  ;;  %v6391_v26 = vcombine.high %v393_v18, %v397_v19  ;;  %v6390_v33 = vcombine.low %v393_v18, %v397_v19 }
  0xee   :  { %v461_v22 = vld [vmem:[#allocation5 + $0x9e8] sm:$0xff] }
  0xef   :  { %3029 = vmatmul.mubr.bf16.vlgmr.msra.gmra.mxu0 %v6935_v21  ;;  %v6207_v21 = vcombine.high %v209_v9, %v213_v10  ;;  %v385_v27 = vld [vmem:[#allocation5 + $0x788] sm:$0xff]  ;;  %v6454_v34 = vcombine.low %v457_v20, %v461_v22 }
  0xf0   :  { %3126 = vmatpush1.bf16.msra.mxu0 %v6326_v29  ;;  %3157 = vmatprep.mubr.bf16.mxu0 %v7701_v60  ;;  %v6239_v60 = vcombine.high %v241_v41, %v245_v42  ;;  %v389_v28 = vld [vmem:[#allocation5 + $0x7a8] sm:$0xff] }
  0xf1   :  { %3099 = vmatpush2.bf16.msra.mxu1 %v6262_v30  ;;  %3127 = vmatprep.subr.bf16.mxu0 %v6319_v31  ;;  %v449_v29 = vld [vmem:[#allocation5 + $0x988] sm:$0xff]  ;;  %v6455_v30 = vcombine.high %v457_v20, %v461_v22  ;;  %v6382_v41 = vcombine.low %v385_v27, %v389_v28 }
  0xf2   :  { %3100 = vmatprep.subr.bf16.mxu1 %v6255_v35  ;;  %v453_v31 = vld [vmem:[#allocation5 + $0x9a8] sm:$0xff]  ;;  %v6383_v35 = vcombine.high %v385_v27, %v389_v28 }
  0xf3   :  { %v377_v36 = vld [vmem:[#allocation5 + $0x748] sm:$0xff]  ;;  %v6446_v42 = vcombine.low %v449_v29, %v453_v31 }
  0xf4   :  { %3128 = vmatpush1.bf16.msra.mxu0 %v6318_v38  ;;  %v381_v37 = vld [vmem:[#allocation5 + $0x768] sm:$0xff] }
  0xf5   :  { %3101 = vmatpush2.bf16.msra.mxu1 %v6254_v39  ;;  %3129 = vmatprep.subr.bf16.mxu0 %v6311_v40  ;;  %v441_v38 = vld [vmem:[#allocation5 + $0x948] sm:$0xff]  ;;  %v6447_v39 = vcombine.high %v449_v29, %v453_v31  ;;  %v6375_v43 = vcombine.high %v377_v36, %v381_v37  ;;  %v6374_v49 = vcombine.low %v377_v36, %v381_v37 }
  0xf6   :  { %3102 = vmatprep.subr.bf16.mxu1 %v6247_v44  ;;  %v445_v40 = vld [vmem:[#allocation5 + $0x968] sm:$0xff] }
  0xf7   :  { %v369_v44 = vld [vmem:[#allocation5 + $0x708] sm:$0xff]  ;;  %v6438_v50 = vcombine.low %v441_v38, %v445_v40 }
  0xf8   :  { %3130 = vmatpush1.bf16.msra.mxu0 %v6310_v46  ;;  %v373_v45 = vld [vmem:[#allocation5 + $0x728] sm:$0xff] }
  0xf9   :  { %3103 = vmatpush2.bf16.msra.mxu1 %v6246_v47  ;;  %3131 = vmatprep.subr.bf16.mxu0 %v6303_v48  ;;  %v433_v46 = vld [vmem:[#allocation5 + $0x908] sm:$0xff]  ;;  %v6439_v47 = vcombine.high %v441_v38, %v445_v40 }
  0xfa   :  { %3104 = vmatprep.subr.bf16.mxu1 %v6239_v60  ;;  %v437_v48 = vld [vmem:[#allocation5 + $0x928] sm:$0xff] }
  0xfb   :  { %v361_v51 = vld [vmem:[#allocation5 + $0x6c8] sm:$0xff]  ;;  %v6430_v55 = vcombine.low %v433_v46, %v437_v48 }
  0xfc   :  { %3132 = vmatpush1.bf16.msra.mxu0 %v6302_v57  ;;  %v365_v60 = vld [vmem:[#allocation5 + $0x6e8] sm:$0xff]  ;;  %v6431_v57 = vcombine.high %v433_v46, %v437_v48 }
  0xfd   :  { %3105 = vmatpush2.bf16.msra.mxu1 %v6238_v53  ;;  %3133 = vmatprep.subr.bf16.mxu0 %v6295_v54  ;;  %v425_v52 = vld [vmem:[#allocation5 + $0x8c8] sm:$0xff]  ;;  %v6366_v54 = vcombine.low %v369_v44, %v373_v45  ;;  %v6359_v56 = vcombine.high %v361_v51, %v365_v60 }
  0xfe   :  { %3106 = vmatprep.subr.bf16.mxu1 %v6231_v59  ;;  %v429_v53 = vld [vmem:[#allocation5 + $0x8e8] sm:$0xff] }
  0xff   :  { %v353_v58 = vld [vmem:[#allocation5 + $0x688] sm:$0xff]  ;;  %v6423_v61 = vcombine.high %v425_v52, %v429_v53 }
 0x100   :  { %3134 = vmatpush1.bf16.msra.mxu0 %v6294_v62  ;;  %v417_v59 = vld [vmem:[#allocation5 + $0x888] sm:$0xff] }
 0x101   :  { %3107 = vmatpush2.bf16.msra.mxu1 %v6230_v63  ;;  %3135 = vmatprep.subr.bf16.mxu0 %v6287_v0  ;;  %v421_v62 = vld [vmem:[#allocation5 + $0x8a8] sm:$0xff]  ;;  %v6358_v63 = vcombine.low %v361_v51, %v365_v60  ;;  %v6422_v0 = vcombine.low %v425_v52, %v429_v53 }
 0x102   :  { %3108 = vmatprep.subr.bf16.mxu1 %v6223_v4  ;;  %v345_v2 = vld [vmem:[#allocation5 + $0x648] sm:$0xff]  ;;  %v6415_v5 = vcombine.high %v417_v59, %v421_v62 }
 0x103   :  { %v349_v3 = vld [vmem:[#allocation5 + $0x668] sm:$0xff] }
 0x104   :  { %3136 = vmatpush1.bf16.msra.mxu0 %v6286_v6  ;;  %v409_v4 = vld [vmem:[#allocation5 + $0x848] sm:$0xff]  ;;  %v6343_v9 = vcombine.high %v345_v2, %v349_v3 }
 0x105   :  { %3109 = vmatpush2.bf16.msra.mxu1 %v6222_v7  ;;  %3137 = vmatprep.subr.bf16.mxu0 %v6279_v8  ;;  %v413_v6 = vld [vmem:[#allocation5 + $0x868] sm:$0xff]  ;;  %v6414_v8 = vcombine.low %v417_v59, %v421_v62 }
 0x106   :  { %3110 = vmatprep.subr.bf16.mxu1 %v6215_v12  ;;  %v337_v10 = vld [vmem:[#allocation5 + $0x608] sm:$0xff]  ;;  %v6407_v14 = vcombine.high %v409_v4, %v413_v6 }
 0x107   :  { %v341_v11 = vld [vmem:[#allocation5 + $0x628] sm:$0xff] }
 0x108   :  { %3138 = vmatpush1.bf16.msra.mxu0 %v6278_v15  ;;  %v401_v12 = vld [vmem:[#allocation5 + $0x808] sm:$0xff]  ;;  %v6335_v18 = vcombine.high %v337_v10, %v341_v11 }
 0x109   :  { %3111 = vmatpush2.bf16.msra.mxu1 %v6214_v16  ;;  %3139 = vmatprep.subr.bf16.mxu0 %v6271_v17  ;;  %v405_v15 = vld [vmem:[#allocation5 + $0x828] sm:$0xff]  ;;  %v6342_v16 = vcombine.low %v345_v2, %v349_v3  ;;  %v6406_v17 = vcombine.low %v409_v4, %v413_v6 }
 0x10a   :  { %3112 = vmatprep.subr.bf16.mxu1 %v6207_v21  ;;  %v521_v19 = vld [vmem:[#allocation5 + $0xbc8] sm:$0xff]  ;;  %v6399_v22 = vcombine.high %v401_v12, %v405_v15 }
 0x10b   :  { %v525_v20 = vld [vmem:[#allocation5 + $0xbe8] sm:$0xff] }
 0x10c   :  { %3140 = vmatpush1.bf16.msra.mxu0 %v6270_v23  ;;  %v585_v21 = vld [vmem:[#allocation5 + $0xdc8] sm:$0xff]  ;;  %v6519_v31 = vcombine.high %v521_v19, %v525_v20 }
 0x10d   :  { %3113 = vmatpush2.bf16.msra.mxu1 %v6206_v24  ;;  %3141 = vmatprep.subr.bf16.mxu0 %v6391_v26  ;;  %v589_v23 = vld [vmem:[#allocation5 + $0xde8] sm:$0xff]  ;;  %v6334_v24 = vcombine.low %v337_v10, %v341_v11  ;;  %v6398_v26 = vcombine.low %v401_v12, %v405_v15 }
 0x10e   :  { %3168 = vmatprep.subr.bf16.mxu1 %v6455_v30  ;;  %v6583_v27 = vcombine.high %v585_v21, %v589_v23  ;;  %v513_v28 = vld [vmem:[#allocation5 + $0xb88] sm:$0xff] }
 0x10f   :  { %v517_v29 = vld [vmem:[#allocation5 + $0xba8] sm:$0xff] }
 0x110   :  { %3115 = vmatmul.mubr.bf16.vlgmr.msra.gmra.mxu1 %v7705_v13  ;;  %3142 = vmatpush2.bf16.msra.mxu0 %v6390_v33  ;;  %v6367_v13 = vcombine.high %v369_v44, %v373_v45  ;;  %v577_v30 = vld [vmem:[#allocation5 + $0xd88] sm:$0xff]  ;;  %v6511_v40 = vcombine.high %v513_v28, %v517_v29  ;;  %v6510_v44 = vcombine.low %v513_v28, %v517_v29 }
 0x111   :  { %3169 = vmatpush1.bf16.msra.mxu1 %v6454_v34  ;;  %3143 = vmatprep.subr.bf16.mxu0 %v6383_v35  ;;  %v581_v33 = vld [vmem:[#allocation5 + $0xda8] sm:$0xff]  ;;  %v6582_v34 = vcombine.low %v585_v21, %v589_v23  ;;  %v6518_v35 = vcombine.low %v521_v19, %v525_v20  ;;  %v202_v21 = vld [vmem:[#allocation5 + $0x1d0] sm:$0xff] }
 0x112   :  { %3170 = vmatprep.subr.bf16.mxu1 %v6447_v39  ;;  %3200 = vmatprep.mubr.bf16.mxu1 %v7708_v25  ;;  %v357_v25 = vld [vmem:[#allocation5 + $0x6a8] sm:$0xff]  ;;  %v6575_v36 = vcombine.high %v577_v30, %v581_v33  ;;  %v330_v23 = vld [vmem:[#allocation5 + $0x5d0] sm:$0xff] }
 0x113   :  { %v6351_v1 = vcombine.high %v353_v58, %v357_v25  ;;  %v6350_v7 = vcombine.low %v353_v58, %v357_v25  ;;  %v505_v37 = vld [vmem:[#allocation5 + $0xb48] sm:$0xff] }
 0x114   :  { %3144 = vmatpush2.bf16.msra.mxu0 %v6382_v41  ;;  %v509_v38 = vld [vmem:[#allocation5 + $0xb68] sm:$0xff] }
 0x115   :  { %3171 = vmatpush1.bf16.msra.mxu1 %v6446_v42  ;;  %3145 = vmatprep.subr.bf16.mxu0 %v6375_v43  ;;  %v569_v39 = vld [vmem:[#allocation5 + $0xd48] sm:$0xff]  ;;  %v6574_v43 = vcombine.low %v577_v30, %v581_v33  ;;  %v6502_v51 = vcombine.low %v505_v37, %v509_v38  ;;  %v194_v30 = vld [vmem:[#allocation5 + $0x190] sm:$0xff] }
 0x116   :  { %3172 = vmatprep.subr.bf16.mxu1 %v6439_v47  ;;  %v573_v41 = vld [vmem:[#allocation5 + $0xd68] sm:$0xff]  ;;  %v322_v33 = vld [vmem:[#allocation5 + $0x590] sm:$0xff] }
 0x117   :  { %v7716_v42 = vld [vmem:[#allocation3 + $0x8] ss:$28 sps:$4 sm:$0xff]   ;;  %v6567_v45 = vcombine.high %v569_v39, %v573_v41 }
 0x118   :  { %3146 = vmatpush2.bf16.msra.mxu0 %v6374_v49  ;;  %v497_v46 = vld [vmem:[#allocation5 + $0xb08] sm:$0xff]  ;;  %v6503_v49 = vcombine.high %v505_v37, %v509_v38 }
 0x119   :  { %3173 = vmatpush1.bf16.msra.mxu1 %v6438_v50  ;;  %3147 = vmatprep.subr.bf16.mxu0 %v6367_v13  ;;  %v501_v47 = vld [vmem:[#allocation5 + $0xb28] sm:$0xff]  ;;  %v6566_v13 = vcombine.low %v569_v39, %v573_v41  ;;  %v186_v39 = vld [vmem:[#allocation5 + $0x150] sm:$0xff] }
 0x11a   :  { %3174 = vmatprep.subr.bf16.mxu1 %v6431_v57  ;;  %v561_v48 = vld [vmem:[#allocation5 + $0xd08] sm:$0xff]  ;;  %v6494_v58 = vcombine.low %v497_v46, %v501_v47  ;;  %v314_v41 = vld [vmem:[#allocation5 + $0x550] sm:$0xff] }
 0x11b   :  { %v565_v50 = vld [vmem:[#allocation5 + $0xd28] sm:$0xff] }
 0x11c   :  { %3148 = vmatpush2.bf16.msra.mxu0 %v6366_v54  ;;  %v6559_v60 = vcombine.high %v561_v48, %v565_v50  ;;  %v489_v52 = vld [vmem:[#allocation5 + $0xac8] sm:$0xff]  ;;  %v6495_v54 = vcombine.high %v497_v46, %v501_v47  ;;  %v7723_v46 = vld [vmem:[#allocation3 + $0x10] ss:$28 sps:$4 sm:$0xff]  }
 0x11d   :  { %3175 = vmatpush1.bf16.msra.mxu1 %v6430_v55  ;;  %3149 = vmatprep.subr.bf16.mxu0 %v6359_v56  ;;  %v493_v57 = vld [vmem:[#allocation5 + $0xae8] sm:$0xff]  ;;  %v6558_v56 = vcombine.low %v561_v48, %v565_v50  ;;  %v178_v50 = vld [vmem:[#allocation5 + $0x110] sm:$0xff] }
 0x11e   :  { %3176 = vmatprep.subr.bf16.mxu1 %v6423_v61  ;;  %v553_v53 = vld [vmem:[#allocation5 + $0xcc8] sm:$0xff]  ;;  %v6486_v2 = vcombine.low %v489_v52, %v493_v57 }
 0x11f   :  { %v557_v55 = vld [vmem:[#allocation5 + $0xce8] sm:$0xff] }
 0x120   :  { %3150 = vmatpush2.bf16.msra.mxu0 %v6358_v63  ;;  %v6551_v25 = vcombine.high %v553_v53, %v557_v55  ;;  %v481_v59 = vld [vmem:[#allocation5 + $0xa88] sm:$0xff]  ;;  %v6487_v63 = vcombine.high %v489_v52, %v493_v57  ;;  %v310_v52 = vld [vmem:[#allocation5 + $0x530] sm:$0xff] }
 0x121   :  { %3177 = vmatpush1.bf16.msra.mxu1 %v6422_v0  ;;  %3151 = vmatprep.subr.bf16.mxu0 %v6351_v1  ;;  %v485_v61 = vld [vmem:[#allocation5 + $0xaa8] sm:$0xff]  ;;  %v6550_v1 = vcombine.low %v553_v53, %v557_v55  ;;  %v7729_v53 = vld [vmem:[#allocation3 + $0xc] ss:$28 sps:$4 sm:$0xff]  }
 0x122   :  { %3178 = vmatprep.subr.bf16.mxu1 %v6415_v5  ;;  %v545_v62 = vld [vmem:[#allocation5 + $0xc88] sm:$0xff]  ;;  %v6478_v10 = vcombine.low %v481_v59, %v485_v61 }
 0x123   :  { %v549_v0 = vld [vmem:[#allocation5 + $0xca8] sm:$0xff] }
 0x124   :  { %3152 = vmatpush2.bf16.msra.mxu0 %v6350_v7  ;;  %v6543_v3 = vcombine.high %v545_v62, %v549_v0  ;;  %v473_v4 = vld [vmem:[#allocation5 + $0xa48] sm:$0xff]  ;;  %v6479_v7 = vcombine.high %v481_v59, %v485_v61  ;;  %v174_v59 = vld [vmem:[#allocation5 + $0xf0] sm:$0xff] }
 0x125   :  { %3179 = vmatpush1.bf16.msra.mxu1 %v6414_v8  ;;  %3153 = vmatprep.subr.bf16.mxu0 %v6343_v9  ;;  %v477_v5 = vld [vmem:[#allocation5 + $0xa68] sm:$0xff]  ;;  %v6542_v9 = vcombine.low %v545_v62, %v549_v0  ;;  %v298_v61 = vld [vmem:[#allocation5 + $0x4d0] sm:$0xff] }
 0x126   :  { %3180 = vmatprep.subr.bf16.mxu1 %v6407_v14  ;;  %v537_v6 = vld [vmem:[#allocation5 + $0xc48] sm:$0xff]  ;;  %v6470_v19 = vcombine.low %v473_v4, %v477_v5  ;;  %v302_v62 = vld [vmem:[#allocation5 + $0x4f0] sm:$0xff] }
 0x127   :  { %v541_v8 = vld [vmem:[#allocation5 + $0xc68] sm:$0xff] }
 0x128   :  { %3154 = vmatpush2.bf16.msra.mxu0 %v6342_v16  ;;  %v6535_v11 = vcombine.high %v537_v6, %v541_v8  ;;  %v465_v12 = vld [vmem:[#allocation5 + $0xa08] sm:$0xff]  ;;  %v6471_v16 = vcombine.high %v473_v4, %v477_v5  ;;  %v166_v4 = vld [vmem:[#allocation5 + $0xb0] sm:$0xff] }
 0x129   :  { %3181 = vmatpush1.bf16.msra.mxu1 %v6406_v17  ;;  %3155 = vmatprep.subr.bf16.mxu0 %v6335_v18  ;;  %v469_v14 = vld [vmem:[#allocation5 + $0xa28] sm:$0xff]  ;;  %v6534_v18 = vcombine.low %v537_v6, %v541_v8  ;;  %v290_v5 = vld [vmem:[#allocation5 + $0x490] sm:$0xff]  ;;  %v6296_v8 = vcombine.low %v298_v61, %v302_v62 }
 0x12a   :  { %3182 = vmatprep.subr.bf16.mxu1 %v6399_v22  ;;  %v529_v15 = vld [vmem:[#allocation5 + $0xc08] sm:$0xff]  ;;  %v206_v22 = vld [vmem:[#allocation5 + $0x1f0] sm:$0xff]  ;;  %v6462_v28 = vcombine.low %v465_v12, %v469_v14 }
 0x12b   :  { %v533_v17 = vld [vmem:[#allocation5 + $0xc28] sm:$0xff]  ;;  %v6201_v29 = vcombine.high %v202_v21, %v206_v22  ;;  %v294_v6 = vld [vmem:[#allocation5 + $0x4b0] sm:$0xff] }
 0x12c   :  { %3156 = vmatpush2.bf16.msra.mxu0 %v6334_v24  ;;  %v6527_v20 = vcombine.high %v529_v15, %v533_v17  ;;  %v6463_v24 = vcombine.high %v465_v12, %v469_v14  ;;  %v7726_v57 = vld [vmem:[#allocation3 + $0x4] ss:$28 sps:$4 sm:$0xff]   ;;  %v158_v12 = vld [vmem:[#allocation5 + $0x70] sm:$0xff] }
 0x12d   :  { %3183 = vmatpush1.bf16.msra.mxu1 %v6398_v26  ;;  %3211 = vmatprep.subr.bf16.mxu0 %v6583_v27  ;;  %v334_v26 = vld [vmem:[#allocation5 + $0x5f0] sm:$0xff]  ;;  %v6526_v27 = vcombine.low %v529_v15, %v533_v17  ;;  %v594_v17 = vlaneseq }
 0x12e   :  { %3184 = vmatprep.subr.bf16.mxu1 %v6519_v31  ;;  %v198_v31 = vld [vmem:[#allocation5 + $0x1b0] sm:$0xff]  ;;  %v6328_v37 = vcombine.low %v330_v23, %v334_v26 }
 0x12f   :  { %3158 = vmatmul.mubr.bf16.vlgmr.msra.gmra.mxu0 %v7716_v42  ;;  %v6193_v38 = vcombine.high %v194_v30, %v198_v31  ;;  %v6192_v47 = vcombine.low %v194_v30, %v198_v31  ;;  %v282_v14 = vld [vmem:[#allocation5 + $0x450] sm:$0xff] }
 0x130   :  { %3212 = vmatpush1.bf16.msra.mxu0 %v6582_v34  ;;  %3243 = vmatprep.mubr.bf16.mxu0 %v7621_v32  ;;  %v6329_v34 = vcombine.high %v330_v23, %v334_v26  ;;  %v286_v15 = vld [vmem:[#allocation5 + $0x470] sm:$0xff] }
 0x131   :  { %3185 = vmatpush2.bf16.msra.mxu1 %v6518_v35  ;;  %3213 = vmatprep.subr.bf16.mxu0 %v6575_v36  ;;  %v326_v35 = vld [vmem:[#allocation5 + $0x5b0] sm:$0xff]  ;;  %v6200_v36 = vcombine.low %v202_v21, %v206_v22 }
 0x132   :  { %3186 = vmatprep.subr.bf16.mxu1 %v6511_v40  ;;  %v190_v40 = vld [vmem:[#allocation5 + $0x170] sm:$0xff]  ;;  %v6320_v48 = vcombine.low %v322_v33, %v326_v35 }
 0x133   :  { %v146_v21 = vld [vmem:[#allocation5 + $0x10] sm:$0xff] }
 0x134   :  { %3214 = vmatpush1.bf16.msra.mxu0 %v6574_v43  ;;  %v6321_v43 = vcombine.high %v322_v33, %v326_v35  ;;  %v150_v22 = vld [vmem:[#allocation5 + $0x30] sm:$0xff] }
 0x135   :  { %3187 = vmatpush2.bf16.msra.mxu1 %v6510_v44  ;;  %3215 = vmatprep.subr.bf16.mxu0 %v6567_v45  ;;  %v318_v44 = vld [vmem:[#allocation5 + $0x570] sm:$0xff]  ;;  %v7720_v45 = vld [vmem:[#allocation3 + $0x18] ss:$28 sps:$4 sm:$0xff]  }
 0x136   :  { %3188 = vmatprep.subr.bf16.mxu1 %v6503_v49  ;;  %v6185_v49 = vcombine.high %v186_v39, %v190_v40  ;;  %v6312_v55 = vcombine.low %v314_v41, %v318_v44  ;;  %v274_v23 = vld [vmem:[#allocation5 + $0x410] sm:$0xff] }
 0x137   :  { %v266_v31 = vld [vmem:[#allocation5 + $0x3d0] sm:$0xff] }
 0x138   :  { %3216 = vmatpush1.bf16.msra.mxu0 %v6566_v13  ;;  %v182_v13 = vld [vmem:[#allocation5 + $0x130] sm:$0xff] }
 0x139   :  { %3189 = vmatpush2.bf16.msra.mxu1 %v6502_v51  ;;  %3217 = vmatprep.subr.bf16.mxu0 %v6559_v60  ;;  %v306_v51 = vld [vmem:[#allocation5 + $0x510] sm:$0xff]  ;;  %v6313_v60 = vcombine.high %v314_v41, %v318_v44 }
 0x13a   :  { %3190 = vmatprep.subr.bf16.mxu1 %v6495_v54  ;;  %v6184_v54 = vcombine.low %v186_v39, %v190_v40  ;;  %v6304_v0 = vcombine.low %v306_v51, %v310_v52  ;;  %v270_v33 = vld [vmem:[#allocation5 + $0x3f0] sm:$0xff]  ;;  %v7737_v39 = vld [vmem:[#allocation7] sm:$0xff] }
 0x13b   :  { %v398_v35 = vld [vmem:[#allocation5 + $0x7f0] sm:$0xff]  ;;  %v6265_v40 = vcombine.high %v266_v31, %v270_v33 }
 0x13c   :  { %3218 = vmatpush1.bf16.msra.mxu0 %v6558_v56  ;;  %v6177_v56 = vcombine.high %v178_v50, %v182_v13  ;;  %v262_v44 = vld [vmem:[#allocation5 + $0x3b0] sm:$0xff] }
 0x13d   :  { %3191 = vmatpush2.bf16.msra.mxu1 %v6494_v58  ;;  %3219 = vmatprep.subr.bf16.mxu0 %v6551_v25  ;;  %v6305_v58 = vcombine.high %v306_v51, %v310_v52  ;;  %v170_v25 = vld [vmem:[#allocation5 + $0xd0] sm:$0xff] }
 0x13e   :  { %3192 = vmatprep.subr.bf16.mxu1 %v6487_v63  ;;  %v6176_v63 = vcombine.low %v178_v50, %v182_v13  ;;  %v6264_v50 = vcombine.low %v266_v31, %v270_v33  ;;  %v250_v52 = vld [vmem:[#allocation5 + $0x350] sm:$0xff] }
 0x140   :  { %3220 = vmatpush1.bf16.msra.mxu0 %v6550_v1  ;;  %v6169_v1 = vcombine.high %v170_v25, %v174_v59 }
 0x141   :  { %3193 = vmatpush2.bf16.msra.mxu1 %v6486_v2  ;;  %3221 = vmatprep.subr.bf16.mxu0 %v6543_v3  ;;  %v6297_v2 = vcombine.high %v298_v61, %v302_v62  ;;  %v162_v3 = vld [vmem:[#allocation5 + $0x90] sm:$0xff] }
 0x142   :  { %3194 = vmatprep.subr.bf16.mxu1 %v6479_v7  ;;  %v6168_v7 = vcombine.low %v170_v25, %v174_v59 }
 0x144   :  { %3222 = vmatpush1.bf16.msra.mxu0 %v6542_v9  ;;  %v6161_v9 = vcombine.high %v162_v3, %v166_v4 }
 0x145   :  { %3195 = vmatpush2.bf16.msra.mxu1 %v6478_v10  ;;  %3223 = vmatprep.subr.bf16.mxu0 %v6535_v11  ;;  %v6289_v10 = vcombine.high %v290_v5, %v294_v6  ;;  %v154_v11 = vld [vmem:[#allocation5 + $0x50] sm:$0xff] }
 0x146   :  { %3196 = vmatprep.subr.bf16.mxu1 %v6471_v16  ;;  %v6160_v16 = vcombine.low %v162_v3, %v166_v4  ;;  %v6152_v26 = vcombine.low %v154_v11, %v158_v12  ;;  %v242_v4 = vld [vmem:[#allocation5 + $0x310] sm:$0xff] }
 0x148   :  { %3224 = vmatpush1.bf16.msra.mxu0 %v6534_v18  ;;  %v6288_v18 = vcombine.low %v290_v5, %v294_v6  ;;  %v246_v5 = vld [vmem:[#allocation5 + $0x330] sm:$0xff] }
 0x149   :  { %3197 = vmatpush2.bf16.msra.mxu1 %v6470_v19  ;;  %3225 = vmatprep.subr.bf16.mxu0 %v6527_v20  ;;  %v6153_v19 = vcombine.high %v154_v11, %v158_v12  ;;  %v6281_v20 = vcombine.high %v282_v14, %v286_v15 }
 0x14a   :  { %3198 = vmatprep.subr.bf16.mxu1 %v6463_v24  ;;  %v278_v24 = vld [vmem:[#allocation5 + $0x430] sm:$0xff] }
 0x14b   :  { %v6273_v30 = vcombine.high %v274_v23, %v278_v24 }
 0x14c   :  { %3226 = vmatpush1.bf16.msra.mxu0 %v6526_v27  ;;  %v7732_v27 = vshrl.u32 %v594_v17, 7  ;;  %v234_v17 = vld [vmem:[#allocation5 + $0x2d0] sm:$0xff] }
 0x14d   :  { %3199 = vmatpush2.bf16.msra.mxu1 %v6462_v28  ;;  %3254 = vmatprep.subr.bf16.mxu0 %v6201_v29  ;;  %v6280_v28 = vcombine.low %v282_v14, %v286_v15  ;;  %v6145_v29 = vcombine.high %v146_v21, %v150_v22  ;;  %v6241_v14 = vcombine.high %v242_v4, %v246_v5 }
 0x14e   :  { %3297 = vmatprep.subr.bf16.mxu1 %v6329_v34  ;;  %v394_v34 = vld [vmem:[#allocation5 + $0x7d0] sm:$0xff] }
 0x14f   :  { %3244 = vmatmul.mubr.bf16.vlgmr.msra.gmra.mxu0 %v7720_v45  ;;  %v6393_v41 = vcombine.high %v394_v34, %v398_v35  ;;  %v6392_v13 = vcombine.low %v394_v34, %v398_v35 }
 0x150   :  { %3201 = vmatmul.mubr.bf16.vlgmr.msra.gmra.mxu1 %v7723_v46  ;;  %3255 = vmatpush1.bf16.msra.mxu0 %v6200_v36  ;;  %v6144_v36 = vcombine.low %v146_v21, %v150_v22  ;;  %v6240_v21 = vcombine.low %v242_v4, %v246_v5  ;;  %v450_v4 = vld [vmem:[#allocation5 + $0x990] sm:$0xff] }
 0x151   :  { %3298 = vmatpush1.bf16.msra.mxu1 %v6328_v37  ;;  %3256 = vmatprep.subr.bf16.mxu0 %v6193_v38  ;;  %v7735_v37 = vsub.s32 0, %v7732_v27  ;;  %v6272_v38 = vcombine.low %v274_v23, %v278_v24  ;;  %v454_v5 = vld [vmem:[#allocation5 + $0x9b0] sm:$0xff] }
 0x152   :  { %3299 = vmatprep.subr.bf16.mxu1 %v6321_v43  ;;  %3286 = vmatprep.mubr.bf16.mxu0 %v7726_v57  ;;  %v258_v43 = vld [vmem:[#allocation5 + $0x390] sm:$0xff] }
 0x153   :  { %3329 = vmatprep.mubr.bf16.mxu1 %v7729_v53  ;;  %v6257_v51 = vcombine.high %v258_v43, %v262_v44  ;;  %v6256_v61 = vcombine.low %v258_v43, %v262_v44 }
 0x154   :  { %3257 = vmatpush1.bf16.msra.mxu0 %v6192_v47  ;;  %v386_v47 = vld [vmem:[#allocation5 + $0x790] sm:$0xff] }
 0x155   :  { %3300 = vmatpush1.bf16.msra.mxu1 %v6320_v48  ;;  %3258 = vmatprep.subr.bf16.mxu0 %v6185_v49  ;;  %v390_v48 = vld [vmem:[#allocation5 + $0x7b0] sm:$0xff]  ;;  %v597_v49 = vrot.slane %v7737_v39, %v7735_v37 }
 0x156   :  { %3301 = vmatprep.subr.bf16.mxu1 %v6313_v60  ;;  %v6385_v60 = vcombine.high %v386_v47, %v390_v48 }
 0x158   :  { %3259 = vmatpush1.bf16.msra.mxu0 %v6184_v54  ;;  %v254_v54 = vld [vmem:[#allocation5 + $0x370] sm:$0xff] }
 0x159   :  { %3302 = vmatpush1.bf16.msra.mxu1 %v6312_v55  ;;  %3260 = vmatprep.subr.bf16.mxu0 %v6177_v56  ;;  %v378_v56 = vld [vmem:[#allocation5 + $0x750] sm:$0xff] }
 0x15a   :  { %3303 = vmatprep.subr.bf16.mxu1 %v6305_v58  ;;  %v382_v58 = vld [vmem:[#allocation5 + $0x770] sm:$0xff] }
 0x15b   :  { %v6377_v3 = vcombine.high %v378_v56, %v382_v58  ;;  %v6376_v12 = vcombine.low %v378_v56, %v382_v58  ;;  %v458_v56 = vld [vmem:[#allocation5 + $0x9d0] sm:$0xff] }
 0x15c   :  { %3261 = vmatpush1.bf16.msra.mxu0 %v6176_v63  ;;  %v6384_v63 = vcombine.low %v386_v47, %v390_v48  ;;  %v462_v58 = vld [vmem:[#allocation5 + $0x9f0] sm:$0xff] }
 0x15d   :  { %3304 = vmatpush1.bf16.msra.mxu1 %v6304_v0  ;;  %3262 = vmatprep.subr.bf16.mxu0 %v6169_v1  ;;  %v6249_v0 = vcombine.high %v250_v52, %v254_v54 }
 0x15e   :  { %3305 = vmatprep.subr.bf16.mxu1 %v6297_v2 }
 0x160   :  { %3263 = vmatpush1.bf16.msra.mxu0 %v6168_v7  ;;  %v370_v7 = vld [vmem:[#allocation5 + $0x710] sm:$0xff] }
 0x161   :  { %3306 = vmatpush1.bf16.msra.mxu1 %v6296_v8  ;;  %3264 = vmatprep.subr.bf16.mxu0 %v6161_v9  ;;  %v374_v8 = vld [vmem:[#allocation5 + $0x730] sm:$0xff] }
 0x162   :  { %3307 = vmatprep.subr.bf16.mxu1 %v6289_v10  ;;  %v6248_v10 = vcombine.low %v250_v52, %v254_v54  ;;  %v6368_v22 = vcombine.low %v370_v7, %v374_v8 }
 0x164   :  { %3265 = vmatpush1.bf16.msra.mxu0 %v6160_v16  ;;  %v6369_v16 = vcombine.high %v370_v7, %v374_v8  ;;  %v582_v7 = vld [vmem:[#allocation5 + $0xdb0] sm:$0xff]  ;;  %v6456_v8 = vcombine.low %v458_v56, %v462_v58 }
 0x165   :  { %3308 = vmatpush1.bf16.msra.mxu1 %v6288_v18  ;;  %3266 = vmatprep.subr.bf16.mxu0 %v6153_v19  ;;  %v238_v18 = vld [vmem:[#allocation5 + $0x2f0] sm:$0xff] }
 0x166   :  { %3309 = vmatprep.subr.bf16.mxu1 %v6281_v20  ;;  %v362_v19 = vld [vmem:[#allocation5 + $0x6d0] sm:$0xff]  ;;  %v6233_v23 = vcombine.high %v234_v17, %v238_v18  ;;  %v6232_v31 = vcombine.low %v234_v17, %v238_v18 }
 0x167   :  { %v366_v20 = vld [vmem:[#allocation5 + $0x6f0] sm:$0xff] }
 0x168   :  { %3267 = vmatpush1.bf16.msra.mxu0 %v6152_v26  ;;  %v6361_v24 = vcombine.high %v362_v19, %v366_v20  ;;  %v226_v26 = vld [vmem:[#allocation5 + $0x290] sm:$0xff]  ;;  %v6360_v33 = vcombine.low %v362_v19, %v366_v20  ;;  %v6448_v19 = vcombine.low %v450_v4, %v454_v5 }
 0x169   :  { %3310 = vmatpush1.bf16.msra.mxu1 %v6280_v28  ;;  %3268 = vmatprep.subr.bf16.mxu0 %v6145_v29  ;;  %v230_v28 = vld [vmem:[#allocation5 + $0x2b0] sm:$0xff] }
 0x16a   :  { %3311 = vmatprep.subr.bf16.mxu1 %v6273_v30  ;;  %v354_v29 = vld [vmem:[#allocation5 + $0x690] sm:$0xff]  ;;  %v6225_v34 = vcombine.high %v226_v26, %v230_v28  ;;  %v6224_v43 = vcombine.low %v226_v26, %v230_v28 }
 0x16b   :  { %v358_v30 = vld [vmem:[#allocation5 + $0x6b0] sm:$0xff] }
 0x16c   :  { %3269 = vmatpush1.bf16.msra.mxu0 %v6144_v36  ;;  %v6353_v35 = vcombine.high %v354_v29, %v358_v30  ;;  %v218_v36 = vld [vmem:[#allocation5 + $0x250] sm:$0xff]  ;;  %v6352_v44 = vcombine.low %v354_v29, %v358_v30  ;;  %v7754_v29 = vld [vmem:[#allocation3 + $0x14] ss:$28 sps:$4 sm:$0xff]  }
 0x16d   :  { %3312 = vmatpush1.bf16.msra.mxu1 %v6272_v38  ;;  %3270 = vmatprep.subr.bf16.mxu0 %v6265_v40  ;;  %v222_v38 = vld [vmem:[#allocation5 + $0x270] sm:$0xff] }
 0x16e   :  { %3313 = vmatprep.subr.bf16.mxu1 %v6393_v41  ;;  %v2987_v59 = vpop.f32.mrf.mxu1  ;;  %v346_v40 = vld [vmem:[#allocation5 + $0x650] sm:$0xff]  ;;  %v6217_v47 = vcombine.high %v218_v36, %v222_v38 }
 0x16f   :  { %v2944_v55 = vpop.f32.mrf.mxu0  ;;  %v350_v41 = vld [vmem:[#allocation5 + $0x670] sm:$0xff] }
 0x170   :  { %v2945_v25 = vadd.f32 %v2944_v55, %v597_v49  ;;  %3271 = vmatpush2.bf16.msra.mxu0 %v6264_v50  ;;  %v7745_v2 = vpop.f32.mrf.mxu1  ;;  %v6345_v48 = vcombine.high %v346_v40, %v350_v41  ;;  %v214_v50 = vld [vmem:[#allocation5 + $0x230] sm:$0xff]  ;;  %v6344_v52 = vcombine.low %v346_v40, %v350_v41 }
 0x171   :  { %3314 = vmatpush2.bf16.msra.mxu1 %v6392_v13  ;;  %v7741_v62 = vpop.f32.mrf.mxu0  ;;  %3272 = vmatprep.subr.bf16.mxu0 %v6257_v51  ;;  %v338_v13 = vld [vmem:[#allocation5 + $0x610] sm:$0xff] }
 0x172   :  { %v7743_v1 = vadd.f32 %v2987_v59, %v2945_v25  ;;  %3315 = vmatprep.subr.bf16.mxu1 %v6385_v60  ;;  %v2991_v11 = vpop.f32.mrf.mxu1  ;;  %v342_v51 = vld [vmem:[#allocation5 + $0x630] sm:$0xff]  ;;  %v6216_v60 = vcombine.low %v218_v36, %v222_v38 }
 0x173   :  { %v2948_v6 = vpop.f32.mrf.mxu0  ;;  %v6337_v55 = vcombine.high %v338_v13, %v342_v51  ;;  %v586_v25 = vld [vmem:[#allocation5 + $0xdd0] sm:$0xff] }
 0x174   :  { %v2949_v9 = vadd.f32 %v2948_v6, %v597_v49  ;;  %3273 = vmatpush2.bf16.msra.mxu0 %v6256_v61  ;;  %v210_v49 = vld [vmem:[#allocation5 + $0x210] sm:$0xff] }
 0x175   :  { %3316 = vmatpush2.bf16.msra.mxu1 %v6384_v63  ;;  %3274 = vmatprep.subr.bf16.mxu0 %v6249_v0  ;;  %v6209_v54 = vcombine.high %v210_v49, %v214_v50  ;;  %v590_v59 = vld [vmem:[#allocation5 + $0xdf0] sm:$0xff]  ;;  %v6208_v61 = vcombine.low %v210_v49, %v214_v50  ;;  %v6336_v63 = vcombine.low %v338_v13, %v342_v51 }
 0x176   :  { %v7747_v15 = vadd.f32 %v2991_v11, %v2949_v9  ;;  %3317 = vmatprep.subr.bf16.mxu1 %v6377_v3  ;;  %v6457_v0 = vcombine.high %v458_v56, %v462_v58  ;;  %v6585_v3 = vcombine.high %v586_v25, %v590_v59  ;;  %v578_v6 = vld [vmem:[#allocation5 + $0xd90] sm:$0xff]  ;;  %v6584_v9 = vcombine.low %v586_v25, %v590_v59 }
 0x177   :  { %v6577_v11 = vcombine.high %v578_v6, %v582_v7  ;;  %v570_v17 = vld [vmem:[#allocation5 + $0xd50] sm:$0xff]  ;;  %v6576_v20 = vcombine.low %v578_v6, %v582_v7 }
 0x178   :  { %3275 = vmatpush2.bf16.msra.mxu0 %v6248_v10  ;;  %v6449_v10 = vcombine.high %v450_v4, %v454_v5  ;;  %v574_v18 = vld [vmem:[#allocation5 + $0xd70] sm:$0xff] }
 0x179   :  { %3318 = vmatpush2.bf16.msra.mxu1 %v6376_v12  ;;  %3276 = vmatprep.subr.bf16.mxu0 %v6241_v14  ;;  %v442_v12 = vld [vmem:[#allocation5 + $0x950] sm:$0xff]  ;;  %v6568_v30 = vcombine.low %v570_v17, %v574_v18 }
 0x17a   :  { %3319 = vmatprep.subr.bf16.mxu1 %v6369_v16  ;;  %v446_v14 = vld [vmem:[#allocation5 + $0x970] sm:$0xff]  ;;  %v7749_v16 = vld [vmem:[#allocation3] ss:$28 sps:$4 sm:$0xff]  }
 0x17b   :  { %v562_v26 = vld [vmem:[#allocation5 + $0xd10] sm:$0xff] }
 0x17c   :  { %3277 = vmatpush2.bf16.msra.mxu0 %v6240_v21  ;;  %v6441_v21 = vcombine.high %v442_v12, %v446_v14  ;;  %v566_v28 = vld [vmem:[#allocation5 + $0xd30] sm:$0xff] }
 0x17d   :  { %3320 = vmatpush2.bf16.msra.mxu1 %v6368_v22  ;;  %3278 = vmatprep.subr.bf16.mxu0 %v6233_v23  ;;  %v6569_v22 = vcombine.high %v570_v17, %v574_v18  ;;  %v434_v23 = vld [vmem:[#allocation5 + $0x910] sm:$0xff]  ;;  %v6560_v41 = vcombine.low %v562_v26, %v566_v28 }
 0x17e   :  { %3321 = vmatprep.subr.bf16.mxu1 %v6361_v24  ;;  %v438_v24 = vld [vmem:[#allocation5 + $0x930] sm:$0xff] }
 0x17f   :  { %v554_v36 = vld [vmem:[#allocation5 + $0xcd0] sm:$0xff]  ;;  %v6432_v40 = vcombine.low %v434_v23, %v438_v24 }
 0x180   :  { %3279 = vmatpush2.bf16.msra.mxu0 %v6232_v31  ;;  %v6433_v31 = vcombine.high %v434_v23, %v438_v24  ;;  %v558_v38 = vld [vmem:[#allocation5 + $0xcf0] sm:$0xff]  ;;  %v7757_v23 = vpop.f32.mrf.mxu1  ;;  %v195_v24 = vld [vmem:[#allocation5 + $0x198] sm:$0xff] }
 0x181   :  { %3322 = vmatpush2.bf16.msra.mxu1 %v6360_v33  ;;  %3280 = vmatprep.subr.bf16.mxu0 %v6225_v34  ;;  %v6561_v33 = vcombine.high %v562_v26, %v566_v28  ;;  %v426_v34 = vld [vmem:[#allocation5 + $0x8d0] sm:$0xff]  ;;  %v6552_v51 = vcombine.low %v554_v36, %v558_v38  ;;  %v199_v26 = vld [vmem:[#allocation5 + $0x1b8] sm:$0xff] }
 0x182   :  { %3323 = vmatprep.subr.bf16.mxu1 %v6353_v35  ;;  %v430_v35 = vld [vmem:[#allocation5 + $0x8f0] sm:$0xff] }
 0x183   :  { %v546_v49 = vld [vmem:[#allocation5 + $0xc90] sm:$0xff]  ;;  %v6424_v13 = vcombine.low %v426_v34, %v430_v35 }
 0x184   :  { %3281 = vmatpush2.bf16.msra.mxu0 %v6224_v43  ;;  %v6425_v43 = vcombine.high %v426_v34, %v430_v35  ;;  %v550_v50 = vld [vmem:[#allocation5 + $0xcb0] sm:$0xff]  ;;  %v6195_v34 = vcombine.high %v195_v24, %v199_v26 }
 0x185   :  { %3324 = vmatpush2.bf16.msra.mxu1 %v6352_v44  ;;  %3282 = vmatprep.subr.bf16.mxu0 %v6217_v47  ;;  %v6553_v44 = vcombine.high %v554_v36, %v558_v38  ;;  %v418_v47 = vld [vmem:[#allocation5 + $0x890] sm:$0xff]  ;;  %v6544_v59 = vcombine.low %v546_v49, %v550_v50 }
 0x186   :  { %3325 = vmatprep.subr.bf16.mxu1 %v6345_v48  ;;  %v422_v48 = vld [vmem:[#allocation5 + $0x8b0] sm:$0xff] }
 0x187   :  { %v538_v56 = vld [vmem:[#allocation5 + $0xc50] sm:$0xff]  ;;  %v6416_v25 = vcombine.low %v418_v47, %v422_v48 }
 0x188   :  { %3283 = vmatpush2.bf16.msra.mxu0 %v6216_v60  ;;  %v6417_v60 = vcombine.high %v418_v47, %v422_v48  ;;  %v542_v58 = vld [vmem:[#allocation5 + $0xc70] sm:$0xff] }
 0x189   :  { %3326 = vmatpush2.bf16.msra.mxu1 %v6344_v52  ;;  %3284 = vmatprep.subr.bf16.mxu0 %v6209_v54  ;;  %v6545_v52 = vcombine.high %v546_v49, %v550_v50  ;;  %v410_v54 = vld [vmem:[#allocation5 + $0x850] sm:$0xff]  ;;  %v6536_v7 = vcombine.low %v538_v56, %v542_v58  ;;  %v6194_v49 = vcombine.low %v195_v24, %v199_v26 }
 0x18a   :  { %3327 = vmatprep.subr.bf16.mxu1 %v6337_v55  ;;  %v414_v55 = vld [vmem:[#allocation5 + $0x870] sm:$0xff] }
 0x18b   :  { %v530_v4 = vld [vmem:[#allocation5 + $0xc10] sm:$0xff]  ;;  %v6408_v6 = vcombine.low %v410_v54, %v414_v55 }
 0x18c   :  { %3285 = vmatpush2.bf16.msra.mxu0 %v6208_v61  ;;  %v6409_v61 = vcombine.high %v410_v54, %v414_v55  ;;  %v534_v5 = vld [vmem:[#allocation5 + $0xc30] sm:$0xff]  ;;  %v179_v54 = vld [vmem:[#allocation5 + $0x118] sm:$0xff] }
 0x18d   :  { %3328 = vmatpush2.bf16.msra.mxu1 %v6336_v63  ;;  %3340 = vmatprep.subr.bf16.mxu0 %v6457_v0  ;;  %v6537_v63 = vcombine.high %v538_v56, %v542_v58  ;;  %v402_v0 = vld [vmem:[#allocation5 + $0x810] sm:$0xff]  ;;  %v6528_v18 = vcombine.low %v530_v4, %v534_v5 }
 0x18e   :  { %3383 = vmatprep.subr.bf16.mxu1 %v6585_v3  ;;  %v406_v3 = vld [vmem:[#allocation5 + $0x830] sm:$0xff] }
 0x18f   :  { %3287 = vmatmul.mubr.bf16.vlgmr.msra.gmra.mxu0 %v7749_v16  ;;  %v6400_v17 = vcombine.low %v402_v0, %v406_v3  ;;  %v506_v35 = vld [vmem:[#allocation5 + $0xb50] sm:$0xff] }
 0x190   :  { %3330 = vmatmul.mubr.bf16.vlgmr.msra.gmra.mxu1 %v7716_v42  ;;  %3341 = vmatpush1.bf16.msra.mxu0 %v6456_v8  ;;  %v6440_v42 = vcombine.low %v442_v12, %v446_v14  ;;  %v6401_v8 = vcombine.high %v402_v0, %v406_v3  ;;  %v203_v12 = vld [vmem:[#allocation5 + $0x1d8] sm:$0xff]  ;;  %v510_v36 = vld [vmem:[#allocation5 + $0xb70] sm:$0xff] }
 0x191   :  { %3384 = vmatpush1.bf16.msra.mxu1 %v6584_v9  ;;  %3342 = vmatprep.subr.bf16.mxu0 %v6449_v10  ;;  %v6529_v9 = vcombine.high %v530_v4, %v534_v5  ;;  %v522_v10 = vld [vmem:[#allocation5 + $0xbd0] sm:$0xff]  ;;  %v207_v14 = vld [vmem:[#allocation5 + $0x1f8] sm:$0xff]  ;;  %v6505_v50 = vcombine.high %v506_v35, %v510_v36  ;;  %v6504_v56 = vcombine.low %v506_v35, %v510_v36 }
 0x192   :  { %3385 = vmatprep.subr.bf16.mxu1 %v6577_v11  ;;  %3415 = vmatprep.mubr.bf16.mxu1 %v7621_v32  ;;  %v526_v11 = vld [vmem:[#allocation5 + $0xbf0] sm:$0xff]  ;;  %v175_v5 = vld [vmem:[#allocation5 + $0xf8] sm:$0xff] }
 0x193   :  { %3372 = vmatprep.mubr.bf16.mxu0 %v7754_v29  ;;  %v6520_v28 = vcombine.low %v522_v10, %v526_v11  ;;  %v490_v3 = vld [vmem:[#allocation5 + $0xad0] sm:$0xff] }
 0x194   :  { %3343 = vmatpush1.bf16.msra.mxu0 %v6448_v19  ;;  %v6521_v19 = vcombine.high %v522_v10, %v526_v11  ;;  %v494_v4 = vld [vmem:[#allocation5 + $0xaf0] sm:$0xff] }
 0x195   :  { %3386 = vmatpush1.bf16.msra.mxu1 %v6576_v20  ;;  %3344 = vmatprep.subr.bf16.mxu0 %v6441_v21  ;;  %v6203_v20 = vcombine.high %v203_v12, %v207_v14  ;;  %v514_v21 = vld [vmem:[#allocation5 + $0xb90] sm:$0xff] }
 0x196   :  { %3387 = vmatprep.subr.bf16.mxu1 %v6569_v22  ;;  %v518_v22 = vld [vmem:[#allocation5 + $0xbb0] sm:$0xff] }
 0x197   :  { %v474_v26 = vld [vmem:[#allocation5 + $0xa50] sm:$0xff] }
 0x198   :  { %3345 = vmatpush1.bf16.msra.mxu0 %v6440_v42  ;;  %v7759_v42 = vpop.f32.mrf.mxu0 }
 0x199   :  { %3388 = vmatpush1.bf16.msra.mxu1 %v6568_v30  ;;  %3346 = vmatprep.subr.bf16.mxu0 %v6433_v31  ;;  %v3073_v30 = vpop.f32.mrf.mxu1  ;;  %v6202_v31 = vcombine.low %v203_v12, %v207_v14  ;;  %v482_v12 = vld [vmem:[#allocation5 + $0xa90] sm:$0xff] }
 0x19a   :  { %3389 = vmatprep.subr.bf16.mxu1 %v6561_v33  ;;  %v6513_v33 = vcombine.high %v514_v21, %v518_v22  ;;  %v486_v14 = vld [vmem:[#allocation5 + $0xab0] sm:$0xff] }
 0x19b   :  { %v7763_v47 = vpop.f32.mrf.mxu1 }
 0x19c   :  { %3347 = vmatpush1.bf16.msra.mxu0 %v6432_v40  ;;  %v187_v40 = vld [vmem:[#allocation5 + $0x158] sm:$0xff] }
 0x19d   :  { %3390 = vmatpush1.bf16.msra.mxu1 %v6560_v41  ;;  %3348 = vmatprep.subr.bf16.mxu0 %v6425_v43  ;;  %v191_v41 = vld [vmem:[#allocation5 + $0x178] sm:$0xff]  ;;  %v3077_v58 = vpop.f32.mrf.mxu1 }
 0x19e   :  { %3391 = vmatprep.subr.bf16.mxu1 %v6553_v44  ;;  %v6512_v44 = vcombine.low %v514_v21, %v518_v22  ;;  %v6481_v22 = vcombine.high %v482_v12, %v486_v14 }
 0x1a0   :  { %3349 = vmatpush1.bf16.msra.mxu0 %v6424_v13 }
 0x1a1   :  { %3392 = vmatpush1.bf16.msra.mxu1 %v6552_v51  ;;  %3350 = vmatprep.subr.bf16.mxu0 %v6417_v60  ;;  %v6187_v51 = vcombine.high %v187_v40, %v191_v41  ;;  %v498_v60 = vld [vmem:[#allocation5 + $0xb10] sm:$0xff] }
 0x1a2   :  { %3393 = vmatprep.subr.bf16.mxu1 %v6545_v52  ;;  %v502_v52 = vld [vmem:[#allocation5 + $0xb30] sm:$0xff] }
 0x1a4   :  { %3351 = vmatpush1.bf16.msra.mxu0 %v6416_v25  ;;  %v6186_v25 = vcombine.low %v187_v40, %v191_v41  ;;  %v470_v40 = vld [vmem:[#allocation5 + $0xa30] sm:$0xff]  ;;  %v147_v41 = vld [vmem:[#allocation5 + $0x18] sm:$0xff] }
 0x1a5   :  { %3394 = vmatpush1.bf16.msra.mxu1 %v6544_v59  ;;  %3352 = vmatprep.subr.bf16.mxu0 %v6409_v61  ;;  %v6497_v59 = vcombine.high %v498_v60, %v502_v52 }
 0x1a6   :  { %3395 = vmatprep.subr.bf16.mxu1 %v6537_v63 }
 0x1a8   :  { %3353 = vmatpush1.bf16.msra.mxu0 %v6408_v6 }
 0x1a9   :  { %3396 = vmatpush1.bf16.msra.mxu1 %v6536_v7  ;;  %3354 = vmatprep.subr.bf16.mxu0 %v6401_v8  ;;  %v6489_v8 = vcombine.high %v490_v3, %v494_v4 }
 0x1aa   :  { %3397 = vmatprep.subr.bf16.mxu1 %v6529_v9 }
 0x1ac   :  { %3355 = vmatpush1.bf16.msra.mxu0 %v6400_v17  ;;  %v163_v17 = vld [vmem:[#allocation5 + $0x98] sm:$0xff] }
 0x1ad   :  { %3398 = vmatpush1.bf16.msra.mxu1 %v6528_v18  ;;  %3356 = vmatprep.subr.bf16.mxu0 %v6521_v19  ;;  %v167_v18 = vld [vmem:[#allocation5 + $0xb8] sm:$0xff] }
 0x1ae   :  { %3426 = vmatprep.subr.bf16.mxu1 %v6203_v20  ;;  %v6488_v20 = vcombine.low %v490_v3, %v494_v4  ;;  %v6163_v24 = vcombine.high %v163_v17, %v167_v18 }
 0x1af   :  { %v3030_v38 = vpop.f32.mrf.mxu0 }
 0x1b0   :  { %v3031_v43 = vadd.f32 %v3030_v38, %v7743_v1  ;;  %3416 = vmatmul.mubr.bf16.vlgmr.msra.gmra.mxu1 %v7720_v45  ;;  %3357 = vmatpush2.bf16.msra.mxu0 %v6520_v28  ;;  %v183_v45 = vld [vmem:[#allocation5 + $0x138] sm:$0xff]  ;;  %v478_v28 = vld [vmem:[#allocation5 + $0xa70] sm:$0xff] }
 0x1b1   :  { %3427 = vmatpush1.bf16.msra.mxu1 %v6202_v31  ;;  %v7765_v48 = vpop.f32.mrf.mxu0  ;;  %3358 = vmatprep.subr.bf16.mxu0 %v6513_v33  ;;  %v6179_v0 = vcombine.high %v179_v54, %v183_v45  ;;  %v6178_v7 = vcombine.low %v179_v54, %v183_v45  ;;  %v159_v31 = vld [vmem:[#allocation5 + $0x78] sm:$0xff]  ;;  %v6480_v33 = vcombine.low %v482_v12, %v486_v14  ;;  %v466_v38 = vld [vmem:[#allocation5 + $0xa10] sm:$0xff] }
 0x1b2   :  { %v3074_v13 = vadd.f32 %v3073_v30, %v3031_v43  ;;  %3428 = vmatprep.subr.bf16.mxu1 %v6195_v34  ;;  %3458 = vmatprep.mubr.bf16.mxu1 %v7726_v57  ;;  %v171_v57 = vld [vmem:[#allocation5 + $0xd8] sm:$0xff]  ;;  %v6162_v34 = vcombine.low %v163_v17, %v167_v18  ;;  %v6473_v35 = vcombine.high %v474_v26, %v478_v28 }
 0x1b3   :  { %v3034_v1 = vpop.f32.mrf.mxu0  ;;  %v6171_v11 = vcombine.high %v171_v57, %v175_v5  ;;  %v6170_v21 = vcombine.low %v171_v57, %v175_v5  ;;  %v155_v30 = vld [vmem:[#allocation5 + $0x58] sm:$0xff]  ;;  %v6464_v54 = vcombine.low %v466_v38, %v470_v40 }
 0x1b4   :  { %v3035_v55 = vadd.f32 %v3034_v1, %v7747_v15  ;;  %3359 = vmatpush2.bf16.msra.mxu0 %v6512_v44  ;;  %v3614_v61 = vmul.f32 0.2, %v3074_v13  ;;  %vm3598_vm0 = vcmp.ge.f32.partialorder %v3074_v13, 0.0  ;;  %v6496_v15 = vcombine.low %v498_v60, %v502_v52  ;;  %v151_v43 = vld [vmem:[#allocation5 + $0x38] sm:$0xff] }
 0x1b5   :  { %3429 = vmatpush1.bf16.msra.mxu1 %v6194_v49  ;;  %3360 = vmatprep.subr.bf16.mxu0 %v6505_v50  ;;  %v6155_v36 = vcombine.high %v155_v30, %v159_v31  ;;  %v6472_v44 = vcombine.low %v474_v26, %v478_v28  ;;  %v6154_v49 = vcombine.low %v155_v30, %v159_v31  ;;  %v335_v60 = vld [vmem:[#allocation5 + $0x5f8] sm:$0xff] }
 0x1b6   :  { %v3078_v63 = vadd.f32 %v3077_v58, %v3035_v55  ;;  %3430 = vmatprep.subr.bf16.mxu1 %v6187_v51  ;;  %v3630_v9 = vsel %vm3598_vm0, %v3074_v13, %v3614_v61  ;;  %v6465_v50 = vcombine.high %v466_v38, %v470_v40  ;;  %v6147_v13 = vcombine.high %v147_v41, %v151_v43  ;;  %v331_v51 = vld [vmem:[#allocation5 + $0x5d8] sm:$0xff] }
 0x1b7   :  { %v267_v52 = vld [vmem:[#allocation5 + $0x3d8] sm:$0xff]  ;;  %v6146_v45 = vcombine.low %v147_v41, %v151_v43  ;;  %v6331_v55 = vcombine.high %v331_v51, %v335_v60 }
 0x1b8   :  { %vm3606_vm1 = vcmp.ge.f32.partialorder %v3078_v63, 0.0  ;;  %v3622_v6 = vmul.f32 0.2, %v3078_v63  ;;  %3361 = vmatpush2.bf16.msra.mxu0 %v6504_v56  ;;  %v271_v1 = vld [vmem:[#allocation5 + $0x3f8] sm:$0xff] }
 0x1b9   :  { %3431 = vmatpush1.bf16.msra.mxu1 %v6186_v25  ;;  %3362 = vmatprep.subr.bf16.mxu0 %v6497_v59  ;;  %v6267_v56 = vcombine.high %v267_v52, %v271_v1  ;;  %v323_v58 = vld [vmem:[#allocation5 + $0x598] sm:$0xff] }
 0x1ba   :  { %v3638_v10 = vsel %vm3606_vm1, %v3078_v63, %v3622_v6  ;;  %3432 = vmatprep.subr.bf16.mxu1 %v6179_v0  ;;  %v327_v25 = vld [vmem:[#allocation5 + $0x5b8] sm:$0xff]  ;;  %v6330_v63 = vcombine.low %v331_v51, %v335_v60  ;;  %v6266_v0 = vcombine.low %v267_v52, %v271_v1 }
 0x1bb   :  { %v7769_v19 = vpack.c.bf16 %v3638_v10, %v3630_v9  ;;  %v259_v59 = vld [vmem:[#allocation5 + $0x398] sm:$0xff]  ;;  %v6323_v3 = vcombine.high %v323_v58, %v327_v25 }
 0x1bc   :  { %3363 = vmatpush2.bf16.msra.mxu0 %v6496_v15  ;;  %v263_v61 = vld [vmem:[#allocation5 + $0x3b8] sm:$0xff] }
 0x1bd   :  { %3433 = vmatpush1.bf16.msra.mxu1 %v6178_v7  ;;  %3364 = vmatprep.subr.bf16.mxu0 %v6489_v8  ;;  %v6259_v4 = vcombine.high %v259_v59, %v263_v61  ;;  %v315_v57 = vld [vmem:[#allocation5 + $0x558] sm:$0xff]  ;;  %v6322_v7 = vcombine.low %v323_v58, %v327_v25  ;;  %v6258_v8 = vcombine.low %v259_v59, %v263_v61  ;;  %v7773_v59 = vpop.f32.mrf.mxu1 }
 0x1be   :  { %3434 = vmatprep.subr.bf16.mxu1 %v6171_v11  ;;  %v319_v5 = vld [vmem:[#allocation5 + $0x578] sm:$0xff] }
 0x1bf   :  { %v251_v6 = vld [vmem:[#allocation5 + $0x358] sm:$0xff]  ;;  %v6315_v9 = vcombine.high %v315_v57, %v319_v5  ;;  %v6314_v18 = vcombine.low %v315_v57, %v319_v5 }
 0x1c0   :  { %3365 = vmatpush2.bf16.msra.mxu0 %v6488_v20  ;;  %v255_v15 = vld [vmem:[#allocation5 + $0x378] sm:$0xff] }
 0x1c1   :  { %3435 = vmatpush1.bf16.msra.mxu1 %v6170_v21  ;;  %3366 = vmatprep.subr.bf16.mxu0 %v6481_v22  ;;  %v6251_v10 = vcombine.high %v251_v6, %v255_v15  ;;  %v307_v11 = vld [vmem:[#allocation5 + $0x518] sm:$0xff] }
 0x1c2   :  { %3436 = vmatprep.subr.bf16.mxu1 %v6163_v24  ;;  %v311_v12 = vld [vmem:[#allocation5 + $0x538] sm:$0xff] }
 0x1c3   :  { %v243_v14 = vld [vmem:[#allocation5 + $0x318] sm:$0xff]  ;;  %v6307_v20 = vcombine.high %v307_v11, %v311_v12  ;;  %v6306_v28 = vcombine.low %v307_v11, %v311_v12 }
 0x1c4   :  { %3367 = vmatpush2.bf16.msra.mxu0 %v6480_v33  ;;  %v247_v17 = vld [vmem:[#allocation5 + $0x338] sm:$0xff] }
 0x1c5   :  { %3437 = vmatpush1.bf16.msra.mxu1 %v6162_v34  ;;  %3368 = vmatprep.subr.bf16.mxu0 %v6473_v35  ;;  %v6243_v21 = vcombine.high %v243_v14, %v247_v17  ;;  %v299_v22 = vld [vmem:[#allocation5 + $0x4d8] sm:$0xff]  ;;  %v6242_v30 = vcombine.low %v243_v14, %v247_v17 }
 0x1c6   :  { %3438 = vmatprep.subr.bf16.mxu1 %v6155_v36  ;;  %v235_v24 = vld [vmem:[#allocation5 + $0x2d8] sm:$0xff] }
 0x1c7   :  { %v239_v26 = vld [vmem:[#allocation5 + $0x2f8] sm:$0xff] }
 0x1c8   :  { %3369 = vmatpush2.bf16.msra.mxu0 %v6472_v44  ;;  %v6235_v33 = vcombine.high %v235_v24, %v239_v26  ;;  %v291_v34 = vld [vmem:[#allocation5 + $0x498] sm:$0xff]  ;;  %v6234_v41 = vcombine.low %v235_v24, %v239_v26 }
 0x1c9   :  { %3439 = vmatpush1.bf16.msra.mxu1 %v6154_v49  ;;  %3370 = vmatprep.subr.bf16.mxu0 %v6465_v50  ;;  %v295_v35 = vld [vmem:[#allocation5 + $0x4b8] sm:$0xff] }
 0x1ca   :  { %3440 = vmatprep.subr.bf16.mxu1 %v6147_v13  ;;  %v227_v36 = vld [vmem:[#allocation5 + $0x298] sm:$0xff]  ;;  %v6291_v43 = vcombine.high %v291_v34, %v295_v35  ;;  %v6290_v60 = vcombine.low %v291_v34, %v295_v35 }
 0x1cb   :  { %v231_v38 = vld [vmem:[#allocation5 + $0x2b8] sm:$0xff] }
 0x1cc   :  { %3371 = vmatpush2.bf16.msra.mxu0 %v6464_v54  ;;  %v6227_v44 = vcombine.high %v227_v36, %v231_v38  ;;  %v283_v49 = vld [vmem:[#allocation5 + $0x458] sm:$0xff]  ;;  %v6226_v52 = vcombine.low %v227_v36, %v231_v38 }
 0x1cd   :  { %3441 = vmatpush1.bf16.msra.mxu1 %v6146_v45  ;;  %3469 = vmatprep.subr.bf16.mxu0 %v6331_v55  ;;  %v287_v50 = vld [vmem:[#allocation5 + $0x478] sm:$0xff] }
 0x1ce   :  { %3442 = vmatprep.subr.bf16.mxu1 %v6267_v56  ;;  %v219_v13 = vld [vmem:[#allocation5 + $0x258] sm:$0xff]  ;;  %v6283_v1 = vcombine.high %v283_v49, %v287_v50  ;;  %v6282_v25 = vcombine.low %v283_v49, %v287_v50 }
 0x1cf   :  { %3373 = vmatmul.mubr.bf16.vlgmr.msra.gmra.mxu0 %v7723_v46  ;;  %v6250_v46 = vcombine.low %v251_v6, %v255_v15  ;;  %v223_v51 = vld [vmem:[#allocation5 + $0x278] sm:$0xff] }
 0x1d0   :  { %3470 = vmatpush1.bf16.msra.mxu0 %v6330_v63  ;;  %3501 = vmatprep.mubr.bf16.mxu0 %v7729_v53  ;;  %v303_v53 = vld [vmem:[#allocation5 + $0x4f8] sm:$0xff]  ;;  %v6219_v54 = vcombine.high %v219_v13, %v223_v51  ;;  %v6218_v61 = vcombine.low %v219_v13, %v223_v51  ;;  %v3116_v5 = vpop.f32.mrf.mxu1 }
 0x1d1   :  { %3443 = vmatpush2.bf16.msra.mxu1 %v6266_v0  ;;  %3471 = vmatprep.subr.bf16.mxu0 %v6323_v3  ;;  %v6299_v31 = vcombine.high %v299_v22, %v303_v53  ;;  %v6298_v40 = vcombine.low %v299_v22, %v303_v53  ;;  %v275_v45 = vld [vmem:[#allocation5 + $0x418] sm:$0xff]  ;;  %v604_v0 = vsub.s32 2, %v7732_v27 }
 0x1d2   :  { %3444 = vmatprep.subr.bf16.mxu1 %v6259_v4  ;;  %v279_v55 = vld [vmem:[#allocation5 + $0x438] sm:$0xff]  ;;  %v7779_v17 = vpop.f32.mrf.mxu1 }
 0x1d3   :  { %v211_v56 = vld [vmem:[#allocation5 + $0x218] sm:$0xff]  ;;  %v6275_v63 = vcombine.high %v275_v45, %v279_v55 }
 0x1d4   :  { %3472 = vmatpush1.bf16.msra.mxu0 %v6322_v7  ;;  %v215_v58 = vld [vmem:[#allocation5 + $0x238] sm:$0xff]  ;;  %v6274_v7 = vcombine.low %v275_v45, %v279_v55 }
 0x1d5   :  { %3445 = vmatpush2.bf16.msra.mxu1 %v6258_v8  ;;  %3473 = vmatprep.subr.bf16.mxu0 %v6315_v9  ;;  %v6211_v3 = vcombine.high %v211_v56, %v215_v58  ;;  %v395_v4 = vld [vmem:[#allocation5 + $0x7d8] sm:$0xff]  ;;  %v6210_v8 = vcombine.low %v211_v56, %v215_v58 }
 0x1d6   :  { %3446 = vmatprep.subr.bf16.mxu1 %v6251_v10  ;;  %v399_v57 = vld [vmem:[#allocation5 + $0x7f8] sm:$0xff]  ;;  %v605_v10 = vrot.slane %v7737_v39, %v604_v0 }
 0x1d7   :  { %v459_v6 = vld [vmem:[#allocation5 + $0x9d8] sm:$0xff]  ;;  %v6395_v9 = vcombine.high %v395_v4, %v399_v57 }
 0x1d8   :  { %3474 = vmatpush1.bf16.msra.mxu0 %v6314_v18  ;;  %v463_v15 = vld [vmem:[#allocation5 + $0x9f8] sm:$0xff]  ;;  %v3117_v24 = vadd.f32 %v3116_v5, %v605_v10 }
 0x1d9   :  { %3447 = vmatpush2.bf16.msra.mxu1 %v6250_v46  ;;  %3475 = vmatprep.subr.bf16.mxu0 %v6307_v20  ;;  %v6459_v11 = vcombine.high %v459_v6, %v463_v15  ;;  %v387_v12 = vld [vmem:[#allocation5 + $0x798] sm:$0xff]  ;;  %v6394_v20 = vcombine.low %v395_v4, %v399_v57  ;;  %v6458_v22 = vcombine.low %v459_v6, %v463_v15 }
 0x1da   :  { %3448 = vmatprep.subr.bf16.mxu1 %v6243_v21  ;;  %v391_v14 = vld [vmem:[#allocation5 + $0x7b8] sm:$0xff]  ;;  %v7781_v21 = vpop.f32.mrf.mxu0 }
 0x1db   :  { %v451_v18 = vld [vmem:[#allocation5 + $0x998] sm:$0xff]  ;;  %v6387_v53 = vcombine.high %v387_v12, %v391_v14  ;;  %v6386_v36 = vcombine.low %v387_v12, %v391_v14 }
 0x1dc   :  { %3476 = vmatpush1.bf16.msra.mxu0 %v6306_v28  ;;  %v455_v46 = vld [vmem:[#allocation5 + $0x9b8] sm:$0xff] }
 0x1dd   :  { %3449 = vmatpush2.bf16.msra.mxu1 %v6242_v30  ;;  %3477 = vmatprep.subr.bf16.mxu0 %v6299_v31  ;;  %v6451_v26 = vcombine.high %v451_v18, %v455_v46  ;;  %v379_v39 = vld [vmem:[#allocation5 + $0x758] sm:$0xff]  ;;  %v3120_v30 = vpop.f32.mrf.mxu1 }
 0x1de   :  { %3450 = vmatprep.subr.bf16.mxu1 %v6235_v33  ;;  %v383_v28 = vld [vmem:[#allocation5 + $0x778] sm:$0xff] }
 0x1df   :  { %v443_v33 = vld [vmem:[#allocation5 + $0x958] sm:$0xff] }
 0x1e0   :  { %3478 = vmatpush1.bf16.msra.mxu0 %v6298_v40  ;;  %v447_v34 = vld [vmem:[#allocation5 + $0x978] sm:$0xff]  ;;  %v6450_v40 = vcombine.low %v451_v18, %v455_v46 }
 0x1e1   :  { %3451 = vmatpush2.bf16.msra.mxu1 %v6234_v41  ;;  %3479 = vmatprep.subr.bf16.mxu0 %v6291_v43  ;;  %v6379_v41 = vcombine.high %v379_v39, %v383_v28  ;;  %v3121_v43 = vadd.f32 %v3120_v30, %v605_v10  ;;  %v371_v49 = vld [vmem:[#allocation5 + $0x718] sm:$0xff] }
 0x1e2   :  { %3452 = vmatprep.subr.bf16.mxu1 %v6227_v44  ;;  %v6443_v44 = vcombine.high %v443_v33, %v447_v34  ;;  %v375_v50 = vld [vmem:[#allocation5 + $0x738] sm:$0xff] }
 0x1e3   :  { %v435_v51 = vld [vmem:[#allocation5 + $0x918] sm:$0xff] }
 0x1e4   :  { %3480 = vmatpush1.bf16.msra.mxu0 %v6290_v60  ;;  %v439_v60 = vld [vmem:[#allocation5 + $0x938] sm:$0xff] }
 0x1e5   :  { %3453 = vmatpush2.bf16.msra.mxu1 %v6226_v52  ;;  %3481 = vmatprep.subr.bf16.mxu0 %v6283_v1  ;;  %v6442_v1 = vcombine.low %v443_v33, %v447_v34  ;;  %v6435_v45 = vcombine.high %v435_v51, %v439_v60  ;;  %v363_v55 = vld [vmem:[#allocation5 + $0x6d8] sm:$0xff] }
 0x1e6   :  { %3454 = vmatprep.subr.bf16.mxu1 %v6219_v54  ;;  %v6371_v54 = vcombine.high %v371_v49, %v375_v50  ;;  %v367_v56 = vld [vmem:[#allocation5 + $0x6f8] sm:$0xff] }
 0x1e7   :  { %v427_v58 = vld [vmem:[#allocation5 + $0x8d8] sm:$0xff]  ;;  %v6362_v15 = vcombine.low %v363_v55, %v367_v56 }
 0x1e8   :  { %3482 = vmatpush1.bf16.msra.mxu0 %v6282_v25  ;;  %v431_v25 = vld [vmem:[#allocation5 + $0x8f8] sm:$0xff] }
 0x1e9   :  { %3455 = vmatpush2.bf16.msra.mxu1 %v6218_v61  ;;  %3483 = vmatprep.subr.bf16.mxu0 %v6275_v63  ;;  %v6370_v61 = vcombine.low %v371_v49, %v375_v50  ;;  %v6363_v63 = vcombine.high %v363_v55, %v367_v56  ;;  %v355_v4 = vld [vmem:[#allocation5 + $0x698] sm:$0xff]  ;;  %v7793_v56 = vpop.f32.mrf.mxu1 }
 0x1ea   :  { %3456 = vmatprep.subr.bf16.mxu1 %v6211_v3  ;;  %v6427_v3 = vcombine.high %v427_v58, %v431_v25  ;;  %v359_v57 = vld [vmem:[#allocation5 + $0x6b8] sm:$0xff] }
 0x1eb   :  { %v419_v5 = vld [vmem:[#allocation5 + $0x898] sm:$0xff]  ;;  %v6354_v18 = vcombine.low %v355_v4, %v359_v57 }
 0x1ec   :  { %3484 = vmatpush1.bf16.msra.mxu0 %v6274_v7  ;;  %v423_v6 = vld [vmem:[#allocation5 + $0x8b8] sm:$0xff]  ;;  %v6426_v7 = vcombine.low %v427_v58, %v431_v25 }
 0x1ed   :  { %3457 = vmatpush2.bf16.msra.mxu1 %v6210_v8  ;;  %3485 = vmatprep.subr.bf16.mxu0 %v6395_v9  ;;  %v6355_v8 = vcombine.high %v355_v4, %v359_v57  ;;  %v6419_v9 = vcombine.high %v419_v5, %v423_v6  ;;  %v347_v10 = vld [vmem:[#allocation5 + $0x658] sm:$0xff]  ;;  %v6418_v46 = vcombine.low %v419_v5, %v423_v6 }
 0x1ee   :  { %3512 = vmatprep.subr.bf16.mxu1 %v6459_v11  ;;  %v351_v11 = vld [vmem:[#allocation5 + $0x678] sm:$0xff] }
 0x1ef   :  { %v3159_v31 = vpop.f32.mrf.mxu0  ;;  %v411_v12 = vld [vmem:[#allocation5 + $0x858] sm:$0xff] }
 0x1f0   :  { %v7783_v35 = vadd.f32 %v3159_v31, %v3117_v24  ;;  %3459 = vmatmul.mubr.bf16.vlgmr.msra.gmra.mxu1 %v7749_v16  ;;  %3486 = vmatpush2.bf16.msra.mxu0 %v6394_v20  ;;  %v6378_v16 = vcombine.low %v379_v39, %v383_v28  ;;  %v415_v14 = vld [vmem:[#allocation5 + $0x878] sm:$0xff]  ;;  %v6347_v20 = vcombine.high %v347_v10, %v351_v11 }
 0x1f1   :  { %3513 = vmatpush1.bf16.msra.mxu1 %v6458_v22  ;;  %v7786_v38 = vpop.f32.mrf.mxu0  ;;  %3487 = vmatprep.subr.bf16.mxu0 %v6387_v53  ;;  %v6411_v22 = vcombine.high %v411_v12, %v415_v14  ;;  %v339_v53 = vld [vmem:[#allocation5 + $0x618] sm:$0xff]  ;;  %v6346_v28 = vcombine.low %v347_v10, %v351_v11  ;;  %v6410_v30 = vcombine.low %v411_v12, %v415_v14 }
 0x1f2   :  { %3514 = vmatprep.subr.bf16.mxu1 %v6451_v26  ;;  %3544 = vmatprep.mubr.bf16.mxu1 %v7754_v29  ;;  %v6434_v29 = vcombine.low %v435_v51, %v439_v60  ;;  %v343_v24 = vld [vmem:[#allocation5 + $0x638] sm:$0xff] }
 0x1f3   :  { %v3163_v13 = vpop.f32.mrf.mxu0  ;;  %v403_v26 = vld [vmem:[#allocation5 + $0x818] sm:$0xff]  ;;  %v6339_v31 = vcombine.high %v339_v53, %v343_v24 }
 0x1f4   :  { %v7789_v52 = vadd.f32 %v3163_v13, %v3121_v43  ;;  %3488 = vmatpush2.bf16.msra.mxu0 %v6386_v36  ;;  %v407_v39 = vld [vmem:[#allocation5 + $0x838] sm:$0xff]  ;;  %v6338_v43 = vcombine.low %v339_v53, %v343_v24 }
 0x1f5   :  { %3515 = vmatpush1.bf16.msra.mxu1 %v6450_v40  ;;  %3489 = vmatprep.subr.bf16.mxu0 %v6379_v41  ;;  %v6403_v33 = vcombine.high %v403_v26, %v407_v39  ;;  %v587_v34 = vld [vmem:[#allocation5 + $0xdd8] sm:$0xff] }
 0x1f6   :  { %3516 = vmatprep.subr.bf16.mxu1 %v6443_v44  ;;  %v591_v36 = vld [vmem:[#allocation5 + $0xdf8] sm:$0xff]  ;;  %v6402_v44 = vcombine.low %v403_v26, %v407_v39 }
 0x1f7   :  { %v523_v40 = vld [vmem:[#allocation5 + $0xbd8] sm:$0xff]  ;;  %v6587_v49 = vcombine.high %v587_v34, %v591_v36 }
 0x1f8   :  { %3490 = vmatpush2.bf16.msra.mxu0 %v6378_v16  ;;  %v527_v41 = vld [vmem:[#allocation5 + $0xbf8] sm:$0xff] }
 0x1f9   :  { %3517 = vmatpush1.bf16.msra.mxu1 %v6442_v1  ;;  %3491 = vmatprep.subr.bf16.mxu0 %v6371_v54  ;;  %v6523_v50 = vcombine.high %v523_v40, %v527_v41  ;;  %v579_v13 = vld [vmem:[#allocation5 + $0xd98] sm:$0xff]  ;;  %v6586_v1 = vcombine.low %v587_v34, %v591_v36  ;;  %v7791_v54 = vpop.f32.mrf.mxu0 }
 0x1fa   :  { %3518 = vmatprep.subr.bf16.mxu1 %v6435_v45  ;;  %v583_v51 = vld [vmem:[#allocation5 + $0xdb8] sm:$0xff]  ;;  %v6522_v45 = vcombine.low %v523_v40, %v527_v41  ;;  %v7806_v41 = vld [vmem:[#allocation7] sm:$0xff] }
 0x1fb   :  { %v515_v60 = vld [vmem:[#allocation5 + $0xb98] sm:$0xff]  ;;  %v6579_v55 = vcombine.high %v579_v13, %v583_v51  ;;  %v6578_v5 = vcombine.low %v579_v13, %v583_v51 }
 0x1fc   :  { %3492 = vmatpush2.bf16.msra.mxu0 %v6370_v61  ;;  %v519_v16 = vld [vmem:[#allocation5 + $0xbb8] sm:$0xff] }
 0x1fd   :  { %3519 = vmatpush1.bf16.msra.mxu1 %v6434_v29  ;;  %3493 = vmatprep.subr.bf16.mxu0 %v6363_v63  ;;  %v6515_v58 = vcombine.high %v515_v60, %v519_v16  ;;  %v571_v25 = vld [vmem:[#allocation5 + $0xd58] sm:$0xff]  ;;  %v7431_v63 = vld [vmem:[#allocation3 + $0x8] ss:$28 sps:$4 sm:$0xff]  }
 0x1fe   :  { %3520 = vmatprep.subr.bf16.mxu1 %v6427_v3  ;;  %v575_v61 = vld [vmem:[#allocation5 + $0xd78] sm:$0xff] }
 0x1ff   :  { %v507_v3 = vld [vmem:[#allocation5 + $0xb58] sm:$0xff] }
 0x200   :  { %3494 = vmatpush2.bf16.msra.mxu0 %v6362_v15  ;;  %v511_v4 = vld [vmem:[#allocation5 + $0xb78] sm:$0xff]  ;;  %v6514_v15 = vcombine.low %v515_v60, %v519_v16 }
 0x201   :  { %3521 = vmatpush1.bf16.msra.mxu1 %v6426_v7  ;;  %3495 = vmatprep.subr.bf16.mxu0 %v6355_v8  ;;  %v6571_v7 = vcombine.high %v571_v25, %v575_v61  ;;  %v6507_v10 = vcombine.high %v507_v3, %v511_v4  ;;  %v563_v11 = vld [vmem:[#allocation5 + $0xd18] sm:$0xff]  ;;  %v6506_v53 = vcombine.low %v507_v3, %v511_v4 }
 0x202   :  { %3522 = vmatprep.subr.bf16.mxu1 %v6419_v9  ;;  %v567_v12 = vld [vmem:[#allocation5 + $0xd38] sm:$0xff] }
 0x203   :  { %v6563_v24 = vcombine.high %v563_v11, %v567_v12  ;;  %v491_v36 = vld [vmem:[#allocation5 + $0xad8] sm:$0xff] }
 0x204   :  { %3496 = vmatpush2.bf16.msra.mxu0 %v6354_v18  ;;  %v499_v18 = vld [vmem:[#allocation5 + $0xb18] sm:$0xff] }
 0x205   :  { %3523 = vmatpush1.bf16.msra.mxu1 %v6418_v46  ;;  %3497 = vmatprep.subr.bf16.mxu0 %v6347_v20  ;;  %v503_v46 = vld [vmem:[#allocation5 + $0xb38] sm:$0xff]  ;;  %v7802_v20 = vsub.s32 1, %v7732_v27 }
 0x206   :  { %3524 = vmatprep.subr.bf16.mxu1 %v6411_v22  ;;  %v6499_v39 = vcombine.high %v499_v18, %v503_v46  ;;  %v495_v40 = vld [vmem:[#allocation5 + $0xaf8] sm:$0xff] }
 0x207   :  { %v6491_v51 = vcombine.high %v491_v36, %v495_v40  ;;  %v547_v60 = vld [vmem:[#allocation5 + $0xc98] sm:$0xff]  ;;  %v6490_v3 = vcombine.low %v491_v36, %v495_v40 }
 0x208   :  { %3498 = vmatpush2.bf16.msra.mxu0 %v6346_v28  ;;  %v555_v28 = vld [vmem:[#allocation5 + $0xcd8] sm:$0xff] }
 0x209   :  { %3525 = vmatpush1.bf16.msra.mxu1 %v6410_v30  ;;  %3499 = vmatprep.subr.bf16.mxu0 %v6339_v31  ;;  %v559_v30 = vld [vmem:[#allocation5 + $0xcf8] sm:$0xff]  ;;  %v608_v31 = vsub.s32 3, %v7732_v27 }
 0x20a   :  { %3526 = vmatprep.subr.bf16.mxu1 %v6403_v33  ;;  %v551_v16 = vld [vmem:[#allocation5 + $0xcb8] sm:$0xff] }
 0x20b   :  { %v6547_v4 = vcombine.high %v547_v60, %v551_v16 }
 0x20c   :  { %3500 = vmatpush2.bf16.msra.mxu0 %v6338_v43  ;;  %v6562_v43 = vcombine.low %v563_v11, %v567_v12  ;;  %v475_v11 = vld [vmem:[#allocation5 + $0xa58] sm:$0xff] }
 0x20d   :  { %3527 = vmatpush1.bf16.msra.mxu1 %v6402_v44  ;;  %3555 = vmatprep.subr.bf16.mxu0 %v6587_v49  ;;  %v6498_v49 = vcombine.low %v499_v18, %v503_v46  ;;  %v479_v12 = vld [vmem:[#allocation5 + $0xa78] sm:$0xff]  ;;  %v6546_v46 = vcombine.low %v547_v60, %v551_v16 }
 0x20e   :  { %3528 = vmatprep.subr.bf16.mxu1 %v6523_v50  ;;  %v6555_v50 = vcombine.high %v555_v28, %v559_v30  ;;  %v6944_v16 = vld [vmem:[#allocation8 + $0xc4] ss:$16 sps:$4 sm:$0xff]  }
 0x20f   :  { %v3245_v29 = vpop.f32.mrf.mxu0  ;;  %3502 = vmatmul.mubr.bf16.vlgmr.msra.gmra.mxu0 %v7431_v63  ;;  %v6554_v63 = vcombine.low %v555_v28, %v559_v30  ;;  %v6474_v30 = vcombine.low %v475_v11, %v479_v12 }
 0x210   :  { %v3202_v57 = vpop.f32.mrf.mxu1  ;;  %3556 = vmatpush1.bf16.msra.mxu0 %v6586_v1  ;;  %3587 = vmatprep.mubr.bf16.mxu0 %v7621_v32  ;;  %v609_v1 = vrot.slane %v7806_v41, %v608_v31 }
 0x211   :  { %v3203_v6 = vadd.f32 %v3202_v57, %v7783_v35  ;;  %3529 = vmatpush2.bf16.msra.mxu1 %v6522_v45  ;;  %3557 = vmatprep.subr.bf16.mxu0 %v6579_v55  ;;  %v7799_v9 = vpop.f32.mrf.mxu0  ;;  %v6570_v35 = vcombine.low %v571_v25, %v575_v61  ;;  %v487_v25 = vld [vmem:[#allocation5 + $0xab8] sm:$0xff] }
 0x212   :  { %v7797_v8 = vpop.f32.mrf.mxu1  ;;  %3530 = vmatprep.subr.bf16.mxu1 %v6515_v58  ;;  %v483_v58 = vld [vmem:[#allocation5 + $0xa98] sm:$0xff] }
 0x213   :  { %v3246_v14 = vadd.f32 %v3245_v29, %v3203_v6  ;;  %v3249_v26 = vpop.f32.mrf.mxu0  ;;  %v6483_v6 = vcombine.high %v483_v58, %v487_v25  ;;  %v6482_v18 = vcombine.low %v483_v58, %v487_v25  ;;  %v6947_v58 = vld [vmem:[#allocation8 + $0x2c4] ss:$16 sps:$4 sm:$0xff]   ;;  %v7434_v25 = vld [vmem:[#allocation3 + $0x10] ss:$28 sps:$4 sm:$0xff]  }
 0x214   :  { %v3206_v32 = vpop.f32.mrf.mxu1  ;;  %3558 = vmatpush1.bf16.msra.mxu0 %v6578_v5 }
 0x215   :  { %v3207_v22 = vadd.f32 %v3206_v32, %v7789_v52  ;;  %3531 = vmatpush2.bf16.msra.mxu1 %v6514_v15  ;;  %3559 = vmatprep.subr.bf16.mxu0 %v6571_v7  ;;  %v3616_v33 = vmul.f32 0.2, %v3246_v14  ;;  %v601_v52 = vrot.slane %v7806_v41, %v7802_v20  ;;  %vm3600_vm2 = vcmp.ge.f32.partialorder %v3246_v14, 0.0  ;;  %v539_v15 = vld [vmem:[#allocation5 + $0xc58] sm:$0xff] }
 0x216   :  { %3532 = vmatprep.subr.bf16.mxu1 %v6507_v10  ;;  %v3208_v5 = vpop.f32.mrf.mxu1  ;;  %v543_v7 = vld [vmem:[#allocation5 + $0xc78] sm:$0xff]  ;;  %v3119_v10 = vadd.f32 %v7779_v17, %v609_v1  ;;  %v6475_v17 = vcombine.high %v475_v11, %v479_v12 }
 0x217   :  { %v3250_v34 = vadd.f32 %v3249_v26, %v3207_v22  ;;  %v2951_v13 = vadd.f32 %v7759_v42, %v601_v52  ;;  %v3632_v45 = vsel %vm3600_vm2, %v3246_v14, %v3616_v33  ;;  %v2947_v61 = vadd.f32 %v7741_v62, %v601_v52  ;;  %v471_v26 = vld [vmem:[#allocation5 + $0xa38] sm:$0xff] }
 0x218   :  { %3560 = vmatpush1.bf16.msra.mxu0 %v6570_v35  ;;  %v3123_v42 = vadd.f32 %v7793_v56, %v609_v1  ;;  %v6539_v35 = vcombine.high %v539_v15, %v543_v7  ;;  %v6538_v28 = vcombine.low %v539_v15, %v543_v7  ;;  %v7433_v1 = vld [vmem:[#allocation3 + $0x18] ss:$28 sps:$4 sm:$0xff]   ;;  %v6954_v7 = vld [vmem:[#allocation8 + $0x80] ss:$16 sps:$4 sm:$0xff]  }
 0x219   :  { %vm3608_vm3 = vcmp.ge.f32.partialorder %v3250_v34, 0.0  ;;  %v3624_v44 = vmul.f32 0.2, %v3250_v34  ;;  %3533 = vmatpush2.bf16.msra.mxu1 %v6506_v53  ;;  %3561 = vmatprep.subr.bf16.mxu0 %v6563_v24  ;;  %v2994_v57 = vadd.f32 %v7757_v23, %v2951_v13  ;;  %v2990_v14 = vadd.f32 %v7745_v2, %v2947_v61  ;;  %v535_v53 = vld [vmem:[#allocation5 + $0xc38] sm:$0xff] }
 0x21a   :  { %3534 = vmatprep.subr.bf16.mxu1 %v6499_v39  ;;  %v3166_v62 = vadd.f32 %v7791_v54, %v3123_v42  ;;  %v3162_v23 = vadd.f32 %v7786_v38, %v3119_v10  ;;  %v531_v54 = vld [vmem:[#allocation5 + $0xc18] sm:$0xff]  ;;  %v3251_v39 = vpop.f32.mrf.mxu0 }
 0x21b   :  { %v3640_v55 = vsel %vm3608_vm3, %v3250_v34, %v3624_v44  ;;  %v3037_v56 = vadd.f32 %v7781_v21, %v2994_v57  ;;  %v3033_v22 = vadd.f32 %v7765_v48, %v2990_v14  ;;  %v467_v2 = vld [vmem:[#allocation5 + $0xa18] sm:$0xff]  ;;  %v6531_v33 = vcombine.high %v531_v54, %v535_v53 }
 0x21c   :  { %v7815_v29 = vpack.c.bf16 %v3640_v55, %v3632_v45  ;;  %3562 = vmatpush1.bf16.msra.mxu0 %v6562_v43  ;;  %v3209_v32 = vadd.f32 %v3208_v5, %v3166_v62  ;;  %v3205_v24 = vadd.f32 %v7797_v8, %v3162_v23  ;;  %v6467_v34 = vcombine.high %v467_v2, %v471_v26  ;;  %v6938_v43 = vld [vmem:[#allocation8 + $0xe4] ss:$16 sps:$4 sm:$0xff]   ;;  %v6945_v42 = vld [vmem:[#allocation8 + $0x2c0] ss:$16 sps:$4 sm:$0xff]  }
 0x21d   :  { %3535 = vmatpush2.bf16.msra.mxu1 %v6498_v49  ;;  %3563 = vmatprep.subr.bf16.mxu0 %v6555_v50  ;;  %v3080_v21 = vadd.f32 %v7773_v59, %v3037_v56  ;;  %v3076_v48 = vadd.f32 %v7763_v47, %v3033_v22  ;;  %v6530_v8 = vcombine.low %v531_v54, %v535_v53  ;;  %v6941_v49 = vld [vmem:[#allocation8 + $0x2e4] ss:$16 sps:$4 sm:$0xff]   ;;  %v6936_v47 = vld [vmem:[#allocation8 + $0xe0] ss:$16 sps:$4 sm:$0xff]  }
 0x21e   :  { %3536 = vmatprep.subr.bf16.mxu1 %v6491_v51  ;;  %v3252_v38 = vadd.f32 %v3251_v39, %v3209_v32  ;;  %v3248_v36 = vadd.f32 %v7799_v9, %v3205_v24  ;;  %v6466_v59 = vcombine.low %v467_v2, %v471_v26  ;;  %v6939_v9 = vld [vmem:[#allocation8 + $0x2e0] ss:$16 sps:$4 sm:$0xff]   ;;  %v6959_v15 = vld [vmem:[#allocation8 + $0x284] ss:$16 sps:$4 sm:$0xff]  }
 0x21f   :  { %v3623_v40 = vmul.f32 0.2, %v3080_v21  ;;  %vm3607_vm4 = vcmp.ge.f32.partialorder %v3080_v21, 0.0  ;;  %v3615_v44 = vmul.f32 0.2, %v3076_v48  ;;  %vm3599_vm6 = vcmp.ge.f32.partialorder %v3076_v48, 0.0 }
 0x220   :  { %3564 = vmatpush1.bf16.msra.mxu0 %v6554_v63  ;;  %v3625_v52 = vmul.f32 0.2, %v3252_v38  ;;  %vm3609_vm5 = vcmp.ge.f32.partialorder %v3252_v38, 0.0  ;;  %v3617_v50 = vmul.f32 0.2, %v3248_v36  ;;  %vm3601_vm7 = vcmp.ge.f32.partialorder %v3248_v36, 0.0 }
 0x221   :  { %3537 = vmatpush2.bf16.msra.mxu1 %v6490_v3  ;;  %3565 = vmatprep.subr.bf16.mxu0 %v6547_v4  ;;  %v3639_v13 = vsel %vm3607_vm4, %v3080_v21, %v3623_v40  ;;  %v3631_v60 = vsel %vm3599_vm6, %v3076_v48, %v3615_v44  ;;  %v6942_v63 = vld [vmem:[#allocation8 + $0xc0] ss:$16 sps:$4 sm:$0xff]   ;;  %v6950_v3 = vld [vmem:[#allocation8 + $0xa4] ss:$16 sps:$4 sm:$0xff]  }
 0x222   :  { %3538 = vmatprep.subr.bf16.mxu1 %v6483_v6  ;;  %v3641_v51 = vsel %vm3609_vm5, %v3252_v38, %v3625_v52  ;;  %v7829_v45 = vpack.c.bf16 %v3639_v13, %v3631_v60  ;;  %v3633_v55 = vsel %vm3601_vm7, %v3248_v36, %v3617_v50  ;;  %v6953_v4 = vld [vmem:[#allocation8 + $0x2a4] ss:$16 sps:$4 sm:$0xff]   ;;  %v6948_v57 = vld [vmem:[#allocation8 + $0xa0] ss:$16 sps:$4 sm:$0xff]  }
 0x223   :  { %v7831_v61 = vpack.c.bf16 %v3641_v51, %v3633_v55  ;;  %v6951_v5 = vld [vmem:[#allocation8 + $0x2a0] ss:$16 sps:$4 sm:$0xff]   ;;  %v6956_v6 = vld [vmem:[#allocation8 + $0x84] ss:$16 sps:$4 sm:$0xff]  }
 0x224   :  { %3566 = vmatpush1.bf16.msra.mxu0 %v6546_v46  ;;  %v6957_v10 = vld [vmem:[#allocation8 + $0x280] ss:$16 sps:$4 sm:$0xff]   ;;  %v6962_v62 = vld [vmem:[#allocation8 + $0x64] ss:$16 sps:$4 sm:$0xff]  }
 0x225   :  { %3539 = vmatpush2.bf16.msra.mxu1 %v6482_v18  ;;  %3567 = vmatprep.subr.bf16.mxu0 %v6539_v35  ;;  %v6965_v11 = vld [vmem:[#allocation8 + $0x264] ss:$16 sps:$4 sm:$0xff]   ;;  %v6960_v12 = vld [vmem:[#allocation8 + $0x60] ss:$16 sps:$4 sm:$0xff]  }
 0x226   :  { %3540 = vmatprep.subr.bf16.mxu1 %v6475_v17  ;;  %v6963_v14 = vld [vmem:[#allocation8 + $0x260] ss:$16 sps:$4 sm:$0xff]   ;;  %v6968_v56 = vld [vmem:[#allocation8 + $0x44] ss:$16 sps:$4 sm:$0xff]  }
 0x227   :  { %v6971_v18 = vld [vmem:[#allocation8 + $0x244] ss:$16 sps:$4 sm:$0xff]   ;;  %v6966_v46 = vld [vmem:[#allocation8 + $0x40] ss:$16 sps:$4 sm:$0xff]  }
 0x228   :  { %3568 = vmatpush1.bf16.msra.mxu0 %v6538_v28  ;;  %v6969_v23 = vld [vmem:[#allocation8 + $0x240] ss:$16 sps:$4 sm:$0xff]   ;;  %v6974_v32 = vld [vmem:[#allocation8 + $0x24] ss:$16 sps:$4 sm:$0xff]  }
 0x229   :  { %3541 = vmatpush2.bf16.msra.mxu1 %v6474_v30  ;;  %3569 = vmatprep.subr.bf16.mxu0 %v6531_v33  ;;  %v6977_v35 = vld [vmem:[#allocation8 + $0x224] ss:$16 sps:$4 sm:$0xff]   ;;  %v6972_v22 = vld [vmem:[#allocation8 + $0x20] ss:$16 sps:$4 sm:$0xff]  }
 0x22a   :  { %3542 = vmatprep.subr.bf16.mxu1 %v6467_v34  ;;  %v6975_v17 = vld [vmem:[#allocation8 + $0x220] ss:$16 sps:$4 sm:$0xff]   ;;  %v6980_v54 = vld [vmem:[#allocation8 + $0x4] ss:$16 sps:$4 sm:$0xff]  }
 0x22b   :  { %v6983_v53 = vld [vmem:[#allocation8 + $0x204] ss:$16 sps:$4 sm:$0xff]   ;;  %v6978_v24 = vld [vmem:[#allocation8] ss:$16 sps:$4 sm:$0xff]  }
 0x22c   :  { %3570 = vmatpush1.bf16.msra.mxu0 %v6530_v8  ;;  %v6981_v2 = vld [vmem:[#allocation8 + $0x200] ss:$16 sps:$4 sm:$0xff]   ;;  %v6986_v26 = vld [vmem:[#allocation8 + $0x1e4] ss:$16 sps:$4 sm:$0xff]  }
 0x22d   :  { %3543 = vmatpush2.bf16.msra.mxu1 %v6466_v59  ;;  %5212 = vmatprep.subr.bf16.mxu0 %v6938_v43  ;;  %v6989_v21 = vld [vmem:[#allocation8 + $0x3e4] ss:$16 sps:$4 sm:$0xff]   ;;  %v6984_v39 = vld [vmem:[#allocation8 + $0x1e0] ss:$16 sps:$4 sm:$0xff]  }
 0x22e   :  { %5255 = vmatprep.subr.bf16.mxu1 %v6941_v49  ;;  %v6987_v28 = vld [vmem:[#allocation8 + $0x3e0] ss:$16 sps:$4 sm:$0xff]   ;;  %v6992_v38 = vld [vmem:[#allocation8 + $0x1c4] ss:$16 sps:$4 sm:$0xff]  }
 0x22f   :  { %3588 = vmatmul.mubr.bf16.vlgmr.msra.gmra.mxu0 %v7433_v1  ;;  %v6995_v30 = vld [vmem:[#allocation8 + $0x3c4] ss:$16 sps:$4 sm:$0xff]   ;;  %v6990_v33 = vld [vmem:[#allocation8 + $0x1c0] ss:$16 sps:$4 sm:$0xff]  }
 0x230   :  { %3545 = vmatmul.mubr.bf16.vlgmr.msra.gmra.mxu1 %v7434_v25  ;;  %5213 = vmatpush1.bf16.msra.mxu0 %v6936_v47  ;;  %v6993_v48 = vld [vmem:[#allocation8 + $0x3c0] ss:$16 sps:$4 sm:$0xff]   ;;  %v6998_v34 = vld [vmem:[#allocation8 + $0x1a4] ss:$16 sps:$4 sm:$0xff]  }
 0x231   :  { %5244 = vmatprep.mubr.bf16.mxu0 %v7829_v45  ;;  %5256 = vmatpush1.bf16.msra.mxu1 %v6939_v9  ;;  %v7001_v36 = vld [vmem:[#allocation8 + $0x3a4] ss:$16 sps:$4 sm:$0xff]   ;;  %v6996_v40 = vld [vmem:[#allocation8 + $0x1a0] ss:$16 sps:$4 sm:$0xff]  }
 0x232   :  { %5287 = vmatprep.mubr.bf16.mxu1 %v7831_v61  ;;  %5214 = vmatprep.subr.bf16.mxu0 %v6944_v16  ;;  %v6999_v8 = vld [vmem:[#allocation8 + $0x3a0] ss:$16 sps:$4 sm:$0xff]   ;;  %v7004_v52 = vld [vmem:[#allocation8 + $0x184] ss:$16 sps:$4 sm:$0xff]  }
 0x233   :  { %5257 = vmatprep.subr.bf16.mxu1 %v6947_v58  ;;  %v7007_v59 = vld [vmem:[#allocation8 + $0x384] ss:$16 sps:$4 sm:$0xff]   ;;  %v7002_v43 = vld [vmem:[#allocation8 + $0x180] ss:$16 sps:$4 sm:$0xff]  }
 0x234   :  { %5215 = vmatpush1.bf16.msra.mxu0 %v6942_v63  ;;  %v7005_v44 = vld [vmem:[#allocation8 + $0x380] ss:$16 sps:$4 sm:$0xff]   ;;  %v7010_v49 = vld [vmem:[#allocation8 + $0x164] ss:$16 sps:$4 sm:$0xff]  }
 0x235   :  { %5258 = vmatpush1.bf16.msra.mxu1 %v6945_v42  ;;  %5216 = vmatprep.subr.bf16.mxu0 %v6950_v3  ;;  %v7013_v50 = vld [vmem:[#allocation8 + $0x364] ss:$16 sps:$4 sm:$0xff]   ;;  %v7008_v47 = vld [vmem:[#allocation8 + $0x160] ss:$16 sps:$4 sm:$0xff]  }
 0x236   :  { %5259 = vmatprep.subr.bf16.mxu1 %v6953_v4  ;;  %v7011_v13 = vld [vmem:[#allocation8 + $0x360] ss:$16 sps:$4 sm:$0xff]   ;;  %v7016_v9 = vld [vmem:[#allocation8 + $0x144] ss:$16 sps:$4 sm:$0xff]  }
 0x237   :  { %v7019_v51 = vld [vmem:[#allocation8 + $0x344] ss:$16 sps:$4 sm:$0xff]   ;;  %v7014_v60 = vld [vmem:[#allocation8 + $0x140] ss:$16 sps:$4 sm:$0xff]  }
 0x238   :  { %5217 = vmatpush1.bf16.msra.mxu0 %v6948_v57  ;;  %v7017_v16 = vld [vmem:[#allocation8 + $0x340] ss:$16 sps:$4 sm:$0xff]   ;;  %v7022_v1 = vld [vmem:[#allocation8 + $0x124] ss:$16 sps:$4 sm:$0xff]  }
 0x239   :  { %5260 = vmatpush1.bf16.msra.mxu1 %v6951_v5  ;;  %5218 = vmatprep.subr.bf16.mxu0 %v6956_v6  ;;  %v7025_v55 = vld [vmem:[#allocation8 + $0x324] ss:$16 sps:$4 sm:$0xff]   ;;  %v7020_v58 = vld [vmem:[#allocation8 + $0x120] ss:$16 sps:$4 sm:$0xff]  }
 0x23a   :  { %5261 = vmatprep.subr.bf16.mxu1 %v6959_v15  ;;  %v7023_v25 = vld [vmem:[#allocation8 + $0x320] ss:$16 sps:$4 sm:$0xff]   ;;  %v7028_v63 = vld [vmem:[#allocation8 + $0x104] ss:$16 sps:$4 sm:$0xff]  }
 0x23b   :  { %v7031_v42 = vld [vmem:[#allocation8 + $0x304] ss:$16 sps:$4 sm:$0xff]   ;;  %v7026_v3 = vld [vmem:[#allocation8 + $0x100] ss:$16 sps:$4 sm:$0xff]  }
 0x23c   :  { %5219 = vmatpush1.bf16.msra.mxu0 %v6954_v7  ;;  %v7029_v4 = vld [vmem:[#allocation8 + $0x300] ss:$16 sps:$4 sm:$0xff]   ;;  %v7034_v57 = vld [vmem:[#allocation8 + $0x4e4] ss:$16 sps:$4 sm:$0xff]  }
 0x23d   :  { %5262 = vmatpush1.bf16.msra.mxu1 %v6957_v10  ;;  %5220 = vmatprep.subr.bf16.mxu0 %v6962_v62  ;;  %v7094_v5 = vld [vmem:[#allocation8 + $0x6e4] ss:$16 sps:$4 sm:$0xff]   ;;  %v7032_v6 = vld [vmem:[#allocation8 + $0x4e0] ss:$16 sps:$4 sm:$0xff]  }
 0x23e   :  { %5263 = vmatprep.subr.bf16.mxu1 %v6965_v11  ;;  %v7037_v15 = vld [vmem:[#allocation8 + $0x4c4] ss:$16 sps:$4 sm:$0xff]   ;;  %v7092_v7 = vld [vmem:[#allocation8 + $0x6e0] ss:$16 sps:$4 sm:$0xff]  }
 0x23f   :  { %v7100_v10 = vld [vmem:[#allocation8 + $0x6c4] ss:$16 sps:$4 sm:$0xff]   ;;  %v7035_v62 = vld [vmem:[#allocation8 + $0x4c0] ss:$16 sps:$4 sm:$0xff]  }
 0x240   :  { %5221 = vmatpush1.bf16.msra.mxu0 %v6960_v12  ;;  %v7040_v11 = vld [vmem:[#allocation8 + $0x4a4] ss:$16 sps:$4 sm:$0xff]   ;;  %v7098_v12 = vld [vmem:[#allocation8 + $0x6c0] ss:$16 sps:$4 sm:$0xff]  }
 0x241   :  { %5264 = vmatpush1.bf16.msra.mxu1 %v6963_v14  ;;  %5222 = vmatprep.subr.bf16.mxu0 %v6968_v56  ;;  %v7106_v14 = vld [vmem:[#allocation8 + $0x6a4] ss:$16 sps:$4 sm:$0xff]   ;;  %v7038_v56 = vld [vmem:[#allocation8 + $0x4a0] ss:$16 sps:$4 sm:$0xff]  }
 0x242   :  { %5265 = vmatprep.subr.bf16.mxu1 %v6971_v18  ;;  %v7043_v18 = vld [vmem:[#allocation8 + $0x484] ss:$16 sps:$4 sm:$0xff]  }
 0x244   :  { %5223 = vmatpush1.bf16.msra.mxu0 %v6966_v46  ;;  %v7104_v46 = vld [vmem:[#allocation8 + $0x6a0] ss:$16 sps:$4 sm:$0xff]  }
 0x245   :  { %5266 = vmatpush1.bf16.msra.mxu1 %v6969_v23  ;;  %5224 = vmatprep.subr.bf16.mxu0 %v6974_v32  ;;  %v7112_v23 = vld [vmem:[#allocation8 + $0x684] ss:$16 sps:$4 sm:$0xff]   ;;  %v7041_v32 = vld [vmem:[#allocation8 + $0x480] ss:$16 sps:$4 sm:$0xff]  }
 0x246   :  { %5267 = vmatprep.subr.bf16.mxu1 %v6977_v35  ;;  %v7046_v35 = vld [vmem:[#allocation8 + $0x464] ss:$16 sps:$4 sm:$0xff]  }
 0x248   :  { %5225 = vmatpush1.bf16.msra.mxu0 %v6972_v22  ;;  %v7110_v22 = vld [vmem:[#allocation8 + $0x680] ss:$16 sps:$4 sm:$0xff]  }
 0x249   :  { %5268 = vmatpush1.bf16.msra.mxu1 %v6975_v17  ;;  %5226 = vmatprep.subr.bf16.mxu0 %v6980_v54  ;;  %v7118_v17 = vld [vmem:[#allocation8 + $0x664] ss:$16 sps:$4 sm:$0xff]   ;;  %v7044_v54 = vld [vmem:[#allocation8 + $0x460] ss:$16 sps:$4 sm:$0xff]  }
 0x24a   :  { %5269 = vmatprep.subr.bf16.mxu1 %v6983_v53  ;;  %v7049_v53 = vld [vmem:[#allocation8 + $0x444] ss:$16 sps:$4 sm:$0xff]  }
 0x24c   :  { %5227 = vmatpush1.bf16.msra.mxu0 %v6978_v24  ;;  %v7116_v24 = vld [vmem:[#allocation8 + $0x660] ss:$16 sps:$4 sm:$0xff]  }
 0x24d   :  { %5270 = vmatpush1.bf16.msra.mxu1 %v6981_v2  ;;  %5228 = vmatprep.subr.bf16.mxu0 %v6986_v26  ;;  %v7124_v26 = vld [vmem:[#allocation8 + $0x644] ss:$16 sps:$4 sm:$0xff]  }
 0x24e   :  { %5271 = vmatprep.subr.bf16.mxu1 %v6989_v21  ;;  %v7047_v21 = vld [vmem:[#allocation8 + $0x440] ss:$16 sps:$4 sm:$0xff]  }
 0x250   :  { %5229 = vmatpush2.bf16.msra.mxu0 %v6984_v39  ;;  %v7837_v2 = vpop.f32.mrf.mxu1  ;;  %v7839_v39 = vpop.f32.mrf.mxu0 }
 0x251   :  { %5272 = vmatpush2.bf16.msra.mxu1 %v6987_v28  ;;  %5230 = vmatprep.subr.bf16.mxu0 %v6992_v38  ;;  %v7052_v28 = vld [vmem:[#allocation8 + $0x424] ss:$16 sps:$4 sm:$0xff]   ;;  %v7122_v38 = vld [vmem:[#allocation8 + $0x640] ss:$16 sps:$4 sm:$0xff]  }
 0x252   :  { %5273 = vmatprep.subr.bf16.mxu1 %v6995_v30  ;;  %v3333_v30 = vpop.f32.mrf.mxu1 }
 0x254   :  { %5231 = vmatpush2.bf16.msra.mxu0 %v6990_v33  ;;  %v7130_v33 = vld [vmem:[#allocation8 + $0x624] ss:$16 sps:$4 sm:$0xff]  }
 0x255   :  { %5274 = vmatpush2.bf16.msra.mxu1 %v6993_v48  ;;  %5232 = vmatprep.subr.bf16.mxu0 %v6998_v34  ;;  %v616_v48 = vsub.s32 5, %v7732_v27  ;;  %v7050_v34 = vld [vmem:[#allocation8 + $0x420] ss:$16 sps:$4 sm:$0xff]  }
 0x256   :  { %5275 = vmatprep.subr.bf16.mxu1 %v7001_v36  ;;  %v3290_v36 = vpop.f32.mrf.mxu0 }
 0x258   :  { %5233 = vmatpush2.bf16.msra.mxu0 %v6996_v40  ;;  %v7055_v40 = vld [vmem:[#allocation8 + $0x404] ss:$16 sps:$4 sm:$0xff]  }
 0x259   :  { %5276 = vmatpush2.bf16.msra.mxu1 %v6999_v8  ;;  %5234 = vmatprep.subr.bf16.mxu0 %v7004_v52  ;;  %v7128_v8 = vld [vmem:[#allocation8 + $0x620] ss:$16 sps:$4 sm:$0xff]   ;;  %v7842_v52 = vpop.f32.mrf.mxu1 }
 0x25a   :  { %5277 = vmatprep.subr.bf16.mxu1 %v7007_v59  ;;  %v7136_v59 = vld [vmem:[#allocation8 + $0x604] ss:$16 sps:$4 sm:$0xff]  }
 0x25c   :  { %5235 = vmatpush2.bf16.msra.mxu0 %v7002_v43  ;;  %v617_v43 = vrot.slane %v7806_v41, %v616_v48 }
 0x25d   :  { %5278 = vmatpush2.bf16.msra.mxu1 %v7005_v44  ;;  %5236 = vmatprep.subr.bf16.mxu0 %v7010_v49  ;;  %v7053_v44 = vld [vmem:[#allocation8 + $0x400] ss:$16 sps:$4 sm:$0xff]   ;;  %v3292_v49 = vpop.f32.mrf.mxu0 }
 0x25e   :  { %5279 = vmatprep.subr.bf16.mxu1 %v7013_v50  ;;  %v7058_v50 = vld [vmem:[#allocation8 + $0x5e4] ss:$16 sps:$4 sm:$0xff]  }
 0x260   :  { %5237 = vmatpush2.bf16.msra.mxu0 %v7008_v47  ;;  %v7134_v47 = vld [vmem:[#allocation8 + $0x600] ss:$16 sps:$4 sm:$0xff]  }
 0x261   :  { %5280 = vmatpush2.bf16.msra.mxu1 %v7011_v13  ;;  %5238 = vmatprep.subr.bf16.mxu0 %v7016_v9  ;;  %v3337_v13 = vpop.f32.mrf.mxu1  ;;  %v7142_v9 = vld [vmem:[#allocation8 + $0x7e4] ss:$16 sps:$4 sm:$0xff]  }
 0x262   :  { %5281 = vmatprep.subr.bf16.mxu1 %v7019_v51  ;;  %v3291_v51 = vadd.f32 %v3290_v36, %v617_v43  ;;  %v7068_v36 = vld [vmem:[#allocation8 + $0x560] ss:$16 sps:$4 sm:$0xff]  }
 0x264   :  { %5239 = vmatpush2.bf16.msra.mxu0 %v7014_v60 }
 0x265   :  { %5282 = vmatpush2.bf16.msra.mxu1 %v7017_v16  ;;  %5240 = vmatprep.subr.bf16.mxu0 %v7022_v1  ;;  %v7056_v16 = vld [vmem:[#allocation8 + $0x5e0] ss:$16 sps:$4 sm:$0xff]   ;;  %v3294_v1 = vpop.f32.mrf.mxu0 }
 0x266   :  { %5283 = vmatprep.subr.bf16.mxu1 %v7025_v55  ;;  %v7061_v55 = vld [vmem:[#allocation8 + $0x5c4] ss:$16 sps:$4 sm:$0xff]  }
 0x268   :  { %5241 = vmatpush2.bf16.msra.mxu0 %v7020_v58  ;;  %v7140_v58 = vld [vmem:[#allocation8 + $0x7e0] ss:$16 sps:$4 sm:$0xff]  }
 0x269   :  { %5284 = vmatpush2.bf16.msra.mxu1 %v7023_v25  ;;  %5242 = vmatprep.subr.bf16.mxu0 %v7028_v63  ;;  %v7148_v25 = vld [vmem:[#allocation8 + $0x7c4] ss:$16 sps:$4 sm:$0xff]  }
 0x26a   :  { %5285 = vmatprep.subr.bf16.mxu1 %v7031_v42  ;;  %v3334_v42 = vadd.f32 %v3333_v30, %v3291_v51 }
 0x26c   :  { %5243 = vmatpush2.bf16.msra.mxu0 %v7026_v3 }
 0x26d   :  { %5286 = vmatpush2.bf16.msra.mxu1 %v7029_v4  ;;  %5298 = vmatprep.subr.bf16.mxu0 %v7034_v57  ;;  %v7059_v4 = vld [vmem:[#allocation8 + $0x5c0] ss:$16 sps:$4 sm:$0xff]   ;;  %v3295_v57 = vadd.f32 %v3294_v1, %v617_v43 }
 0x26e   :  { %5341 = vmatprep.subr.bf16.mxu1 %v7094_v5  ;;  %v7164_v43 = vld [vmem:[#allocation8 + $0x760] ss:$16 sps:$4 sm:$0xff]  }
 0x26f   :  { %5245 = vmatmul.mubr.bf16.vlgmr.msra.gmra.mxu0 %v7769_v19 }
 0x270   :  { %5288 = vmatmul.mubr.bf16.vlgmr.msra.gmra.mxu1 %v7815_v29  ;;  %5299 = vmatpush1.bf16.msra.mxu0 %v7032_v6  ;;  %v7845_v60 = vpop.f32.mrf.mxu1  ;;  %v7064_v6 = vld [vmem:[#allocation8 + $0x5a4] ss:$16 sps:$4 sm:$0xff]  }
 0x271   :  { %5300 = vmatprep.subr.bf16.mxu0 %v7037_v15  ;;  %5342 = vmatpush1.bf16.msra.mxu1 %v7092_v7  ;;  %v7146_v15 = vld [vmem:[#allocation8 + $0x7c0] ss:$16 sps:$4 sm:$0xff]   ;;  %v612_v7 = vsub.s32 4, %v7732_v27 }
 0x272   :  { %5343 = vmatprep.subr.bf16.mxu1 %v7100_v10  ;;  %v3419_v3 = vpop.f32.mrf.mxu1 }
 0x274   :  { %5301 = vmatpush1.bf16.msra.mxu0 %v7035_v62  ;;  %v7154_v62 = vld [vmem:[#allocation8 + $0x7a4] ss:$16 sps:$4 sm:$0xff]  }
 0x275   :  { %5302 = vmatprep.subr.bf16.mxu0 %v7040_v11  ;;  %5344 = vmatpush1.bf16.msra.mxu1 %v7098_v12  ;;  %v3421_v12 = vpop.f32.mrf.mxu1 }
 0x276   :  { %5345 = vmatprep.subr.bf16.mxu1 %v7106_v14  ;;  %v7062_v14 = vld [vmem:[#allocation8 + $0x5a0] ss:$16 sps:$4 sm:$0xff]  }
 0x278   :  { %5303 = vmatpush1.bf16.msra.mxu0 %v7038_v56  ;;  %v3338_v56 = vadd.f32 %v3337_v13, %v3295_v57  ;;  %v7076_v13 = vld [vmem:[#allocation8 + $0x524] ss:$16 sps:$4 sm:$0xff]   ;;  %v7182_v57 = vld [vmem:[#allocation8 + $0x700] ss:$16 sps:$4 sm:$0xff]  }
 0x279   :  { %5304 = vmatprep.subr.bf16.mxu0 %v7043_v18  ;;  %5346 = vmatpush1.bf16.msra.mxu1 %v7104_v46 }
 0x27a   :  { %5347 = vmatprep.subr.bf16.mxu1 %v7112_v23  ;;  %v7067_v23 = vld [vmem:[#allocation8 + $0x584] ss:$16 sps:$4 sm:$0xff]  }
 0x27c   :  { %5305 = vmatpush1.bf16.msra.mxu0 %v7041_v32  ;;  %v7152_v32 = vld [vmem:[#allocation8 + $0x7a0] ss:$16 sps:$4 sm:$0xff]  }
 0x27d   :  { %5306 = vmatprep.subr.bf16.mxu0 %v7046_v35  ;;  %5348 = vmatpush1.bf16.msra.mxu1 %v7110_v22  ;;  %v613_v35 = vrot.slane %v7806_v41, %v612_v7  ;;  %v7160_v22 = vld [vmem:[#allocation8 + $0x784] ss:$16 sps:$4 sm:$0xff]  }
 0x27e   :  { %5349 = vmatprep.subr.bf16.mxu1 %v7118_v17 }
 0x27f   :  { %v3289_v30 = vadd.f32 %v7839_v39, %v613_v35  ;;  %v7172_v39 = vld [vmem:[#allocation8 + $0x744] ss:$16 sps:$4 sm:$0xff]  }
 0x280   :  { %5307 = vmatpush1.bf16.msra.mxu0 %v7044_v54  ;;  %v3293_v54 = vadd.f32 %v3292_v49, %v613_v35  ;;  %v7109_v35 = vld [vmem:[#allocation8 + $0x2c] ss:$16 sps:$4 sm:$0xff]  }
 0x281   :  { %5308 = vmatprep.subr.bf16.mxu0 %v7049_v53  ;;  %5350 = vmatpush1.bf16.msra.mxu1 %v7116_v24  ;;  %v3423_v53 = vpop.f32.mrf.mxu1  ;;  %v7065_v24 = vld [vmem:[#allocation8 + $0x580] ss:$16 sps:$4 sm:$0xff]  }
 0x282   :  { %5351 = vmatprep.subr.bf16.mxu1 %v7124_v26 }
 0x284   :  { %5309 = vmatpush1.bf16.msra.mxu0 %v7047_v21 }
 0x285   :  { %5310 = vmatprep.subr.bf16.mxu0 %v7052_v28  ;;  %5352 = vmatpush1.bf16.msra.mxu1 %v7122_v38  ;;  %v7070_v28 = vld [vmem:[#allocation8 + $0x564] ss:$16 sps:$4 sm:$0xff]   ;;  %v7158_v38 = vld [vmem:[#allocation8 + $0x780] ss:$16 sps:$4 sm:$0xff]  }
 0x286   :  { %5353 = vmatprep.subr.bf16.mxu1 %v7130_v33  ;;  %v7166_v33 = vld [vmem:[#allocation8 + $0x764] ss:$16 sps:$4 sm:$0xff]  }
 0x288   :  { %5311 = vmatpush1.bf16.msra.mxu0 %v7050_v34  ;;  %v3336_v34 = vadd.f32 %v7842_v52, %v3293_v54  ;;  %v7071_v52 = vld [vmem:[#allocation8 + $0x540] ss:$16 sps:$4 sm:$0xff]   ;;  %v7121_v54 = vld [vmem:[#allocation8 + $0x1ec] ss:$16 sps:$4 sm:$0xff]  }
 0x289   :  { %5312 = vmatprep.subr.bf16.mxu0 %v7055_v40  ;;  %5354 = vmatpush1.bf16.msra.mxu1 %v7128_v8 }
 0x28a   :  { %5355 = vmatprep.subr.bf16.mxu1 %v7136_v59  ;;  %v7073_v59 = vld [vmem:[#allocation8 + $0x544] ss:$16 sps:$4 sm:$0xff]  }
 0x28c   :  { %5313 = vmatpush1.bf16.msra.mxu0 %v7053_v44  ;;  %v3332_v44 = vadd.f32 %v7837_v2, %v3289_v30  ;;  %v7074_v2 = vld [vmem:[#allocation8 + $0x520] ss:$16 sps:$4 sm:$0xff]   ;;  %v7137_v30 = vld [vmem:[#allocation8 + $0x188] ss:$16 sps:$4 sm:$0xff]  }
 0x28d   :  { %5314 = vmatprep.subr.bf16.mxu0 %v7058_v50  ;;  %5356 = vmatpush1.bf16.msra.mxu1 %v7134_v47 }
 0x28e   :  { %5357 = vmatprep.subr.bf16.mxu1 %v7142_v9  ;;  %v7170_v9 = vld [vmem:[#allocation8 + $0x740] ss:$16 sps:$4 sm:$0xff]  }
 0x28f   :  { %v3374_v63 = vpop.f32.mrf.mxu0 }
 0x290   :  { %5315 = vmatpush2.bf16.msra.mxu0 %v7056_v16  ;;  %v3375_v47 = vadd.f32 %v3374_v63, %v3332_v44  ;;  %v7178_v16 = vld [vmem:[#allocation8 + $0x724] ss:$16 sps:$4 sm:$0xff]  }
 0x291   :  { %v3376_v5 = vpop.f32.mrf.mxu0  ;;  %5316 = vmatprep.subr.bf16.mxu0 %v7061_v55  ;;  %5358 = vmatpush2.bf16.msra.mxu1 %v7140_v58  ;;  %v7079_v55 = vld [vmem:[#allocation8 + $0x504] ss:$16 sps:$4 sm:$0xff]   ;;  %v7176_v58 = vld [vmem:[#allocation8 + $0x720] ss:$16 sps:$4 sm:$0xff]  }
 0x292   :  { %v3377_v10 = vadd.f32 %v3376_v5, %v3334_v42  ;;  %5359 = vmatprep.subr.bf16.mxu1 %v7148_v25  ;;  %v3418_v1 = vadd.f32 %v7845_v60, %v3375_v47  ;;  %v7184_v63 = vld [vmem:[#allocation8 + $0x704] ss:$16 sps:$4 sm:$0xff]   ;;  %v7190_v60 = vld [vmem:[#allocation8 + $0x2ec] ss:$16 sps:$4 sm:$0xff]   ;;  %v620_v47 = vsub.s32 6, %v7732_v27 }
 0x293   :  { %v3378_v11 = vpop.f32.mrf.mxu0 }
 0x294   :  { %5317 = vmatpush2.bf16.msra.mxu0 %v7059_v4  ;;  %v3420_v18 = vadd.f32 %v3419_v3, %v3377_v10  ;;  %v3379_v49 = vadd.f32 %v3378_v11, %v3336_v34  ;;  %v3618_v42 = vmul.f32 0.2, %v3418_v1  ;;  %v7077_v3 = vld [vmem:[#allocation8 + $0x500] ss:$16 sps:$4 sm:$0xff]   ;;  %vm3602_vm11 = vcmp.ge.f32.partialorder %v3418_v1, 0.0 }
 0x295   :  { %v3380_v46 = vpop.f32.mrf.mxu0  ;;  %5318 = vmatprep.subr.bf16.mxu0 %v7064_v6  ;;  %5360 = vmatpush2.bf16.msra.mxu1 %v7146_v15  ;;  %v7082_v4 = vld [vmem:[#allocation8 + $0xec] ss:$16 sps:$4 sm:$0xff]   ;;  %v7080_v15 = vld [vmem:[#allocation8 + $0xe8] ss:$16 sps:$4 sm:$0xff]  }
 0x296   :  { %5361 = vmatprep.subr.bf16.mxu1 %v7154_v62  ;;  %v3381_v17 = vadd.f32 %v3380_v46, %v3338_v56  ;;  %v3619_v26 = vmul.f32 0.2, %v3420_v18  ;;  %vm3603_vm8 = vcmp.ge.f32.partialorder %v3420_v18, 0.0  ;;  %v3422_v51 = vadd.f32 %v3421_v12, %v3379_v49  ;;  %v7085_v10 = vld [vmem:[#allocation8 + $0xcc] ss:$16 sps:$4 sm:$0xff]  }
 0x297   :  { %v3634_v6 = vsel %vm3602_vm11, %v3418_v1, %v3618_v42  ;;  %v7083_v62 = vld [vmem:[#allocation8 + $0xc8] ss:$16 sps:$4 sm:$0xff]   ;;  %v7088_v11 = vld [vmem:[#allocation8 + $0xac] ss:$16 sps:$4 sm:$0xff]   ;;  %v621_v1 = vrot.slane %v7806_v41, %v620_v47 }
 0x298   :  { %5319 = vmatpush2.bf16.msra.mxu0 %v7062_v14  ;;  %v3424_v21 = vadd.f32 %v3423_v53, %v3381_v17  ;;  %v3635_v40 = vsel %vm3603_vm8, %v3420_v18, %v3619_v26  ;;  %v3626_v25 = vmul.f32 0.2, %v3422_v51  ;;  %vm3610_vm10 = vcmp.ge.f32.partialorder %v3422_v51, 0.0  ;;  %v7086_v12 = vld [vmem:[#allocation8 + $0xa8] ss:$16 sps:$4 sm:$0xff]  }
 0x299   :  { %5320 = vmatprep.subr.bf16.mxu0 %v7067_v23  ;;  %5362 = vmatpush2.bf16.msra.mxu1 %v7152_v32  ;;  %v7091_v14 = vld [vmem:[#allocation8 + $0x8c] ss:$16 sps:$4 sm:$0xff]   ;;  %v7089_v56 = vld [vmem:[#allocation8 + $0x88] ss:$16 sps:$4 sm:$0xff]  }
 0x29a   :  { %5363 = vmatprep.subr.bf16.mxu1 %v7160_v22  ;;  %vm3611_vm9 = vcmp.ge.f32.partialorder %v3424_v21, 0.0  ;;  %v3627_v48 = vmul.f32 0.2, %v3424_v21  ;;  %v3642_v5 = vsel %vm3610_vm10, %v3422_v51, %v3626_v25  ;;  %v7097_v18 = vld [vmem:[#allocation8 + $0x6c] ss:$16 sps:$4 sm:$0xff]  }
 0x29b   :  { %v7856_v7 = vpack.c.bf16 %v3642_v5, %v3634_v6  ;;  %v7095_v46 = vld [vmem:[#allocation8 + $0x68] ss:$16 sps:$4 sm:$0xff]   ;;  %v7103_v23 = vld [vmem:[#allocation8 + $0x4c] ss:$16 sps:$4 sm:$0xff]  }
 0x29c   :  { %5321 = vmatpush2.bf16.msra.mxu0 %v7065_v24  ;;  %v3643_v8 = vsel %vm3611_vm9, %v3424_v21, %v3627_v48  ;;  %v7101_v32 = vld [vmem:[#allocation8 + $0x48] ss:$16 sps:$4 sm:$0xff]   ;;  %v7115_v22 = vld [vmem:[#allocation8 + $0xc] ss:$16 sps:$4 sm:$0xff]  }
 0x29d   :  { %5322 = vmatprep.subr.bf16.mxu0 %v7070_v28  ;;  %5364 = vmatpush2.bf16.msra.mxu1 %v7158_v38  ;;  %v7852_v50 = vpack.c.bf16 %v3643_v8, %v3635_v40  ;;  %v7113_v17 = vld [vmem:[#allocation8 + $0x8] ss:$16 sps:$4 sm:$0xff]   ;;  %v7127_v24 = vld [vmem:[#allocation8 + $0x1cc] ss:$16 sps:$4 sm:$0xff]  }
 0x29e   :  { %5365 = vmatprep.subr.bf16.mxu1 %v7166_v33  ;;  %v7119_v53 = vld [vmem:[#allocation8 + $0x1e8] ss:$16 sps:$4 sm:$0xff]   ;;  %v7133_v21 = vld [vmem:[#allocation8 + $0x1ac] ss:$16 sps:$4 sm:$0xff]  }
 0x29f   :  { %5330 = vmatprep.mubr.bf16.mxu0 %v7852_v50  ;;  %v7125_v26 = vld [vmem:[#allocation8 + $0x1c8] ss:$16 sps:$4 sm:$0xff]   ;;  %v7139_v38 = vld [vmem:[#allocation8 + $0x18c] ss:$16 sps:$4 sm:$0xff]  }
 0x2a0   :  { %5323 = vmatpush2.bf16.msra.mxu0 %v7068_v36  ;;  %v7131_v28 = vld [vmem:[#allocation8 + $0x1a8] ss:$16 sps:$4 sm:$0xff]   ;;  %v7145_v33 = vld [vmem:[#allocation8 + $0x16c] ss:$16 sps:$4 sm:$0xff]  }
 0x2a1   :  { %5324 = vmatprep.subr.bf16.mxu0 %v7073_v59  ;;  %5366 = vmatpush2.bf16.msra.mxu1 %v7164_v43  ;;  %v7143_v48 = vld [vmem:[#allocation8 + $0x168] ss:$16 sps:$4 sm:$0xff]   ;;  %v7151_v34 = vld [vmem:[#allocation8 + $0x14c] ss:$16 sps:$4 sm:$0xff]  }
 0x2a2   :  { %5367 = vmatprep.subr.bf16.mxu1 %v7172_v39  ;;  %v7149_v36 = vld [vmem:[#allocation8 + $0x148] ss:$16 sps:$4 sm:$0xff]   ;;  %v7157_v8 = vld [vmem:[#allocation8 + $0x12c] ss:$16 sps:$4 sm:$0xff]  }
 0x2a3   :  { %v7155_v43 = vld [vmem:[#allocation8 + $0x128] ss:$16 sps:$4 sm:$0xff]   ;;  %v7163_v49 = vld [vmem:[#allocation8 + $0x10c] ss:$16 sps:$4 sm:$0xff]  }
 0x2a4   :  { %5325 = vmatpush2.bf16.msra.mxu0 %v7071_v52  ;;  %v624_v52 = vsub.s32 7, %v7732_v27  ;;  %v7169_v51 = vld [vmem:[#allocation8 + $0x4ec] ss:$16 sps:$4 sm:$0xff]   ;;  %v7173_v5 = vld [vmem:[#allocation8 + $0x4c8] ss:$16 sps:$4 sm:$0xff]  }
 0x2a5   :  { %5326 = vmatprep.subr.bf16.mxu0 %v7076_v13  ;;  %5368 = vmatpush2.bf16.msra.mxu1 %v7170_v9  ;;  %v7161_v13 = vld [vmem:[#allocation8 + $0x108] ss:$16 sps:$4 sm:$0xff]   ;;  %v7175_v25 = vld [vmem:[#allocation8 + $0x4cc] ss:$16 sps:$4 sm:$0xff]  }
 0x2a6   :  { %5369 = vmatprep.subr.bf16.mxu1 %v7178_v16  ;;  %v7197_v47 = vld [vmem:[#allocation8 + $0x448] ss:$16 sps:$4 sm:$0xff]  }
 0x2a8   :  { %5327 = vmatpush2.bf16.msra.mxu0 %v7074_v2  ;;  %v625_v2 = vrot.slane %v7806_v41, %v624_v52  ;;  %v7205_v52 = vld [vmem:[#allocation8 + $0x42c] ss:$16 sps:$4 sm:$0xff]  }
 0x2a9   :  { %5328 = vmatprep.subr.bf16.mxu0 %v7079_v55  ;;  %5370 = vmatpush2.bf16.msra.mxu1 %v7176_v58  ;;  %v7167_v55 = vld [vmem:[#allocation8 + $0x4e8] ss:$16 sps:$4 sm:$0xff]  }
 0x2aa   :  { %5371 = vmatprep.subr.bf16.mxu1 %v7184_v63 }
 0x2ac   :  { %5329 = vmatpush2.bf16.msra.mxu0 %v7077_v3 }
 0x2ad   :  { %5384 = vmatprep.subr.bf16.mxu0 %v7082_v4  ;;  %5372 = vmatpush2.bf16.msra.mxu1 %v7182_v57 }
 0x2ae   :  { %5427 = vmatprep.subr.bf16.mxu1 %v7190_v60 }
 0x2af   :  { %5331 = vmatmul.mubr.bf16.vlgmr.msra.gmra.mxu0 %v7856_v7 }
 0x2b0   :  { %5385 = vmatpush1.bf16.msra.mxu0 %v7080_v15  ;;  %5416 = vmatprep.mubr.bf16.mxu0 %v7829_v45  ;;  %v7107_v45 = vld [vmem:[#allocation8 + $0x28] ss:$16 sps:$4 sm:$0xff]   ;;  %v3460_v59 = vpop.f32.mrf.mxu1 }
 0x2b1   :  { %5386 = vmatprep.subr.bf16.mxu0 %v7085_v10  ;;  %v3461_v42 = vadd.f32 %v3460_v59, %v621_v1  ;;  %v7181_v10 = vld [vmem:[#allocation8 + $0x4ac] ss:$16 sps:$4 sm:$0xff]  }
 0x2b2   :  { %v3462_v39 = vpop.f32.mrf.mxu1 }
 0x2b3   :  { %v3463_v3 = vadd.f32 %v3462_v39, %v625_v2  ;;  %v7196_v39 = vld [vmem:[#allocation8 + $0x2cc] ss:$16 sps:$4 sm:$0xff]  }
 0x2b4   :  { %5387 = vmatpush1.bf16.msra.mxu0 %v7083_v62  ;;  %v3464_v16 = vpop.f32.mrf.mxu1 }
 0x2b5   :  { %5388 = vmatprep.subr.bf16.mxu0 %v7088_v11  ;;  %v3465_v60 = vadd.f32 %v3464_v16, %v621_v1  ;;  %v7211_v16 = vld [vmem:[#allocation8 + $0x40c] ss:$16 sps:$4 sm:$0xff]   ;;  %v7200_v1 = vld [vmem:[#allocation8 + $0x2a8] ss:$16 sps:$4 sm:$0xff]  }
 0x2b6   :  { %v3466_v63 = vpop.f32.mrf.mxu1 }
 0x2b8   :  { %5389 = vmatpush1.bf16.msra.mxu0 %v7086_v12 }
 0x2b9   :  { %5390 = vmatprep.subr.bf16.mxu0 %v7091_v14 }
 0x2bc   :  { %5391 = vmatpush1.bf16.msra.mxu0 %v7089_v56  ;;  %v3467_v56 = vadd.f32 %v3466_v63, %v625_v2  ;;  %v7208_v2 = vld [vmem:[#allocation8 + $0x28c] ss:$16 sps:$4 sm:$0xff]   ;;  %v7215_v63 = vld [vmem:[#allocation8 + $0x5e8] ss:$16 sps:$4 sm:$0xff]  }
 0x2bd   :  { %5392 = vmatprep.subr.bf16.mxu0 %v7097_v18 }
 0x2c0   :  { %5393 = vmatpush1.bf16.msra.mxu0 %v7095_v46  ;;  %v7179_v46 = vld [vmem:[#allocation8 + $0x4a8] ss:$16 sps:$4 sm:$0xff]  }
 0x2c1   :  { %5394 = vmatprep.subr.bf16.mxu0 %v7103_v23 }
 0x2c4   :  { %5395 = vmatpush1.bf16.msra.mxu0 %v7101_v32  ;;  %v7187_v32 = vld [vmem:[#allocation8 + $0x48c] ss:$16 sps:$4 sm:$0xff]  }
 0x2c5   :  { %5396 = vmatprep.subr.bf16.mxu0 %v7109_v35 }
 0x2c8   :  { %5397 = vmatpush1.bf16.msra.mxu0 %v7107_v45 }
 0x2c9   :  { %5398 = vmatprep.subr.bf16.mxu0 %v7115_v22 }
 0x2cc   :  { %5399 = vmatpush1.bf16.msra.mxu0 %v7113_v17 }
 0x2cd   :  { %5400 = vmatprep.subr.bf16.mxu0 %v7121_v54 }
 0x2cf   :  { %v3503_v40 = vpop.f32.mrf.mxu0 }
 0x2d0   :  { %5401 = vmatpush2.bf16.msra.mxu0 %v7119_v53  ;;  %v3504_v6 = vadd.f32 %v3503_v40, %v3461_v42  ;;  %v7185_v53 = vld [vmem:[#allocation8 + $0x488] ss:$16 sps:$4 sm:$0xff]   ;;  %v7223_v42 = vld [vmem:[#allocation8 + $0x5cc] ss:$16 sps:$4 sm:$0xff]  }
 0x2d1   :  { %5402 = vmatprep.subr.bf16.mxu0 %v7127_v24  ;;  %v3505_v44 = vpop.f32.mrf.mxu0 }
 0x2d2   :  { %v3506_v15 = vadd.f32 %v3505_v44, %v3463_v3  ;;  %v7188_v44 = vld [vmem:[#allocation8 + $0x2e8] ss:$16 sps:$4 sm:$0xff]  }
 0x2d3   :  { %v3507_v9 = vpop.f32.mrf.mxu0  ;;  %v7212_v3 = vld [vmem:[#allocation8 + $0x268] ss:$16 sps:$4 sm:$0xff]  }
 0x2d4   :  { %5403 = vmatpush2.bf16.msra.mxu0 %v7125_v26  ;;  %v3508_v11 = vadd.f32 %v3507_v9, %v3465_v60  ;;  %v7202_v9 = vld [vmem:[#allocation8 + $0x2ac] ss:$16 sps:$4 sm:$0xff]   ;;  %v7218_v60 = vld [vmem:[#allocation8 + $0x248] ss:$16 sps:$4 sm:$0xff]  }
 0x2d5   :  { %5404 = vmatprep.subr.bf16.mxu0 %v7133_v21  ;;  %v3509_v58 = vpop.f32.mrf.mxu0  ;;  %v7193_v21 = vld [vmem:[#allocation8 + $0x46c] ss:$16 sps:$4 sm:$0xff]  }
 0x2d8   :  { %5405 = vmatpush2.bf16.msra.mxu0 %v7131_v28 }
 0x2d9   :  { %5406 = vmatprep.subr.bf16.mxu0 %v7139_v38 }
 0x2dc   :  { %5407 = vmatpush2.bf16.msra.mxu0 %v7137_v30 }
 0x2dd   :  { %5408 = vmatprep.subr.bf16.mxu0 %v7145_v33 }
 0x2e0   :  { %5409 = vmatpush2.bf16.msra.mxu0 %v7143_v48  ;;  %v7191_v48 = vld [vmem:[#allocation8 + $0x468] ss:$16 sps:$4 sm:$0xff]  }
 0x2e1   :  { %5410 = vmatprep.subr.bf16.mxu0 %v7151_v34 }
 0x2e4   :  { %5411 = vmatpush2.bf16.msra.mxu0 %v7149_v36  ;;  %v7199_v36 = vld [vmem:[#allocation8 + $0x44c] ss:$16 sps:$4 sm:$0xff]  }
 0x2e5   :  { %5412 = vmatprep.subr.bf16.mxu0 %v7157_v8 }
 0x2e8   :  { %5413 = vmatpush2.bf16.msra.mxu0 %v7155_v43 }
 0x2e9   :  { %5414 = vmatprep.subr.bf16.mxu0 %v7163_v49 }
 0x2ec   :  { %5415 = vmatpush2.bf16.msra.mxu0 %v7161_v13  ;;  %v7194_v13 = vld [vmem:[#allocation8 + $0x2c8] ss:$16 sps:$4 sm:$0xff]  }
 0x2ed   :  { %5470 = vmatprep.subr.bf16.mxu0 %v7169_v51  ;;  %v7203_v51 = vld [vmem:[#allocation8 + $0x428] ss:$16 sps:$4 sm:$0xff]  }
 0x2ef   :  { %v3589_v4 = vpop.f32.mrf.mxu0  ;;  %5417 = vmatmul.mubr.bf16.vlgmr.msra.gmra.mxu0 %v7769_v19 }
 0x2f0   :  { %v3546_v57 = vpop.f32.mrf.mxu1  ;;  %5471 = vmatpush1.bf16.msra.mxu0 %v7167_v55  ;;  %5502 = vmatprep.mubr.bf16.mxu0 %v7852_v50  ;;  %v3510_v50 = vadd.f32 %v3509_v58, %v3467_v56  ;;  %v7209_v55 = vld [vmem:[#allocation8 + $0x408] ss:$16 sps:$4 sm:$0xff]   ;;  %v7217_v58 = vld [vmem:[#allocation8 + $0x5ec] ss:$16 sps:$4 sm:$0xff]  }
 0x2f1   :  { %v3591_v41 = vpop.f32.mrf.mxu0  ;;  %5472 = vmatprep.subr.bf16.mxu0 %v7175_v25  ;;  %v3547_v12 = vadd.f32 %v3546_v57, %v3504_v6  ;;  %v7206_v25 = vld [vmem:[#allocation8 + $0x288] ss:$16 sps:$4 sm:$0xff]   ;;  %v7226_v6 = vld [vmem:[#allocation8 + $0x22c] ss:$16 sps:$4 sm:$0xff]  }
 0x2f2   :  { %v3548_v62 = vpop.f32.mrf.mxu1  ;;  %v7221_v57 = vld [vmem:[#allocation8 + $0x5c8] ss:$16 sps:$4 sm:$0xff]   ;;  %v7238_v56 = vld [vmem:[#allocation8 + $0x3ec] ss:$16 sps:$4 sm:$0xff]  }
 0x2f3   :  { %v3549_v14 = vadd.f32 %v3548_v62, %v3506_v15  ;;  %v3593_v23 = vpop.f32.mrf.mxu0  ;;  %v3590_v22 = vadd.f32 %v3589_v4, %v3547_v12  ;;  %v7220_v4 = vld [vmem:[#allocation8 + $0x24c] ss:$16 sps:$4 sm:$0xff]   ;;  %v7227_v15 = vld [vmem:[#allocation8 + $0x5a8] ss:$16 sps:$4 sm:$0xff]  }
 0x2f4   :  { %v3550_v18 = vpop.f32.mrf.mxu1  ;;  %5473 = vmatpush1.bf16.msra.mxu0 %v7173_v5  ;;  %v7229_v5 = vld [vmem:[#allocation8 + $0x5ac] ss:$16 sps:$4 sm:$0xff]  }
 0x2f5   :  { %v3551_v19 = vadd.f32 %v3550_v18, %v3508_v11  ;;  %5474 = vmatprep.subr.bf16.mxu0 %v7181_v10  ;;  %v3592_v35 = vadd.f32 %v3591_v41, %v3549_v14  ;;  %v3595_v26 = vpop.f32.mrf.mxu0  ;;  %v3620_v30 = vmul.f32 0.2, %v3590_v22  ;;  %vm3604_vm14 = vcmp.ge.f32.partialorder %v3590_v22, 0.0  ;;  %v7235_v41 = vld [vmem:[#allocation8 + $0x58c] ss:$16 sps:$4 sm:$0xff]  }
 0x2f6   :  { %v3552_v45 = vpop.f32.mrf.mxu1  ;;  %v7224_v10 = vld [vmem:[#allocation8 + $0x228] ss:$16 sps:$4 sm:$0xff]   ;;  %v7232_v62 = vld [vmem:[#allocation8 + $0x20c] ss:$16 sps:$4 sm:$0xff]  }
 0x2f7   :  { %v3594_v17 = vadd.f32 %v3593_v23, %v3551_v19  ;;  %v3553_v54 = vadd.f32 %v3552_v45, %v3510_v50  ;;  %v3621_v28 = vmul.f32 0.2, %v3592_v35  ;;  %vm3605_vm13 = vcmp.ge.f32.partialorder %v3592_v35, 0.0  ;;  %v7233_v11 = vld [vmem:[#allocation8 + $0x588] ss:$16 sps:$4 sm:$0xff]  }
 0x2f8   :  { %5475 = vmatpush1.bf16.msra.mxu0 %v7179_v46  ;;  %v3636_v59 = vsel %vm3604_vm14, %v3590_v22, %v3620_v30  ;;  %v7241_v12 = vld [vmem:[#allocation8 + $0x56c] ss:$16 sps:$4 sm:$0xff]   ;;  %v7230_v14 = vld [vmem:[#allocation8 + $0x208] ss:$16 sps:$4 sm:$0xff]  }
 0x2f9   :  { %v3628_v24 = vmul.f32 0.2, %v3594_v17  ;;  %5476 = vmatprep.subr.bf16.mxu0 %v7187_v32  ;;  %vm3612_vm12 = vcmp.ge.f32.partialorder %v3594_v17, 0.0  ;;  %v3596_v38 = vadd.f32 %v3595_v26, %v3553_v54  ;;  %v3637_v40 = vsel %vm3605_vm13, %v3592_v35, %v3621_v28  ;;  %v7239_v18 = vld [vmem:[#allocation8 + $0x568] ss:$16 sps:$4 sm:$0xff]  }
 0x2fa   :  { %v7247_v46 = vld [vmem:[#allocation8 + $0x54c] ss:$16 sps:$4 sm:$0xff]   ;;  %v7236_v19 = vld [vmem:[#allocation8 + $0x3e8] ss:$16 sps:$4 sm:$0xff]  }
 0x2fb   :  { %vm3613_vm15 = vcmp.ge.f32.partialorder %v3596_v38, 0.0  ;;  %v3629_v33 = vmul.f32 0.2, %v3596_v38  ;;  %v3644_v34 = vsel %vm3612_vm12, %v3594_v17, %v3628_v24  ;;  %v7244_v23 = vld [vmem:[#allocation8 + $0x3cc] ss:$16 sps:$4 sm:$0xff]   ;;  %vm6121_vm12 = vcmask 7168  }
 0x2fc   :  { %5477 = vmatpush1.bf16.msra.mxu0 %v7185_v53  ;;  %v7868_v49 = vpack.c.bf16 %v3644_v34, %v3636_v59  ;;  %v7245_v32 = vld [vmem:[#allocation8 + $0x548] ss:$16 sps:$4 sm:$0xff]   ;;  %v7253_v50 = vld [vmem:[#allocation8 + $0x52c] ss:$16 sps:$4 sm:$0xff]  }
 0x2fd   :  { %5478 = vmatprep.subr.bf16.mxu0 %v7193_v21  ;;  %v3645_v8 = vsel %vm3613_vm15, %v3596_v38, %v3629_v33  ;;  %v7242_v35 = vld [vmem:[#allocation8 + $0x3c8] ss:$16 sps:$4 sm:$0xff]   ;;  %v7250_v45 = vld [vmem:[#allocation8 + $0x3ac] ss:$16 sps:$4 sm:$0xff]  }
 0x2fe   :  { %v7866_v43 = vpack.c.bf16 %v3645_v8, %v3637_v40  ;;  %v7251_v22 = vld [vmem:[#allocation8 + $0x528] ss:$16 sps:$4 sm:$0xff]   ;;  %v7259_v17 = vld [vmem:[#allocation8 + $0x50c] ss:$16 sps:$4 sm:$0xff]  }
 0x2ff   :  { %v7248_v54 = vld [vmem:[#allocation8 + $0x3a8] ss:$16 sps:$4 sm:$0xff]   ;;  %v7256_v53 = vld [vmem:[#allocation8 + $0x38c] ss:$16 sps:$4 sm:$0xff]  }
 0x300   :  { %5479 = vmatpush1.bf16.msra.mxu0 %v7191_v48  ;;  %5373 = vmatprep.mubr.bf16.mxu1 %v7866_v43  ;;  %v7257_v24 = vld [vmem:[#allocation8 + $0x508] ss:$16 sps:$4 sm:$0xff]   ;;  %v7262_v28 = vld [vmem:[#allocation8 + $0x36c] ss:$16 sps:$4 sm:$0xff]  }
 0x301   :  { %5480 = vmatprep.subr.bf16.mxu0 %v7199_v36  ;;  %5374 = vmatmul.mubr.bf16.vlgmr.msra.gmra.mxu1 %v7868_v49  ;;  %v7322_v26 = vld [vmem:[#allocation11 + $0x74] ss:$8 sps:$4 sm:$0xff]   ;;  %v7320_v38 = vld [vmem:[#allocation11 + $0x70] ss:$8 sps:$4 sm:$0xff]   ;;  %v7325_v30 = vld [vmem:[#allocation11 + $0x64] ss:$8 sps:$4 sm:$0xff]  }
 0x302   :  { %5428 = vmatpush1.bf16.msra.mxu1 %v7188_v44  ;;  %5459 = vmatprep.mubr.bf16.mxu1 %v7831_v61  ;;  %v7214_v61 = vld [vmem:[#allocation8 + $0x26c] ss:$16 sps:$4 sm:$0xff]   ;;  %v7254_v21 = vld [vmem:[#allocation8 + $0x388] ss:$16 sps:$4 sm:$0xff]  }
 0x303   :  { %5429 = vmatprep.subr.bf16.mxu1 %v7196_v39  ;;  %v7260_v33 = vld [vmem:[#allocation8 + $0x368] ss:$16 sps:$4 sm:$0xff]   ;;  %v7265_v48 = vld [vmem:[#allocation8 + $0x34c] ss:$16 sps:$4 sm:$0xff]  }
 0x304   :  { %5481 = vmatpush1.bf16.msra.mxu0 %v7197_v47  ;;  %v7323_v34 = vld [vmem:[#allocation11 + $0x60] ss:$8 sps:$4 sm:$0xff]   ;;  %v7328_v36 = vld [vmem:[#allocation11 + $0x54] ss:$8 sps:$4 sm:$0xff]   ;;  %v7326_v59 = vld [vmem:[#allocation11 + $0x50] ss:$8 sps:$4 sm:$0xff]  }
 0x305   :  { %5482 = vmatprep.subr.bf16.mxu0 %v7205_v52  ;;  %v7263_v40 = vld [vmem:[#allocation8 + $0x348] ss:$16 sps:$4 sm:$0xff]   ;;  %v7268_v8 = vld [vmem:[#allocation8 + $0x32c] ss:$16 sps:$4 sm:$0xff]  }
 0x306   :  { %5430 = vmatpush1.bf16.msra.mxu1 %v7194_v13  ;;  %v7331_v44 = vld [vmem:[#allocation11 + $0x44] ss:$8 sps:$4 sm:$0xff]   ;;  %v7271_v47 = vld [vmem:[#allocation8 + $0x30c] ss:$16 sps:$4 sm:$0xff]   ;;  %v7334_v52 = vld [vmem:[#allocation11 + $0x34] ss:$8 sps:$4 sm:$0xff]  }
 0x307   :  { %5431 = vmatprep.subr.bf16.mxu1 %v7202_v9  ;;  %v7266_v39 = vld [vmem:[#allocation8 + $0x328] ss:$16 sps:$4 sm:$0xff]   ;;  %v7274_v9 = vld [vmem:[#allocation8 + $0x6ec] ss:$16 sps:$4 sm:$0xff]  }
 0x308   :  { %5483 = vmatpush1.bf16.msra.mxu0 %v7203_v51  ;;  %v7269_v13 = vld [vmem:[#allocation8 + $0x308] ss:$16 sps:$4 sm:$0xff]   ;;  %v7332_v51 = vld [vmem:[#allocation11 + $0x30] ss:$8 sps:$4 sm:$0xff]  }
 0x309   :  { %5484 = vmatprep.subr.bf16.mxu0 %v7211_v16  ;;  %v7337_v16 = vld [vmem:[#allocation11 + $0x24] ss:$8 sps:$4 sm:$0xff]  }
 0x30a   :  { %5432 = vmatpush1.bf16.msra.mxu1 %v7200_v1  ;;  %v7272_v1 = vld [vmem:[#allocation8 + $0x6e8] ss:$16 sps:$4 sm:$0xff]  }
 0x30b   :  { %5433 = vmatprep.subr.bf16.mxu1 %v7208_v2  ;;  %v7277_v2 = vld [vmem:[#allocation8 + $0x6cc] ss:$16 sps:$4 sm:$0xff]  }
 0x30c   :  { %5485 = vmatpush1.bf16.msra.mxu0 %v7209_v55  ;;  %v7335_v55 = vld [vmem:[#allocation11 + $0x20] ss:$8 sps:$4 sm:$0xff]  }
 0x30d   :  { %5486 = vmatprep.subr.bf16.mxu0 %v7217_v58  ;;  %v7340_v58 = vld [vmem:[#allocation11 + $0x14] ss:$8 sps:$4 sm:$0xff]  }
 0x30e   :  { %5434 = vmatpush1.bf16.msra.mxu1 %v7206_v25  ;;  %v7275_v25 = vld [vmem:[#allocation8 + $0x6c8] ss:$16 sps:$4 sm:$0xff]  }
 0x30f   :  { %5435 = vmatprep.subr.bf16.mxu1 %v7214_v61  ;;  %v7280_v61 = vld [vmem:[#allocation8 + $0x6ac] ss:$16 sps:$4 sm:$0xff]  }
 0x310   :  { %5487 = vmatpush2.bf16.msra.mxu0 %v7215_v63  ;;  %v7338_v63 = vld [vmem:[#allocation11 + $0x10] ss:$8 sps:$4 sm:$0xff]  }
 0x311   :  { %5488 = vmatprep.subr.bf16.mxu0 %v7223_v42  ;;  %v7343_v42 = vld [vmem:[#allocation11 + $0x4] ss:$8 sps:$4 sm:$0xff]  }
 0x312   :  { %5436 = vmatpush1.bf16.msra.mxu1 %v7212_v3  ;;  %v7278_v3 = vld [vmem:[#allocation8 + $0x6a8] ss:$16 sps:$4 sm:$0xff]  }
 0x313   :  { %5437 = vmatprep.subr.bf16.mxu1 %v7220_v4  ;;  %v7283_v4 = vld [vmem:[#allocation8 + $0x68c] ss:$16 sps:$4 sm:$0xff]  }
 0x314   :  { %5489 = vmatpush2.bf16.msra.mxu0 %v7221_v57  ;;  %v7341_v57 = vld [vmem:[#allocation11] ss:$8 sps:$4 sm:$0xff]  }
 0x315   :  { %5490 = vmatprep.subr.bf16.mxu0 %v7229_v5  ;;  %v7346_v5 = vld [vmem:[#allocation11 + $0xf4] ss:$8 sps:$4 sm:$0xff]  }
 0x316   :  { %5438 = vmatpush1.bf16.msra.mxu1 %v7218_v60  ;;  %v7286_v60 = vld [vmem:[#allocation8 + $0x66c] ss:$16 sps:$4 sm:$0xff]  }
 0x317   :  { %5439 = vmatprep.subr.bf16.mxu1 %v7226_v6  ;;  %v7349_v6 = vld [vmem:[#allocation11 + $0xe4] ss:$8 sps:$4 sm:$0xff]  }
 0x318   :  { %5491 = vmatpush2.bf16.msra.mxu0 %v7227_v15  ;;  %v7284_v15 = vld [vmem:[#allocation8 + $0x668] ss:$16 sps:$4 sm:$0xff]  }
 0x319   :  { %5492 = vmatprep.subr.bf16.mxu0 %v7235_v41  ;;  %v7289_v41 = vld [vmem:[#allocation8 + $0x64c] ss:$16 sps:$4 sm:$0xff]  }
 0x31a   :  { %5440 = vmatpush1.bf16.msra.mxu1 %v7224_v10  ;;  %v7347_v10 = vld [vmem:[#allocation11 + $0xe0] ss:$8 sps:$4 sm:$0xff]  }
 0x31b   :  { %5441 = vmatprep.subr.bf16.mxu1 %v7232_v62  ;;  %v7352_v62 = vld [vmem:[#allocation11 + $0xd4] ss:$8 sps:$4 sm:$0xff]  }
 0x31c   :  { %5493 = vmatpush2.bf16.msra.mxu0 %v7233_v11  ;;  %v7287_v11 = vld [vmem:[#allocation8 + $0x648] ss:$16 sps:$4 sm:$0xff]  }
 0x31d   :  { %5494 = vmatprep.subr.bf16.mxu0 %v7241_v12  ;;  %v7292_v12 = vld [vmem:[#allocation8 + $0x62c] ss:$16 sps:$4 sm:$0xff]  }
 0x31e   :  { %5442 = vmatpush1.bf16.msra.mxu1 %v7230_v14  ;;  %v7350_v14 = vld [vmem:[#allocation11 + $0xd0] ss:$8 sps:$4 sm:$0xff]  }
 0x31f   :  { %5443 = vmatprep.subr.bf16.mxu1 %v7238_v56  ;;  %v7355_v56 = vld [vmem:[#allocation11 + $0xc4] ss:$8 sps:$4 sm:$0xff]  }
 0x320   :  { %5495 = vmatpush2.bf16.msra.mxu0 %v7239_v18  ;;  %v7290_v18 = vld [vmem:[#allocation8 + $0x628] ss:$16 sps:$4 sm:$0xff]  }
 0x321   :  { %5496 = vmatprep.subr.bf16.mxu0 %v7247_v46  ;;  %v7295_v46 = vld [vmem:[#allocation8 + $0x60c] ss:$16 sps:$4 sm:$0xff]  }
 0x322   :  { %5444 = vmatpush2.bf16.msra.mxu1 %v7236_v19  ;;  %v7353_v19 = vld [vmem:[#allocation11 + $0xc0] ss:$8 sps:$4 sm:$0xff]  }
 0x323   :  { %5445 = vmatprep.subr.bf16.mxu1 %v7244_v23  ;;  %v7358_v23 = vld [vmem:[#allocation11 + $0xb4] ss:$8 sps:$4 sm:$0xff]  }
 0x324   :  { %5497 = vmatpush2.bf16.msra.mxu0 %v7245_v32  ;;  %v7293_v32 = vld [vmem:[#allocation8 + $0x608] ss:$16 sps:$4 sm:$0xff]  }
 0x325   :  { %5498 = vmatprep.subr.bf16.mxu0 %v7253_v50  ;;  %v7298_v50 = vld [vmem:[#allocation8 + $0x7ec] ss:$16 sps:$4 sm:$0xff]  }
 0x326   :  { %5446 = vmatpush2.bf16.msra.mxu1 %v7242_v35  ;;  %v7356_v35 = vld [vmem:[#allocation11 + $0xb0] ss:$8 sps:$4 sm:$0xff]  }
 0x327   :  { %5447 = vmatprep.subr.bf16.mxu1 %v7250_v45  ;;  %v7361_v45 = vld [vmem:[#allocation11 + $0xa4] ss:$8 sps:$4 sm:$0xff]  }
 0x328   :  { %5499 = vmatpush2.bf16.msra.mxu0 %v7251_v22  ;;  %v7296_v22 = vld [vmem:[#allocation8 + $0x7e8] ss:$16 sps:$4 sm:$0xff]  }
 0x329   :  { %5500 = vmatprep.subr.bf16.mxu0 %v7259_v17  ;;  %v7301_v17 = vld [vmem:[#allocation8 + $0x7cc] ss:$16 sps:$4 sm:$0xff]  }
 0x32a   :  { %5448 = vmatpush2.bf16.msra.mxu1 %v7248_v54  ;;  %v7359_v54 = vld [vmem:[#allocation11 + $0xa0] ss:$8 sps:$4 sm:$0xff]  }
 0x32b   :  { %5449 = vmatprep.subr.bf16.mxu1 %v7256_v53  ;;  %v7364_v53 = vld [vmem:[#allocation11 + $0x94] ss:$8 sps:$4 sm:$0xff]  }
 0x32c   :  { %5501 = vmatpush2.bf16.msra.mxu0 %v7257_v24  ;;  %v7299_v24 = vld [vmem:[#allocation8 + $0x7c8] ss:$16 sps:$4 sm:$0xff]  }
 0x32d   :  { %5980 = vmatprep.subr.bf16.mxu0 %v7322_v26  ;;  %v7304_v26 = vld [vmem:[#allocation8 + $0x7ac] ss:$16 sps:$4 sm:$0xff]  }
 0x32e   :  { %5450 = vmatpush2.bf16.msra.mxu1 %v7254_v21  ;;  %v7362_v21 = vld [vmem:[#allocation11 + $0x90] ss:$8 sps:$4 sm:$0xff]  }
 0x32f   :  { %5503 = vmatmul.mubr.bf16.vlgmr.msra.gmra.mxu0 %v7856_v7  ;;  %5451 = vmatprep.subr.bf16.mxu1 %v7262_v28  ;;  %v7329_v7 = vld [vmem:[#allocation11 + $0x40] ss:$8 sps:$4 sm:$0xff]   ;;  %v7367_v28 = vld [vmem:[#allocation11 + $0x84] ss:$8 sps:$4 sm:$0xff]  }
 0x330   :  { %5981 = vmatpush1.bf16.msra.mxu0 %v7320_v38  ;;  %v7302_v38 = vld [vmem:[#allocation8 + $0x7a8] ss:$16 sps:$4 sm:$0xff]  }
 0x331   :  { %5982 = vmatprep.subr.bf16.mxu0 %v7325_v30  ;;  %v7307_v30 = vld [vmem:[#allocation8 + $0x78c] ss:$16 sps:$4 sm:$0xff]  }
 0x332   :  { %5452 = vmatpush2.bf16.msra.mxu1 %v7260_v33  ;;  %v7365_v33 = vld [vmem:[#allocation11 + $0x80] ss:$8 sps:$4 sm:$0xff]  }
 0x333   :  { %5453 = vmatprep.subr.bf16.mxu1 %v7265_v48  ;;  %v7305_v48 = vld [vmem:[#allocation8 + $0x788] ss:$16 sps:$4 sm:$0xff]  }
 0x334   :  { %5983 = vmatpush1.bf16.msra.mxu0 %v7323_v34  ;;  %v7310_v34 = vld [vmem:[#allocation8 + $0x76c] ss:$16 sps:$4 sm:$0xff]  }
 0x335   :  { %5984 = vmatprep.subr.bf16.mxu0 %v7328_v36  ;;  %v7308_v36 = vld [vmem:[#allocation8 + $0x768] ss:$16 sps:$4 sm:$0xff]  }
 0x336   :  { %5454 = vmatpush2.bf16.msra.mxu1 %v7263_v40  ;;  %v7313_v40 = vld [vmem:[#allocation8 + $0x74c] ss:$16 sps:$4 sm:$0xff]  }
 0x337   :  { %5455 = vmatprep.subr.bf16.mxu1 %v7268_v8  ;;  %v7311_v8 = vld [vmem:[#allocation8 + $0x748] ss:$16 sps:$4 sm:$0xff]  }
 0x338   :  { %5985 = vmatpush1.bf16.msra.mxu0 %v7326_v59  ;;  %v7316_v59 = vld [vmem:[#allocation8 + $0x72c] ss:$16 sps:$4 sm:$0xff]  }
 0x339   :  { %5986 = vmatprep.subr.bf16.mxu0 %v7331_v44  ;;  %v7314_v44 = vld [vmem:[#allocation8 + $0x728] ss:$16 sps:$4 sm:$0xff]  }
 0x33a   :  { %5456 = vmatpush2.bf16.msra.mxu1 %v7266_v39  ;;  %v7319_v39 = vld [vmem:[#allocation8 + $0x70c] ss:$16 sps:$4 sm:$0xff]  }
 0x33b   :  { %5457 = vmatprep.subr.bf16.mxu1 %v7271_v47  ;;  %v7317_v47 = vld [vmem:[#allocation8 + $0x708] ss:$16 sps:$4 sm:$0xff]  }
 0x33c   :  { %5987 = vmatpush1.bf16.msra.mxu0 %v7329_v7  ;;  %v7368_v7 = vld [vmem:[#allocation11 + $0x170] ss:$8 sps:$4 sm:$0xff]  }
 0x33d   :  { %5988 = vmatprep.subr.bf16.mxu0 %v7334_v52  ;;  %v7370_v52 = vld [vmem:[#allocation11 + $0x174] ss:$8 sps:$4 sm:$0xff]  }
 0x33e   :  { %5458 = vmatpush2.bf16.msra.mxu1 %v7269_v13  ;;  %v7373_v13 = vld [vmem:[#allocation11 + $0x164] ss:$8 sps:$4 sm:$0xff]  }
 0x33f   :  { %5513 = vmatprep.subr.bf16.mxu1 %v7274_v9  ;;  %v7371_v9 = vld [vmem:[#allocation11 + $0x160] ss:$8 sps:$4 sm:$0xff]  }
 0x340   :  { %5989 = vmatpush1.bf16.msra.mxu0 %v7332_v51  ;;  %v7376_v51 = vld [vmem:[#allocation11 + $0x154] ss:$8 sps:$4 sm:$0xff]  }
 0x341   :  { %5990 = vmatprep.subr.bf16.mxu0 %v7337_v16  ;;  %5460 = vmatmul.mubr.bf16.vlgmr.msra.gmra.mxu1 %v7815_v29  ;;  %v7281_v29 = vld [vmem:[#allocation8 + $0x688] ss:$16 sps:$4 sm:$0xff]   ;;  %v7374_v16 = vld [vmem:[#allocation11 + $0x150] ss:$8 sps:$4 sm:$0xff]  }
 0x342   :  { %5514 = vmatpush1.bf16.msra.mxu1 %v7272_v1  ;;  %5545 = vmatprep.mubr.bf16.mxu1 %v7866_v43  ;;  %v7344_v43 = vld [vmem:[#allocation11 + $0xf0] ss:$8 sps:$4 sm:$0xff]   ;;  %v7379_v1 = vld [vmem:[#allocation11 + $0x144] ss:$8 sps:$4 sm:$0xff]  }
 0x343   :  { %5515 = vmatprep.subr.bf16.mxu1 %v7277_v2  ;;  %v7377_v2 = vld [vmem:[#allocation11 + $0x140] ss:$8 sps:$4 sm:$0xff]  }
 0x344   :  { %5991 = vmatpush1.bf16.msra.mxu0 %v7335_v55  ;;  %v7382_v55 = vld [vmem:[#allocation11 + $0x134] ss:$8 sps:$4 sm:$0xff]  }
 0x345   :  { %5992 = vmatprep.subr.bf16.mxu0 %v7340_v58  ;;  %v7380_v58 = vld [vmem:[#allocation11 + $0x130] ss:$8 sps:$4 sm:$0xff]  }
 0x346   :  { %5516 = vmatpush1.bf16.msra.mxu1 %v7275_v25  ;;  %v7383_v25 = vld [vmem:[#allocation11 + $0x120] ss:$8 sps:$4 sm:$0xff]  }
 0x347   :  { %5517 = vmatprep.subr.bf16.mxu1 %v7280_v61  ;;  %v7388_v61 = vld [vmem:[#allocation11 + $0x114] ss:$8 sps:$4 sm:$0xff]  }
 0x348   :  { %5993 = vmatpush1.bf16.msra.mxu0 %v7338_v63  ;;  %v7386_v63 = vld [vmem:[#allocation11 + $0x110] ss:$8 sps:$4 sm:$0xff]  }
 0x349   :  { %5994 = vmatprep.subr.bf16.mxu0 %v7343_v42  ;;  %v7391_v42 = vld [vmem:[#allocation11 + $0x104] ss:$8 sps:$4 sm:$0xff]  }
 0x34a   :  { %5518 = vmatpush1.bf16.msra.mxu1 %v7278_v3  ;;  %v7389_v3 = vld [vmem:[#allocation11 + $0x100] ss:$8 sps:$4 sm:$0xff]  }
 0x34b   :  { %5519 = vmatprep.subr.bf16.mxu1 %v7283_v4  ;;  %v7394_v4 = vld [vmem:[#allocation11 + $0x1f4] ss:$8 sps:$4 sm:$0xff]  }
 0x34c   :  { %5995 = vmatpush1.bf16.msra.mxu0 %v7341_v57  ;;  %v7392_v57 = vld [vmem:[#allocation11 + $0x1f0] ss:$8 sps:$4 sm:$0xff]  }
 0x34d   :  { %5996 = vmatprep.subr.bf16.mxu0 %v7346_v5  ;;  %v7397_v5 = vld [vmem:[#allocation11 + $0x1e4] ss:$8 sps:$4 sm:$0xff]  }
 0x34e   :  { %5520 = vmatpush1.bf16.msra.mxu1 %v7281_v29  ;;  %v5246_v29 = vpop.f32.mrf.mxu0 }
 0x34f   :  { %5521 = vmatprep.subr.bf16.mxu1 %v7286_v60  ;;  %v7395_v60 = vld [vmem:[#allocation11 + $0x1e0] ss:$8 sps:$4 sm:$0xff]  }
 0x350   :  { %5997 = vmatpush2.bf16.msra.mxu0 %v7344_v43  ;;  %v7400_v43 = vld [vmem:[#allocation11 + $0x1d4] ss:$8 sps:$4 sm:$0xff]  }
 0x351   :  { %5998 = vmatprep.subr.bf16.mxu0 %v7349_v6  ;;  %v5248_v6 = vpop.f32.mrf.mxu0 }
 0x352   :  { %5522 = vmatpush1.bf16.msra.mxu1 %v7284_v15  ;;  %v7398_v15 = vld [vmem:[#allocation11 + $0x1d0] ss:$8 sps:$4 sm:$0xff]  }
 0x353   :  { %5523 = vmatprep.subr.bf16.mxu1 %v7289_v41  ;;  %v7403_v41 = vld [vmem:[#allocation11 + $0x1c4] ss:$8 sps:$4 sm:$0xff]  }
 0x354   :  { %5999 = vmatpush2.bf16.msra.mxu0 %v7347_v10  ;;  %v5250_v10 = vpop.f32.mrf.mxu0 }
 0x355   :  { %6000 = vmatprep.subr.bf16.mxu0 %v7352_v62  ;;  %v5289_v62 = vpop.f32.mrf.mxu1 }
 0x356   :  { %5524 = vmatpush1.bf16.msra.mxu1 %v7287_v11  ;;  %v7401_v11 = vld [vmem:[#allocation11 + $0x1c0] ss:$8 sps:$4 sm:$0xff]  }
 0x357   :  { %5525 = vmatprep.subr.bf16.mxu1 %v7292_v12  ;;  %v7406_v12 = vld [vmem:[#allocation11 + $0x1b4] ss:$8 sps:$4 sm:$0xff]  }
 0x358   :  { %6001 = vmatpush2.bf16.msra.mxu0 %v7350_v14  ;;  %v5252_v14 = vpop.f32.mrf.mxu0 }
 0x359   :  { %6002 = vmatprep.subr.bf16.mxu0 %v7355_v56  ;;  %v7877_v56 = vld [vmem:[#allocation10] sm:$0xf] }
 0x35a   :  { %5526 = vmatpush1.bf16.msra.mxu1 %v7290_v18  ;;  %v5291_v18 = vpop.f32.mrf.mxu1 }
 0x35b   :  { %5527 = vmatprep.subr.bf16.mxu1 %v7295_v46 }
 0x35c   :  { %6003 = vmatpush2.bf16.msra.mxu0 %v7353_v19  ;;  %v7404_v19 = vld [vmem:[#allocation11 + $0x1b0] ss:$8 sps:$4 sm:$0xff]  }
 0x35d   :  { %6004 = vmatprep.subr.bf16.mxu0 %v7358_v23  ;;  %v3919_v23 = vrot.slane %v7877_v56, %v7802_v20 }
 0x35e   :  { %5528 = vmatpush1.bf16.msra.mxu1 %v7293_v32  ;;  %v3915_v32 = vrot.slane %v7877_v56, %v7735_v37 }
 0x35f   :  { %5529 = vmatprep.subr.bf16.mxu1 %v7298_v50  ;;  %v5293_v50 = vpop.f32.mrf.mxu1 }
 0x360   :  { %6005 = vmatpush2.bf16.msra.mxu0 %v7356_v35 }
 0x361   :  { %6006 = vmatprep.subr.bf16.mxu0 %v7361_v45  ;;  %v5249_v45 = vadd.f32 %v5248_v6, %v3919_v23 }
 0x362   :  { %5530 = vmatpush2.bf16.msra.mxu1 %v7296_v22  ;;  %v5247_v22 = vadd.f32 %v5246_v29, %v3915_v32 }
 0x363   :  { %5531 = vmatprep.subr.bf16.mxu1 %v7301_v17  ;;  %v5251_v17 = vadd.f32 %v5250_v10, %v3915_v32  ;;  %v3923_v10 = vrot.slane %v7877_v56, %v604_v0 }
 0x364   :  { %6007 = vmatpush2.bf16.msra.mxu0 %v7359_v54  ;;  %v5295_v54 = vpop.f32.mrf.mxu1 }
 0x365   :  { %6008 = vmatprep.subr.bf16.mxu0 %v7364_v53 }
 0x366   :  { %5532 = vmatpush2.bf16.msra.mxu1 %v7299_v24  ;;  %v5292_v24 = vadd.f32 %v5291_v18, %v5249_v45 }
 0x367   :  { %5533 = vmatprep.subr.bf16.mxu1 %v7304_v26  ;;  %v5253_v26 = vadd.f32 %v5252_v14, %v3919_v23 }
 0x368   :  { %6009 = vmatpush2.bf16.msra.mxu0 %v7362_v21  ;;  %v5290_v21 = vadd.f32 %v5289_v62, %v5247_v22 }
 0x369   :  { %6010 = vmatprep.subr.bf16.mxu0 %v7367_v28 }
 0x36a   :  { %5534 = vmatpush2.bf16.msra.mxu1 %v7302_v38  ;;  %v5294_v38 = vadd.f32 %v5293_v50, %v5251_v17 }
 0x36b   :  { %5535 = vmatprep.subr.bf16.mxu1 %v7307_v30 }
 0x36c   :  { %6011 = vmatpush2.bf16.msra.mxu0 %v7365_v33  ;;  %v7409_v33 = vld [vmem:[#allocation11 + $0x1a4] ss:$8 sps:$4 sm:$0xff]  }
 0x36e   :  { %5536 = vmatpush2.bf16.msra.mxu1 %v7305_v48 }
 0x36f   :  { %5537 = vmatprep.subr.bf16.mxu1 %v7310_v34  ;;  %v5332_v46 = vpop.f32.mrf.mxu0 }
 0x370   :  { %v5333_v48 = vadd.f32 %v5332_v46, %v5290_v21 }
 0x371   :  { %v5334_v35 = vpop.f32.mrf.mxu0 }
 0x372   :  { %5538 = vmatpush2.bf16.msra.mxu1 %v7308_v36  ;;  %v5335_v30 = vadd.f32 %v5334_v35, %v5292_v24 }
 0x373   :  { %5539 = vmatprep.subr.bf16.mxu1 %v7313_v40  ;;  %v5336_v53 = vpop.f32.mrf.mxu0  ;;  %v7407_v40 = vld [vmem:[#allocation11 + $0x1a0] ss:$8 sps:$4 sm:$0xff]  }
 0x375   :  { %v5338_v34 = vpop.f32.mrf.mxu0 }
 0x376   :  { %5540 = vmatpush2.bf16.msra.mxu1 %v7311_v8  ;;  %v5296_v8 = vadd.f32 %v5295_v54, %v5253_v26 }
 0x377   :  { %5541 = vmatprep.subr.bf16.mxu1 %v7316_v59  ;;  %v5337_v59 = vadd.f32 %v5336_v53, %v5294_v38 }
 0x37a   :  { %5542 = vmatpush2.bf16.msra.mxu1 %v7314_v44 }
 0x37b   :  { %5543 = vmatprep.subr.bf16.mxu1 %v7319_v39 }
 0x37e   :  { %5544 = vmatpush2.bf16.msra.mxu1 %v7317_v47 }
 0x37f   :  { %6023 = vmatprep.subr.bf16.mxu1 %v7370_v52 }
 0x381   :  { %5546 = vmatmul.mubr.bf16.vlgmr.msra.gmra.mxu1 %v7868_v49  ;;  %v7385_v49 = vld [vmem:[#allocation11 + $0x124] ss:$8 sps:$4 sm:$0xff]  }
 0x382   :  { %6024 = vmatpush1.bf16.msra.mxu1 %v7368_v7  ;;  %v5339_v7 = vadd.f32 %v5338_v34, %v5296_v8 }
 0x383   :  { %6025 = vmatprep.subr.bf16.mxu1 %v7373_v13  ;;  %v7412_v13 = vld [vmem:[#allocation11 + $0x194] ss:$8 sps:$4 sm:$0xff]  }
 0x386   :  { %6026 = vmatpush1.bf16.msra.mxu1 %v7371_v9 }
 0x387   :  { %6027 = vmatprep.subr.bf16.mxu1 %v7376_v51  ;;  %v7410_v51 = vld [vmem:[#allocation11 + $0x190] ss:$8 sps:$4 sm:$0xff]  }
 0x38a   :  { %6028 = vmatpush1.bf16.msra.mxu1 %v7374_v16 }
 0x38b   :  { %6029 = vmatprep.subr.bf16.mxu1 %v7379_v1 }
 0x38e   :  { %6030 = vmatpush1.bf16.msra.mxu1 %v7377_v2 }
 0x38f   :  { %6031 = vmatprep.subr.bf16.mxu1 %v7382_v55 }
 0x392   :  { %6032 = vmatpush1.bf16.msra.mxu1 %v7380_v58 }
 0x393   :  { %6033 = vmatprep.subr.bf16.mxu1 %v7385_v49  ;;  %v7415_v49 = vld [vmem:[#allocation11 + $0x184] ss:$8 sps:$4 sm:$0xff]  }
 0x396   :  { %6034 = vmatpush1.bf16.msra.mxu1 %v7383_v25 }
 0x397   :  { %6035 = vmatprep.subr.bf16.mxu1 %v7388_v61  ;;  %v7413_v61 = vld [vmem:[#allocation11 + $0x180] ss:$8 sps:$4 sm:$0xff]  }
 0x39a   :  { %6036 = vmatpush1.bf16.msra.mxu1 %v7386_v63 }
 0x39b   :  { %6037 = vmatprep.subr.bf16.mxu1 %v7391_v42 }
 0x39e   :  { %6038 = vmatpush1.bf16.msra.mxu1 %v7389_v3 }
 0x39f   :  { %6039 = vmatprep.subr.bf16.mxu1 %v7394_v4 }
 0x3a2   :  { %6040 = vmatpush2.bf16.msra.mxu1 %v7392_v57 }
 0x3a3   :  { %6041 = vmatprep.subr.bf16.mxu1 %v7397_v5 }
 0x3a6   :  { %6042 = vmatpush2.bf16.msra.mxu1 %v7395_v60 }
 0x3a7   :  { %6043 = vmatprep.subr.bf16.mxu1 %v7400_v43 }
 0x3aa   :  { %6044 = vmatpush2.bf16.msra.mxu1 %v7398_v15 }
 0x3ab   :  { %6045 = vmatprep.subr.bf16.mxu1 %v7403_v41  ;;  %v3927_v41 = vrot.slane %v7877_v56, %v608_v31 }
 0x3ae   :  { %6046 = vmatpush2.bf16.msra.mxu1 %v7401_v11 }
 0x3af   :  { %6047 = vmatprep.subr.bf16.mxu1 %v7406_v12  ;;  %v5418_v5 = vpop.f32.mrf.mxu0 }
 0x3b0   :  { %v5419_v14 = vadd.f32 %v5418_v5, %v3923_v10 }
 0x3b1   :  { %v5420_v29 = vpop.f32.mrf.mxu0 }
 0x3b2   :  { %6048 = vmatpush2.bf16.msra.mxu1 %v7404_v19  ;;  %v5421_v12 = vadd.f32 %v5420_v29, %v3927_v41 }
 0x3b3   :  { %6049 = vmatprep.subr.bf16.mxu1 %v7409_v33  ;;  %v5422_v60 = vpop.f32.mrf.mxu0 }
 0x3b4   :  { %v5423_v46 = vadd.f32 %v5422_v60, %v3923_v10 }
 0x3b5   :  { %v5424_v6 = vpop.f32.mrf.mxu0 }
 0x3b6   :  { %6050 = vmatpush2.bf16.msra.mxu1 %v7407_v40  ;;  %v5425_v50 = vadd.f32 %v5424_v6, %v3927_v41 }
 0x3b7   :  { %6051 = vmatprep.subr.bf16.mxu1 %v7412_v13 }
 0x3ba   :  { %6052 = vmatpush2.bf16.msra.mxu1 %v7410_v51 }
 0x3bb   :  { %6053 = vmatprep.subr.bf16.mxu1 %v7415_v49 }
 0x3be   :  { %6054 = vmatpush2.bf16.msra.mxu1 %v7413_v61 }
 0x3c1   :  { %v5375_v28 = vpop.f32.mrf.mxu1 }
 0x3c2   :  { %v5376_v39 = vadd.f32 %v5375_v28, %v5333_v48 }
 0x3c3   :  { %v5377_v36 = vpop.f32.mrf.mxu1 }
 0x3c4   :  { %v5378_v44 = vadd.f32 %v5377_v36, %v5335_v30  ;;  %v5564_v55 = vmul.f32 0.2, %v5376_v39  ;;  %vm5556_vm2 = vcmp.ge.f32.partialorder %v5376_v39, 0.0 }
 0x3c5   :  { %v5379_v47 = vpop.f32.mrf.mxu1 }
 0x3c6   :  { %v5380_v52 = vadd.f32 %v5379_v47, %v5337_v59  ;;  %v5565_v16 = vmul.f32 0.2, %v5378_v44  ;;  %vm5557_vm1 = vcmp.ge.f32.partialorder %v5378_v44, 0.0  ;;  %v5572_v3 = vsel %vm5556_vm2, %v5376_v39, %v5564_v55 }
 0x3c7   :  { %v5381_v9 = vpop.f32.mrf.mxu1 }
 0x3c8   :  { %vm5560_vm0 = vcmp.ge.f32.partialorder %v5380_v52, 0.0  ;;  %v5568_v1 = vmul.f32 0.2, %v5380_v52  ;;  %v5382_v2 = vadd.f32 %v5381_v9, %v5339_v7  ;;  %v5573_v63 = vsel %vm5557_vm1, %v5378_v44, %v5565_v16 }
 0x3ca   :  { %vm5561_vm3 = vcmp.ge.f32.partialorder %v5382_v2, 0.0  ;;  %v5569_v58 = vmul.f32 0.2, %v5382_v2  ;;  %v5576_v25 = vsel %vm5560_vm0, %v5380_v52, %v5568_v1  ;;  %v5648_v52 = vld [vmem:[#allocation13] sm:$0x3] }
 0x3cb   :  { %v5580_v57 = vpack.c.bf16 %v5576_v25, %v5572_v3  ;;  %v5653_v9 = vrot.slane %v5648_v52, %v7735_v37  ;;  %v5657_v51 = vrot.slane %v5648_v52, %v7802_v20  ;;  %v6078_v25 = vld [vmem:[#allocation14] sm:$0x3] }
 0x3cc   :  { %v5577_v42 = vsel %vm5561_vm3, %v5382_v2, %v5569_v58  ;;  %v6083_v5 = vrot.slane %v6078_v25, %v7735_v37  ;;  %v6087_v29 = vrot.slane %v6078_v25, %v7802_v20 }
 0x3cd   :  { %v5581_v4 = vpack.c.bf16 %v5577_v42, %v5573_v63 }
 0x3cf   :  { %6012 = vmatprep.mubr.bf16.mxu0 %v5581_v4 }
 0x3d0   :  { %6013 = vmatmul.mubr.bf16.vlgmr.msra.gmra.mxu0 %v5580_v57 }
 0x3ef   :  { %v5504_v62 = vpop.f32.mrf.mxu0 }
 0x3f1   :  { %v5506_v18 = vpop.f32.mrf.mxu0 }
 0x3f3   :  { %v5508_v45 = vpop.f32.mrf.mxu0 }
 0x3f5   :  { %v5510_v0 = vpop.f32.mrf.mxu0 }
 0x401   :  { %v5461_v43 = vpop.f32.mrf.mxu1 }
 0x402   :  { %v5462_v23 = vadd.f32 %v5461_v43, %v5419_v14 }
 0x403   :  { %v5463_v15 = vpop.f32.mrf.mxu1 }
 0x404   :  { %v5464_v19 = vadd.f32 %v5463_v15, %v5421_v12  ;;  %v5505_v31 = vadd.f32 %v5504_v62, %v5462_v23 }
 0x405   :  { %v5465_v11 = vpop.f32.mrf.mxu1 }
 0x406   :  { %v5466_v35 = vadd.f32 %v5465_v11, %v5423_v46  ;;  %v5507_v54 = vadd.f32 %v5506_v18, %v5464_v19 }
 0x407   :  { %v5467_v32 = vpop.f32.mrf.mxu1 }
 0x408   :  { %v5468_v17 = vadd.f32 %v5467_v32, %v5425_v50  ;;  %v5509_v24 = vadd.f32 %v5508_v45, %v5466_v35  ;;  %v6908_v32 = vld [vmem:[#allocation2] ss:$0 sm:$0xff] }
 0x40a   :  { %v5511_v28 = vadd.f32 %v5510_v0, %v5468_v17 }
 0x441   :  { %v5547_v22 = vpop.f32.mrf.mxu1 }
 0x442   :  { %v5548_v56 = vadd.f32 %v5547_v22, %v5505_v31 }
 0x443   :  { %v5549_v53 = vpop.f32.mrf.mxu1 }
 0x444   :  { %v5550_v27 = vadd.f32 %v5549_v53, %v5507_v54  ;;  %v5566_v34 = vmul.f32 0.2, %v5548_v56  ;;  %vm5558_vm6 = vcmp.ge.f32.partialorder %v5548_v56, 0.0 }
 0x445   :  { %v5551_v26 = vpop.f32.mrf.mxu1 }
 0x446   :  { %v5552_v21 = vadd.f32 %v5551_v26, %v5509_v24  ;;  %v5567_v30 = vmul.f32 0.2, %v5550_v27  ;;  %vm5559_vm5 = vcmp.ge.f32.partialorder %v5550_v27, 0.0  ;;  %v5574_v44 = vsel %vm5558_vm6, %v5548_v56, %v5566_v34 }
 0x447   :  { %v5553_v38 = vpop.f32.mrf.mxu1 }
 0x448   :  { %vm5562_vm4 = vcmp.ge.f32.partialorder %v5552_v21, 0.0  ;;  %v5570_v33 = vmul.f32 0.2, %v5552_v21  ;;  %v5554_v48 = vadd.f32 %v5553_v38, %v5511_v28  ;;  %v5575_v8 = vsel %vm5559_vm5, %v5550_v27, %v5567_v30 }
 0x44a   :  { %vm5563_vm7 = vcmp.ge.f32.partialorder %v5554_v48, 0.0  ;;  %v5571_v36 = vmul.f32 0.2, %v5554_v48  ;;  %v5578_v40 = vsel %vm5562_vm4, %v5552_v21, %v5570_v33 }
 0x44b   :  { %v5582_v47 = vpack.c.bf16 %v5578_v40, %v5574_v44 }
 0x44c   :  { %v5579_v59 = vsel %vm5563_vm7, %v5554_v48, %v5571_v36 }
 0x44d   :  { %v5583_v39 = vpack.c.bf16 %v5579_v59, %v5575_v8 }
 0x44f   :  { %6055 = vmatprep.mubr.bf16.mxu1 %v5583_v39 }
 0x450   :  { %6056 = vmatmul.mubr.bf16.vlgmr.msra.gmra.mxu1 %v5582_v47 }
 0x490   :  { %v6014_v7 = vpop.f32.mrf.mxu0 }
 0x491   :  { %v6015_v1 = vadd.f32 %v6014_v7, %v5653_v9 }
 0x492   :  { %v6016_v13 = vpop.f32.mrf.mxu0 }
 0x493   :  { %v6017_v55 = vadd.f32 %v6016_v13, %v5657_v51 }
 0x494   :  { %v6018_v16 = vpop.f32.mrf.mxu0 }
 0x495   :  { %v6019_v63 = vadd.f32 %v6018_v16, %v5653_v9 }
 0x496   :  { %v6020_v58 = vpop.f32.mrf.mxu0 }
 0x497   :  { %v6021_v4 = vadd.f32 %v6020_v58, %v5657_v51 }
 0x510   :  { %v6057_v2 = vpop.f32.mrf.mxu1 }
 0x511   :  { %v6058_v49 = vadd.f32 %v6057_v2, %v6015_v1 }
 0x512   :  { %v6059_v61 = vpop.f32.mrf.mxu1 }
 0x513   :  { %vm6066_vm8 = vcmp.ge.f32.partialorder %v6058_v49, 0.0  ;;  %v6070_v42 = vmul.f32 0.2, %v6058_v49  ;;  %v6060_v3 = vadd.f32 %v6059_v61, %v6017_v55 }
 0x514   :  { %v6061_v57 = vpop.f32.mrf.mxu1 }
 0x515   :  { %vm6067_vm9 = vcmp.ge.f32.partialorder %v6060_v3, 0.0  ;;  %v6071_v60 = vmul.f32 0.2, %v6060_v3  ;;  %v6062_v43 = vadd.f32 %v6061_v57, %v6019_v63  ;;  %v6074_v6 = vsel %vm6066_vm8, %v6058_v49, %v6070_v42 }
 0x516   :  { %v6063_v15 = vpop.f32.mrf.mxu1  ;;  %v6090_v11 = vmul.f32 %v6083_v5, %v6074_v6 }
 0x517   :  { %vm6068_vm10 = vcmp.ge.f32.partialorder %v6062_v43, 0.0  ;;  %v6072_v41 = vmul.f32 0.2, %v6062_v43  ;;  %v6064_v10 = vadd.f32 %v6063_v15, %v6021_v4  ;;  %v6075_v62 = vsel %vm6067_vm9, %v6060_v3, %v6071_v60 }
 0x518   :  { %v6091_v12 = vmul.f32 %v6087_v29, %v6075_v62 }
 0x519   :  { %vm6069_vm11 = vcmp.ge.f32.partialorder %v6064_v10, 0.0  ;;  %v6073_v14 = vmul.f32 0.2, %v6064_v10  ;;  %v6076_v18 = vsel %vm6068_vm10, %v6062_v43, %v6072_v41 }
 0x51a   :  { %v6094_v46 = vadd.f32 %v6091_v12, %v6090_v11  ;;  %v6092_v37 = vmul.f32 %v6083_v5, %v6076_v18 }
 0x51b   :  { %v6077_v19 = vsel %vm6069_vm11, %v6064_v10, %v6073_v14 }
 0x51c   :  { %6095 = vadd.xlane.f32.xlu0 %v6094_v46  ;;  %v6093_v23 = vmul.f32 %v6087_v29, %v6077_v19 }
 0x51e   :  { %v6097_v20 = vadd.f32 %v6093_v23, %v6092_v37 }
 0x520   :  { %6098 = vadd.xlane.f32.xlu0 %v6097_v20 }
 0x5a5   :  { %v6096_v50 = vpop.xlane.xlu0 %6095 }
 0x5a6   :  { %v6107_v35 = vadd.f32 %v6908_v32, %v6096_v50 }
 0x5a8   :  { %v6109_v45 = vsub.f32 0.0, %v6107_v35 }
 0x5a9   :  { %v6099_v22 = vpop.xlane.xlu0 %6098 }
 0x5aa   :  { %v6111_v17 = vmul.f32 1.442695, %v6109_v45  ;;  %v6108_v54 = vadd.f32 %v6908_v32, %v6099_v22 }
 0x5ac   :  { %7416 = vpow2.f32 %v6111_v17  ;;  %v6110_v31 = vsub.f32 0.0, %v6108_v54 }
 0x5ae   :  { %v6113_v53 = vmul.f32 1.442695, %v6110_v31 }
 0x5b0   :  { %7418 = vpow2.f32 %v6113_v53 }
 0x5b9   :  { %v7417_v27 = vpop.eup %7416 }
 0x5ba   :  { %v6115_v24 = vadd.f32 1.0, %v7417_v27 }
 0x5bc   :  { %7420 = vrcp.f32 %v6115_v24 }
 0x5bd   :  { %v7419_v0 = vpop.eup %7418 }
 0x5be   :  { %v6116_v56 = vadd.f32 1.0, %v7419_v0 }
 0x5c0   :  { %7422 = vrcp.f32 %v6116_v56 }
 0x5c9   :  { %v7421_v26 = vpop.eup %7420 }
 0x5ca   :  { %6122 = vst.msk [vmem:[%s7908_s9] sm:$0xff] %vm6121_vm12, %v7421_v26 }
 0x5cd   :  { %v7423_v21 = vpop.eup %7422 }
 0x5ce   :  { %6123 = vst.msk [vmem:[%s7908_s9 + $0x8] sm:$0xff] %vm6121_vm12, %v7423_v21 }
 0x5cf   :  { %6128 = vsyncpa [#allocation4], 1 }
 0x5d0   :  { %6129 = vsyncpa [#allocation6], 1 }
 0x5d1   :  { %6130 = vsyncpa [#allocation9], 1 }
 0x5d2   :  { %6131 = vsyncpa [#allocation12], 1 }
 0x5d3   :  { %6132 = vsyncpa [#allocation15], 1 }

</bundles_post_ra>
